<compile_context>
chip_gen: v7x
topology: tpu7x:2x2x1
jax: 0.10.0
libtpu: 0.0.40
codegen_flags: <defaults>
</compile_context>

<pallas_src>
import jax
import jax.numpy as jnp
import numpy as np
from jax.experimental import pallas as pl
from jax.experimental.pallas import tpu as pltpu


def _round_up(n, m):
    return ((n + m - 1) // m) * m


def _pick_time_chunk(T, BT, D, GP, *, max_chunk=64, vmem_budget_bytes=40 << 20):
    """Largest multiple-of-8 time chunk whose per-chunk VMEM footprint fits the budget."""
    cap = min(max_chunk, _round_up(T, 8))
    tt = max((cap // 8) * 8, 8)
    while tt > 8:
        need = tt * BT * 4 * GP * 4 + 2 * BT * tt * D * 4   # xg_scr + double-buffered x block
        if need <= vmem_budget_bytes:
            break
        tt -= 8
    return tt


def _make_lstm_chunk_kernel(TT, BT, D, GP, T_valid, needs_mask, unroll_threshold=8):
    """Build the per-chunk kernel. One grid step = TT timesteps for one batch tile."""

    def kernel(x_ref, wx_ref, wh_ref, b_ref, h_ref, c_scr, xg_scr):
        chunk = pl.program_id(1)            # time is the inner ("arbitrary") grid axis

        @pl.when(chunk == 0)
        def _init():                        # fresh h/c per batch tile
            h_ref[...] = jnp.zeros_like(h_ref)
            c_scr[...] = jnp.zeros_like(c_scr)

        wh = wh_ref[...]                    # invariant recurrent weight, hoisted

        # Whole-chunk input projection: ONE wide MXU matmul, bias folded in once.
        # x block is time-major (TT, BT, D); BT % 8 == 0 so both reshapes are free.
        xc = x_ref[...].reshape(TT * BT, D).astype(wh.dtype)
        xg = jnp.dot(xc, wx_ref[...], preferred_element_type=jnp.float32) + b_ref[...]
        xg_scr[...] = xg.reshape(TT, BT, 4 * GP)

        h = h_ref[...]                      # (BT, GP) f32, carried in the output block
        c = c_scr[...]

        def step(tt, h, c):
            # xg_scr[tt]: dense, tile-aligned (BT, 4*GP) leading-axis read (time-major cache).
            g = xg_scr[tt] + jnp.dot(h.astype(wh.dtype), wh,
                                     preferred_element_type=jnp.float32)
            i_g = jax.nn.sigmoid(g[:, 0 * GP:1 * GP])
            f_g = jax.nn.sigmoid(g[:, 1 * GP:2 * GP])
            g_g = jnp.tanh(g[:, 2 * GP:3 * GP])
            o_g = jax.nn.sigmoid(g[:, 3 * GP:4 * GP])
            c_new = f_g * c + i_g * g_g
            h_new = o_g * jnp.tanh(c_new)
            if needs_mask:                  # static flag: only when T was padded to a chunk multiple
                valid = (chunk * TT + tt) < T_valid
                h_new = jnp.where(valid, h_new, h)
                c_new = jnp.where(valid, c_new, c)
            return h_new, c_new

        if TT <= unroll_threshold:          # small chunk: full static unroll
            for tt in range(TT):
                h, c = step(tt, h, c)
        else:                               # large chunk: bounded vreg pressure, LLO-visible loop
            h, c = jax.lax.fori_loop(0, TT, lambda tt, hc: step(tt, *hc), (h, c), unroll=4)

        h_ref[...] = h                      # per-chunk store IS the state carry (grid-resident block)
        c_scr[...] = c

    return kernel


def _prepare_gate_weights(params, mxu_dtype):
    """Pre-transpose and lane-pad the LSTM weights. Gate order matches PyTorch: [i, f, g, o]."""
    w_ih, w_hh = params["w_ih"], params["w_hh"]            # (4H, D), (4H, H)
    bias = params["b_ih"] + params["b_hh"]                 # (4H,)
    H = w_hh.shape[1]
    D = w_ih.shape[1]
    GP = _round_up(H, 128)

    wx = jnp.zeros((D, 4 * GP), jnp.float32)
    wh = jnp.zeros((GP, 4 * GP), jnp.float32)
    b = jnp.zeros((1, 4 * GP), jnp.float32)
    for k in range(4):
        wx = wx.at[:, k * GP:k * GP + H].set(w_ih[k * H:(k + 1) * H, :].T)
        wh = wh.at[:H, k * GP:k * GP + H].set(w_hh[k * H:(k + 1) * H, :].T)
        b = b.at[0, k * GP:k * GP + H].set(bias[k * H:(k + 1) * H])
    return wx.astype(mxu_dtype), wh.astype(mxu_dtype), b, GP


def lstm_regressor_forward(x, params, *, mxu_dtype=jnp.bfloat16, max_time_chunk=64):
    """x: (B, T, D) float32 (batch_first, like PyTorch). Returns (B, 1) float32."""
    B, T, D = x.shape
    H = params["w_hh"].shape[1]
    wx, wh, b, GP = _prepare_gate_weights(params, mxu_dtype)

    # Batch padding / optional 2-way batch tiling (megacore "parallel" axis on v7x).
    BP = _round_up(B, 8)
    if BP >= 16:
        BP = _round_up(B, 16)
        BT = BP // 2
    else:
        BT = BP
    n_btiles = BP // BT

    # VMEM-aware time-chunk selection; T padded to a chunk multiple (padded steps are masked).
    TT = _pick_time_chunk(T, BT, D, GP, max_chunk=max_time_chunk)
    TP = _round_up(T, TT)
    n_chunks = TP // TT
    needs_mask = TP != T

    xp = jnp.pad(x, ((0, BP - B), (0, TP - T), (0, 0)))
    # Time-major presentation of x: per-timestep gate reads in the serial loop become dense
    # (BT, 4*GP) leading-axis views instead of sublane-strided gathers.  One overlappable XLA
    # transpose of the input replaces TT strided extracts per chunk on the critical path.
    xp = jnp.transpose(xp, (1, 0, 2))                       # (TP, BP, D)

    kernel = _make_lstm_chunk_kernel(TT, BT, D, GP, T, needs_mask)

    wbytes = (wx.size + wh.size) * wx.dtype.itemsize + b.size * 4
    vmem_needed = (2 * BT * TT * D * 4          # x block (double-buffered)
                   + wbytes                      # invariant weights (single-buffered)
                   + TT * BT * 4 * GP * 4        # xg_scr
                   + BT * GP * 4                 # c_scr
                   + 2 * BT * GP * 4)            # output block
    vmem_limit = int(min(max(vmem_needed * 3 // 2 + (2 << 20), 32 << 20), 64 << 20))

    cost = pl.CostEstimate(
        flops=int(2 * BP * TP * (D + GP) * 4 * GP),
        transcendentals=int(5 * BP * TP * GP),
        bytes_accessed=int(xp.size * 4 + wbytes + BP * GP * 4),
    )

    def build(single_buffer_weights):
        if single_buffer_weights:
            # Constant index_map => double-buffering buys nothing; single-buffer the weights.
            wspec = lambda s: pl.BlockSpec(s, lambda bi, ti: (0, 0),
                                           pipeline_mode=pl.Buffered(1))
        else:
            wspec = lambda s: pl.BlockSpec(s, lambda bi, ti: (0, 0))
        return pl.pallas_call(
            kernel,
            out_shape=jax.ShapeDtypeStruct((BP, GP), jnp.float32),
            grid_spec=pltpu.PrefetchScalarGridSpec(
                num_scalar_prefetch=0,
                grid=(n_btiles, n_chunks),
                in_specs=[
                    # time-major x: one (TT, BT, D) chunk per grid step
                    pl.BlockSpec((TT, BT, D), lambda bi, ti: (ti, bi, 0)),
                    wspec(wx.shape),
                    wspec(wh.shape),
                    wspec(b.shape),
                ],
                # Lane-dense final hidden state; doubles as the h carry across the time axis.
                out_specs=pl.BlockSpec((BT, GP), lambda bi, ti: (bi, 0)),
                scratch_shapes=[
                    pltpu.VMEM((BT, GP), jnp.float32),            # c state
                    pltpu.VMEM((TT, BT, 4 * GP), jnp.float32),    # time-major input-gate cache
                ],
            ),
            compiler_params=pltpu.CompilerParams(
                dimension_semantics=("parallel", "arbitrary"),
                vmem_limit_bytes=vmem_limit),
            cost_estimate=cost,
        )

    try:
        h_last = build(True)(xp, wx, wh, b)
    except Exception:
        # pipeline_mode=pl.Buffered(1) not supported by this jax build: fall back to defaults.
        h_last = build(False)(xp, wx, wh, b)

    # The 1-wide output projection is strictly cheaper in plain XLA than an N=1 MXU matmul
    # with a masked (B, 1) store inside the kernel.
    h_final = h_last[:B, :H]
    return h_final @ params["w_fc"].T + params["b_fc"]


def init_params(key, input_dim, hidden_dim):
    """Deterministic init mimicking PyTorch's uniform(-1/sqrt(H), 1/sqrt(H))."""
    ks = jax.random.split(key, 6)
    s = 1.0 / np.sqrt(hidden_dim)
    u = lambda k, shape: jax.random.uniform(k, shape, jnp.float32, -s, s)
    return {
        "w_ih": u(ks[0], (4 * hidden_dim, input_dim)),
        "w_hh": u(ks[1], (4 * hidden_dim, hidden_dim)),
        "b_ih": u(ks[2], (4 * hidden_dim,)),
        "b_hh": u(ks[3], (4 * hidden_dim,)),
        "w_fc": u(ks[4], (1, hidden_dim)),
        "b_fc": u(ks[5], (1,)),
    }


def reference_forward(x, params):
    """Pure-JAX reference with PyTorch LSTM semantics (gate order i,f,g,o)."""
    w_ih, w_hh = params["w_ih"], params["w_hh"]
    b = params["b_ih"] + params["b_hh"]
    B, T, D = x.shape
    H = w_hh.shape[1]
    h = jnp.zeros((B, H), jnp.float32)
    c = jnp.zeros((B, H), jnp.float32)
    for t in range(T):
        g = x[:, t, :] @ w_ih.T + h @ w_hh.T + b
        i = jax.nn.sigmoid(g[:, :H])
        f = jax.nn.sigmoid(g[:, H:2 * H])
        gg = jnp.tanh(g[:, 2 * H:3 * H])
        o = jax.nn.sigmoid(g[:, 3 * H:])
        c = f * c + i * gg
        h = o * jnp.tanh(c)
    return h @ params["w_fc"].T + params["b_fc"]


if __name__ == "__main__":
    B, T, D, H = 4, 8, 16, 32
    key = jax.random.PRNGKey(0)
    k_x, k_p = jax.random.split(key)
    x = jax.random.normal(k_x, (B, T, D), jnp.float32)
    params = init_params(k_p, D, H)

    ref = reference_forward(x, params)

    # f32 MXU path (note: default-precision f32 dots may internally decompose to bf16 passes;
    # the rtol below accounts for that): tight semantic check against the pure-JAX reference.
    out_f32 = jax.block_until_ready(
        lstm_regressor_forward(x, params, mxu_dtype=jnp.float32))
    assert out_f32.shape == (B, 1)
    np.testing.assert_allclose(np.asarray(out_f32), np.asarray(ref), rtol=1e-4, atol=1e-5)

    # Default bf16-MXU fast path (f32 accumulation + f32 gate math): looser tolerance.
    out_bf16 = jax.block_until_ready(lstm_regressor_forward(x, params))
    assert out_bf16.shape == (B, 1)
    np.testing.assert_allclose(np.asarray(out_bf16), np.asarray(ref), rtol=1e-1, atol=1e-1)

    print("KERNEL_OK")
</pallas_src>

<mosaic_0001>
module attributes {stable_mosaic.version = 11 : i64} {
  func.func @kernel(%arg0: i32, %arg1: i32, %arg2: memref<8x8x16xf32, #tpu.memory_space<vmem>>, %arg3: memref<16x512xf32, #tpu.memory_space<vmem>>, %arg4: memref<128x512xf32, #tpu.memory_space<vmem>>, %arg5: memref<1x512xf32, #tpu.memory_space<vmem>>, %arg6: memref<8x128xf32, #tpu.memory_space<vmem>>, %arg7: memref<8x128xf32, #tpu.memory_space<vmem>>, %arg8: memref<8x8x512xf32, #tpu.memory_space<vmem>>) attributes {dimension_semantics = [#tpu.dimension_semantics<parallel>, #tpu.dimension_semantics<arbitrary>], iteration_bounds = array<i64: 1, 1>, scalar_prefetch = 0 : i64, scratch_operands = 2 : i64, tpu.core_type = #tpu.core_type<tc>, window_params = [{transform_indices = @transform_0, window_bounds = array<i64: 8, 8, 16>}, {pipeline_mode = #tpu.pipeline_mode<synchronous>, transform_indices = @transform_1, window_bounds = array<i64: 16, 512>}, {pipeline_mode = #tpu.pipeline_mode<synchronous>, transform_indices = @transform_2, window_bounds = array<i64: 128, 512>}, {pipeline_mode = #tpu.pipeline_mode<synchronous>, transform_indices = @transform_3, window_bounds = array<i64: 1, 512>}, {transform_indices = @transform_4, window_bounds = array<i64: 8, 128>}]} {
    %c0_i32 = arith.constant 0 : i32
    %0 = arith.cmpi eq, %arg1, %c0_i32 : i32
    %1 = arith.extui %0 : i1 to i32
    %c0_i32_0 = arith.constant 0 : i32
    %2 = arith.cmpi ne, %1, %c0_i32_0 : i32
    scf.if %2 {
      %cst_69 = arith.constant 0.000000e+00 : f32
      %249 = vector.broadcast %cst_69 : f32 to vector<8x128xf32>
      %c0_70 = arith.constant 0 : index
      %c0_71 = arith.constant 0 : index
      %250 = vector.load %arg6[%c0_70, %c0_71] : memref<8x128xf32, #tpu.memory_space<vmem>>, vector<8x128xf32>
      tpu.vector_store %arg6[%c0_70, %c0_71], %249 {strides = array<i32>} : memref<8x128xf32, #tpu.memory_space<vmem>>, vector<8x128xf32>,
      %cst_72 = arith.constant 0.000000e+00 : f32
      %251 = vector.broadcast %cst_72 : f32 to vector<8x128xf32>
      %c0_73 = arith.constant 0 : index
      %c0_74 = arith.constant 0 : index
      %252 = vector.load %arg7[%c0_73, %c0_74] : memref<8x128xf32, #tpu.memory_space<vmem>>, vector<8x128xf32>
      tpu.vector_store %arg7[%c0_73, %c0_74], %251 {strides = array<i32>} : memref<8x128xf32, #tpu.memory_space<vmem>>, vector<8x128xf32>,
    } else {
    }
    %c0 = arith.constant 0 : index
    %c0_1 = arith.constant 0 : index
    %3 = vector.load %arg4[%c0, %c0_1] : memref<128x512xf32, #tpu.memory_space<vmem>>, vector<128x512xf32>
    %c0_2 = arith.constant 0 : index
    %c0_3 = arith.constant 0 : index
    %c0_4 = arith.constant 0 : index
    %4 = vector.load %arg2[%c0_2, %c0_3, %c0_4] : memref<8x8x16xf32, #tpu.memory_space<vmem>>, vector<8x8x16xf32>
    %5 = vector.shape_cast %4 : vector<8x8x16xf32> to vector<64x16xf32>
    %c0_5 = arith.constant 0 : index
    %c0_6 = arith.constant 0 : index
    %6 = vector.load %arg3[%c0_5, %c0_6] : memref<16x512xf32, #tpu.memory_space<vmem>>, vector<16x512xf32>
    %cst = arith.constant dense<0.000000e+00> : vector<64x512xf32>
    %7 = tpu.matmul %5, %6, %cst {dimension_numbers = #tpu.dot_dimension_numbers<[1], [0], [0], [1], [0, 0, 1, 1], [], []>} : vector<64x16xf32>, vector<16x512xf32>, vector<64x512xf32> -> vector<64x512xf32>
    %c0_7 = arith.constant 0 : index
    %c0_8 = arith.constant 0 : index
    %8 = vector.load %arg5[%c0_7, %c0_8] : memref<1x512xf32, #tpu.memory_space<vmem>>, vector<1x512xf32>
    %9 = vector.broadcast %8 : vector<1x512xf32> to vector<64x512xf32>
    %10 = arith.addf %7, %9 : vector<64x512xf32>
    %11 = vector.shape_cast %10 : vector<64x512xf32> to vector<8x8x512xf32>
    %c0_9 = arith.constant 0 : index
    %c0_10 = arith.constant 0 : index
    %c0_11 = arith.constant 0 : index
    %12 = vector.load %arg8[%c0_9, %c0_10, %c0_11] : memref<8x8x512xf32, #tpu.memory_space<vmem>>, vector<8x8x512xf32>
    tpu.vector_store %arg8[%c0_9, %c0_10, %c0_11], %11 {strides = array<i32>} : memref<8x8x512xf32, #tpu.memory_space<vmem>>, vector<8x8x512xf32>,
    %c0_12 = arith.constant 0 : index
    %c0_13 = arith.constant 0 : index
    %13 = vector.load %arg6[%c0_12, %c0_13] : memref<8x128xf32, #tpu.memory_space<vmem>>, vector<8x128xf32>
    %c0_14 = arith.constant 0 : index
    %c0_15 = arith.constant 0 : index
    %14 = vector.load %arg7[%c0_14, %c0_15] : memref<8x128xf32, #tpu.memory_space<vmem>>, vector<8x128xf32>
    %c0_16 = arith.constant 0 : index
    %c0_17 = arith.constant 0 : index
    %c0_18 = arith.constant 0 : index
    %15 = vector.load %arg8[%c0_16, %c0_17, %c0_18] : memref<8x8x512xf32, #tpu.memory_space<vmem>>, vector<1x8x512xf32>
    %16 = vector.shape_cast %15 : vector<1x8x512xf32> to vector<8x512xf32>
    %cst_19 = arith.constant dense<0.000000e+00> : vector<8x512xf32>
    %17 = tpu.matmul %13, %3, %cst_19 {dimension_numbers = #tpu.dot_dimension_numbers<[1], [0], [0], [1], [0, 0, 1, 1], [], []>} : vector<8x128xf32>, vector<128x512xf32>, vector<8x512xf32> -> vector<8x512xf32>
    %18 = arith.addf %16, %17 : vector<8x512xf32>
    %19 = vector.extract_strided_slice %18 {offsets = [0, 0], sizes = [8, 128], strides = [1, 1]} : vector<8x512xf32> to vector<8x128xf32>
    %20 = arith.negf %19 : vector<8x128xf32>
    %21 = math.exp %20 : vector<8x128xf32>
    %cst_20 = arith.constant 1.000000e+00 : f32
    %22 = vector.broadcast %cst_20 : f32 to vector<8x128xf32>
    %23 = arith.addf %22, %21 : vector<8x128xf32>
    %24 = arith.divf %22, %23 : vector<8x128xf32>
    %25 = vector.extract_strided_slice %18 {offsets = [0, 128], sizes = [8, 128], strides = [1, 1]} : vector<8x512xf32> to vector<8x128xf32>
    %26 = arith.negf %25 : vector<8x128xf32>
    %27 = math.exp %26 : vector<8x128xf32>
    %cst_21 = arith.constant 1.000000e+00 : f32
    %28 = vector.broadcast %cst_21 : f32 to vector<8x128xf32>
    %29 = arith.addf %28, %27 : vector<8x128xf32>
    %30 = arith.divf %28, %29 : vector<8x128xf32>
    %31 = vector.extract_strided_slice %18 {offsets = [0, 256], sizes = [8, 128], strides = [1, 1]} : vector<8x512xf32> to vector<8x128xf32>
    %32 = math.tanh %31 : vector<8x128xf32>
    %33 = vector.extract_strided_slice %18 {offsets = [0, 384], sizes = [8, 128], strides = [1, 1]} : vector<8x512xf32> to vector<8x128xf32>
    %34 = arith.negf %33 : vector<8x128xf32>
    %35 = math.exp %34 : vector<8x128xf32>
    %cst_22 = arith.constant 1.000000e+00 : f32
    %36 = vector.broadcast %cst_22 : f32 to vector<8x128xf32>
    %37 = arith.addf %36, %35 : vector<8x128xf32>
    %38 = arith.divf %36, %37 : vector<8x128xf32>
    %39 = arith.mulf %30, %14 : vector<8x128xf32>
    %40 = arith.mulf %24, %32 : vector<8x128xf32>
    %41 = arith.addf %39, %40 : vector<8x128xf32>
    %42 = math.tanh %41 : vector<8x128xf32>
    %43 = arith.mulf %38, %42 : vector<8x128xf32>
    %c1 = arith.constant 1 : index
    %c0_23 = arith.constant 0 : index
    %c0_24 = arith.constant 0 : index
    %44 = vector.load %arg8[%c1, %c0_23, %c0_24] : memref<8x8x512xf32, #tpu.memory_space<vmem>>, vector<1x8x512xf32>
    %45 = vector.shape_cast %44 : vector<1x8x512xf32> to vector<8x512xf32>
    %cst_25 = arith.constant dense<0.000000e+00> : vector<8x512xf32>
    %46 = tpu.matmul %43, %3, %cst_25 {dimension_numbers = #tpu.dot_dimension_numbers<[1], [0], [0], [1], [0, 0, 1, 1], [], []>} : vector<8x128xf32>, vector<128x512xf32>, vector<8x512xf32> -> vector<8x512xf32>
    %47 = arith.addf %45, %46 : vector<8x512xf32>
    %48 = vector.extract_strided_slice %47 {offsets = [0, 0], sizes = [8, 128], strides = [1, 1]} : vector<8x512xf32> to vector<8x128xf32>
    %49 = arith.negf %48 : vector<8x128xf32>
    %50 = math.exp %49 : vector<8x128xf32>
    %cst_26 = arith.constant 1.000000e+00 : f32
    %51 = vector.broadcast %cst_26 : f32 to vector<8x128xf32>
    %52 = arith.addf %51, %50 : vector<8x128xf32>
    %53 = arith.divf %51, %52 : vector<8x128xf32>
    %54 = vector.extract_strided_slice %47 {offsets = [0, 128], sizes = [8, 128], strides = [1, 1]} : vector<8x512xf32> to vector<8x128xf32>
    %55 = arith.negf %54 : vector<8x128xf32>
    %56 = math.exp %55 : vector<8x128xf32>
    %cst_27 = arith.constant 1.000000e+00 : f32
    %57 = vector.broadcast %cst_27 : f32 to vector<8x128xf32>
    %58 = arith.addf %57, %56 : vector<8x128xf32>
    %59 = arith.divf %57, %58 : vector<8x128xf32>
    %60 = vector.extract_strided_slice %47 {offsets = [0, 256], sizes = [8, 128], strides = [1, 1]} : vector<8x512xf32> to vector<8x128xf32>
    %61 = math.tanh %60 : vector<8x128xf32>
    %62 = vector.extract_strided_slice %47 {offsets = [0, 384], sizes = [8, 128], strides = [1, 1]} : vector<8x512xf32> to vector<8x128xf32>
    %63 = arith.negf %62 : vector<8x128xf32>
    %64 = math.exp %63 : vector<8x128xf32>
    %cst_28 = arith.constant 1.000000e+00 : f32
    %65 = vector.broadcast %cst_28 : f32 to vector<8x128xf32>
    %66 = arith.addf %65, %64 : vector<8x128xf32>
    %67 = arith.divf %65, %66 : vector<8x128xf32>
    %68 = arith.mulf %59, %41 : vector<8x128xf32>
    %69 = arith.mulf %53, %61 : vector<8x128xf32>
    %70 = arith.addf %68, %69 : vector<8x128xf32>
    %71 = math.tanh %70 : vector<8x128xf32>
    %72 = arith.mulf %67, %71 : vector<8x128xf32>
    %c2 = arith.constant 2 : index
    %c0_29 = arith.constant 0 : index
    %c0_30 = arith.constant 0 : index
    %73 = vector.load %arg8[%c2, %c0_29, %c0_30] : memref<8x8x512xf32, #tpu.memory_space<vmem>>, vector<1x8x512xf32>
    %74 = vector.shape_cast %73 : vector<1x8x512xf32> to vector<8x512xf32>
    %cst_31 = arith.constant dense<0.000000e+00> : vector<8x512xf32>
    %75 = tpu.matmul %72, %3, %cst_31 {dimension_numbers = #tpu.dot_dimension_numbers<[1], [0], [0], [1], [0, 0, 1, 1], [], []>} : vector<8x128xf32>, vector<128x512xf32>, vector<8x512xf32> -> vector<8x512xf32>
    %76 = arith.addf %74, %75 : vector<8x512xf32>
    %77 = vector.extract_strided_slice %76 {offsets = [0, 0], sizes = [8, 128], strides = [1, 1]} : vector<8x512xf32> to vector<8x128xf32>
    %78 = arith.negf %77 : vector<8x128xf32>
    %79 = math.exp %78 : vector<8x128xf32>
    %cst_32 = arith.constant 1.000000e+00 : f32
    %80 = vector.broadcast %cst_32 : f32 to vector<8x128xf32>
    %81 = arith.addf %80, %79 : vector<8x128xf32>
    %82 = arith.divf %80, %81 : vector<8x128xf32>
    %83 = vector.extract_strided_slice %76 {offsets = [0, 128], sizes = [8, 128], strides = [1, 1]} : vector<8x512xf32> to vector<8x128xf32>
    %84 = arith.negf %83 : vector<8x128xf32>
    %85 = math.exp %84 : vector<8x128xf32>
    %cst_33 = arith.constant 1.000000e+00 : f32
    %86 = vector.broadcast %cst_33 : f32 to vector<8x128xf32>
    %87 = arith.addf %86, %85 : vector<8x128xf32>
    %88 = arith.divf %86, %87 : vector<8x128xf32>
    %89 = vector.extract_strided_slice %76 {offsets = [0, 256], sizes = [8, 128], strides = [1, 1]} : vector<8x512xf32> to vector<8x128xf32>
    %90 = math.tanh %89 : vector<8x128xf32>
    %91 = vector.extract_strided_slice %76 {offsets = [0, 384], sizes = [8, 128], strides = [1, 1]} : vector<8x512xf32> to vector<8x128xf32>
    %92 = arith.negf %91 : vector<8x128xf32>
    %93 = math.exp %92 : vector<8x128xf32>
    %cst_34 = arith.constant 1.000000e+00 : f32
    %94 = vector.broadcast %cst_34 : f32 to vector<8x128xf32>
    %95 = arith.addf %94, %93 : vector<8x128xf32>
    %96 = arith.divf %94, %95 : vector<8x128xf32>
    %97 = arith.mulf %88, %70 : vector<8x128xf32>
    %98 = arith.mulf %82, %90 : vector<8x128xf32>
    %99 = arith.addf %97, %98 : vector<8x128xf32>
    %100 = math.tanh %99 : vector<8x128xf32>
    %101 = arith.mulf %96, %100 : vector<8x128xf32>
    %c3 = arith.constant 3 : index
    %c0_35 = arith.constant 0 : index
    %c0_36 = arith.constant 0 : index
    %102 = vector.load %arg8[%c3, %c0_35, %c0_36] : memref<8x8x512xf32, #tpu.memory_space<vmem>>, vector<1x8x512xf32>
    %103 = vector.shape_cast %102 : vector<1x8x512xf32> to vector<8x512xf32>
    %cst_37 = arith.constant dense<0.000000e+00> : vector<8x512xf32>
    %104 = tpu.matmul %101, %3, %cst_37 {dimension_numbers = #tpu.dot_dimension_numbers<[1], [0], [0], [1], [0, 0, 1, 1], [], []>} : vector<8x128xf32>, vector<128x512xf32>, vector<8x512xf32> -> vector<8x512xf32>
    %105 = arith.addf %103, %104 : vector<8x512xf32>
    %106 = vector.extract_strided_slice %105 {offsets = [0, 0], sizes = [8, 128], strides = [1, 1]} : vector<8x512xf32> to vector<8x128xf32>
    %107 = arith.negf %106 : vector<8x128xf32>
    %108 = math.exp %107 : vector<8x128xf32>
    %cst_38 = arith.constant 1.000000e+00 : f32
    %109 = vector.broadcast %cst_38 : f32 to vector<8x128xf32>
    %110 = arith.addf %109, %108 : vector<8x128xf32>
    %111 = arith.divf %109, %110 : vector<8x128xf32>
    %112 = vector.extract_strided_slice %105 {offsets = [0, 128], sizes = [8, 128], strides = [1, 1]} : vector<8x512xf32> to vector<8x128xf32>
    %113 = arith.negf %112 : vector<8x128xf32>
    %114 = math.exp %113 : vector<8x128xf32>
    %cst_39 = arith.constant 1.000000e+00 : f32
    %115 = vector.broadcast %cst_39 : f32 to vector<8x128xf32>
    %116 = arith.addf %115, %114 : vector<8x128xf32>
    %117 = arith.divf %115, %116 : vector<8x128xf32>
    %118 = vector.extract_strided_slice %105 {offsets = [0, 256], sizes = [8, 128], strides = [1, 1]} : vector<8x512xf32> to vector<8x128xf32>
    %119 = math.tanh %118 : vector<8x128xf32>
    %120 = vector.extract_strided_slice %105 {offsets = [0, 384], sizes = [8, 128], strides = [1, 1]} : vector<8x512xf32> to vector<8x128xf32>
    %121 = arith.negf %120 : vector<8x128xf32>
    %122 = math.exp %121 : vector<8x128xf32>
    %cst_40 = arith.constant 1.000000e+00 : f32
    %123 = vector.broadcast %cst_40 : f32 to vector<8x128xf32>
    %124 = arith.addf %123, %122 : vector<8x128xf32>
    %125 = arith.divf %123, %124 : vector<8x128xf32>
    %126 = arith.mulf %117, %99 : vector<8x128xf32>
    %127 = arith.mulf %111, %119 : vector<8x128xf32>
    %128 = arith.addf %126, %127 : vector<8x128xf32>
    %129 = math.tanh %128 : vector<8x128xf32>
    %130 = arith.mulf %125, %129 : vector<8x128xf32>
    %c4 = arith.constant 4 : index
    %c0_41 = arith.constant 0 : index
    %c0_42 = arith.constant 0 : index
    %131 = vector.load %arg8[%c4, %c0_41, %c0_42] : memref<8x8x512xf32, #tpu.memory_space<vmem>>, vector<1x8x512xf32>
    %132 = vector.shape_cast %131 : vector<1x8x512xf32> to vector<8x512xf32>
    %cst_43 = arith.constant dense<0.000000e+00> : vector<8x512xf32>
    %133 = tpu.matmul %130, %3, %cst_43 {dimension_numbers = #tpu.dot_dimension_numbers<[1], [0], [0], [1], [0, 0, 1, 1], [], []>} : vector<8x128xf32>, vector<128x512xf32>, vector<8x512xf32> -> vector<8x512xf32>
    %134 = arith.addf %132, %133 : vector<8x512xf32>
    %135 = vector.extract_strided_slice %134 {offsets = [0, 0], sizes = [8, 128], strides = [1, 1]} : vector<8x512xf32> to vector<8x128xf32>
    %136 = arith.negf %135 : vector<8x128xf32>
    %137 = math.exp %136 : vector<8x128xf32>
    %cst_44 = arith.constant 1.000000e+00 : f32
    %138 = vector.broadcast %cst_44 : f32 to vector<8x128xf32>
    %139 = arith.addf %138, %137 : vector<8x128xf32>
    %140 = arith.divf %138, %139 : vector<8x128xf32>
    %141 = vector.extract_strided_slice %134 {offsets = [0, 128], sizes = [8, 128], strides = [1, 1]} : vector<8x512xf32> to vector<8x128xf32>
    %142 = arith.negf %141 : vector<8x128xf32>
    %143 = math.exp %142 : vector<8x128xf32>
    %cst_45 = arith.constant 1.000000e+00 : f32
    %144 = vector.broadcast %cst_45 : f32 to vector<8x128xf32>
    %145 = arith.addf %144, %143 : vector<8x128xf32>
    %146 = arith.divf %144, %145 : vector<8x128xf32>
    %147 = vector.extract_strided_slice %134 {offsets = [0, 256], sizes = [8, 128], strides = [1, 1]} : vector<8x512xf32> to vector<8x128xf32>
    %148 = math.tanh %147 : vector<8x128xf32>
    %149 = vector.extract_strided_slice %134 {offsets = [0, 384], sizes = [8, 128], strides = [1, 1]} : vector<8x512xf32> to vector<8x128xf32>
    %150 = arith.negf %149 : vector<8x128xf32>
    %151 = math.exp %150 : vector<8x128xf32>
    %cst_46 = arith.constant 1.000000e+00 : f32
    %152 = vector.broadcast %cst_46 : f32 to vector<8x128xf32>
    %153 = arith.addf %152, %151 : vector<8x128xf32>
    %154 = arith.divf %152, %153 : vector<8x128xf32>
    %155 = arith.mulf %146, %128 : vector<8x128xf32>
    %156 = arith.mulf %140, %148 : vector<8x128xf32>
    %157 = arith.addf %155, %156 : vector<8x128xf32>
    %158 = math.tanh %157 : vector<8x128xf32>
    %159 = arith.mulf %154, %158 : vector<8x128xf32>
    %c5 = arith.constant 5 : index
    %c0_47 = arith.constant 0 : index
    %c0_48 = arith.constant 0 : index
    %160 = vector.load %arg8[%c5, %c0_47, %c0_48] : memref<8x8x512xf32, #tpu.memory_space<vmem>>, vector<1x8x512xf32>
    %161 = vector.shape_cast %160 : vector<1x8x512xf32> to vector<8x512xf32>
    %cst_49 = arith.constant dense<0.000000e+00> : vector<8x512xf32>
    %162 = tpu.matmul %159, %3, %cst_49 {dimension_numbers = #tpu.dot_dimension_numbers<[1], [0], [0], [1], [0, 0, 1, 1], [], []>} : vector<8x128xf32>, vector<128x512xf32>, vector<8x512xf32> -> vector<8x512xf32>
    %163 = arith.addf %161, %162 : vector<8x512xf32>
    %164 = vector.extract_strided_slice %163 {offsets = [0, 0], sizes = [8, 128], strides = [1, 1]} : vector<8x512xf32> to vector<8x128xf32>
    %165 = arith.negf %164 : vector<8x128xf32>
    %166 = math.exp %165 : vector<8x128xf32>
    %cst_50 = arith.constant 1.000000e+00 : f32
    %167 = vector.broadcast %cst_50 : f32 to vector<8x128xf32>
    %168 = arith.addf %167, %166 : vector<8x128xf32>
    %169 = arith.divf %167, %168 : vector<8x128xf32>
    %170 = vector.extract_strided_slice %163 {offsets = [0, 128], sizes = [8, 128], strides = [1, 1]} : vector<8x512xf32> to vector<8x128xf32>
    %171 = arith.negf %170 : vector<8x128xf32>
    %172 = math.exp %171 : vector<8x128xf32>
    %cst_51 = arith.constant 1.000000e+00 : f32
    %173 = vector.broadcast %cst_51 : f32 to vector<8x128xf32>
    %174 = arith.addf %173, %172 : vector<8x128xf32>
    %175 = arith.divf %173, %174 : vector<8x128xf32>
    %176 = vector.extract_strided_slice %163 {offsets = [0, 256], sizes = [8, 128], strides = [1, 1]} : vector<8x512xf32> to vector<8x128xf32>
    %177 = math.tanh %176 : vector<8x128xf32>
    %178 = vector.extract_strided_slice %163 {offsets = [0, 384], sizes = [8, 128], strides = [1, 1]} : vector<8x512xf32> to vector<8x128xf32>
    %179 = arith.negf %178 : vector<8x128xf32>
    %180 = math.exp %179 : vector<8x128xf32>
    %cst_52 = arith.constant 1.000000e+00 : f32
    %181 = vector.broadcast %cst_52 : f32 to vector<8x128xf32>
    %182 = arith.addf %181, %180 : vector<8x128xf32>
    %183 = arith.divf %181, %182 : vector<8x128xf32>
    %184 = arith.mulf %175, %157 : vector<8x128xf32>
    %185 = arith.mulf %169, %177 : vector<8x128xf32>
    %186 = arith.addf %184, %185 : vector<8x128xf32>
    %187 = math.tanh %186 : vector<8x128xf32>
    %188 = arith.mulf %183, %187 : vector<8x128xf32>
    %c6 = arith.constant 6 : index
    %c0_53 = arith.constant 0 : index
    %c0_54 = arith.constant 0 : index
    %189 = vector.load %arg8[%c6, %c0_53, %c0_54] : memref<8x8x512xf32, #tpu.memory_space<vmem>>, vector<1x8x512xf32>
    %190 = vector.shape_cast %189 : vector<1x8x512xf32> to vector<8x512xf32>
    %cst_55 = arith.constant dense<0.000000e+00> : vector<8x512xf32>
    %191 = tpu.matmul %188, %3, %cst_55 {dimension_numbers = #tpu.dot_dimension_numbers<[1], [0], [0], [1], [0, 0, 1, 1], [], []>} : vector<8x128xf32>, vector<128x512xf32>, vector<8x512xf32> -> vector<8x512xf32>
    %192 = arith.addf %190, %191 : vector<8x512xf32>
    %193 = vector.extract_strided_slice %192 {offsets = [0, 0], sizes = [8, 128], strides = [1, 1]} : vector<8x512xf32> to vector<8x128xf32>
    %194 = arith.negf %193 : vector<8x128xf32>
    %195 = math.exp %194 : vector<8x128xf32>
    %cst_56 = arith.constant 1.000000e+00 : f32
    %196 = vector.broadcast %cst_56 : f32 to vector<8x128xf32>
    %197 = arith.addf %196, %195 : vector<8x128xf32>
    %198 = arith.divf %196, %197 : vector<8x128xf32>
    %199 = vector.extract_strided_slice %192 {offsets = [0, 128], sizes = [8, 128], strides = [1, 1]} : vector<8x512xf32> to vector<8x128xf32>
    %200 = arith.negf %199 : vector<8x128xf32>
    %201 = math.exp %200 : vector<8x128xf32>
    %cst_57 = arith.constant 1.000000e+00 : f32
    %202 = vector.broadcast %cst_57 : f32 to vector<8x128xf32>
    %203 = arith.addf %202, %201 : vector<8x128xf32>
    %204 = arith.divf %202, %203 : vector<8x128xf32>
    %205 = vector.extract_strided_slice %192 {offsets = [0, 256], sizes = [8, 128], strides = [1, 1]} : vector<8x512xf32> to vector<8x128xf32>
    %206 = math.tanh %205 : vector<8x128xf32>
    %207 = vector.extract_strided_slice %192 {offsets = [0, 384], sizes = [8, 128], strides = [1, 1]} : vector<8x512xf32> to vector<8x128xf32>
    %208 = arith.negf %207 : vector<8x128xf32>
    %209 = math.exp %208 : vector<8x128xf32>
    %cst_58 = arith.constant 1.000000e+00 : f32
    %210 = vector.broadcast %cst_58 : f32 to vector<8x128xf32>
    %211 = arith.addf %210, %209 : vector<8x128xf32>
    %212 = arith.divf %210, %211 : vector<8x128xf32>
    %213 = arith.mulf %204, %186 : vector<8x128xf32>
    %214 = arith.mulf %198, %206 : vector<8x128xf32>
    %215 = arith.addf %213, %214 : vector<8x128xf32>
    %216 = math.tanh %215 : vector<8x128xf32>
    %217 = arith.mulf %212, %216 : vector<8x128xf32>
    %c7 = arith.constant 7 : index
    %c0_59 = arith.constant 0 : index
    %c0_60 = arith.constant 0 : index
    %218 = vector.load %arg8[%c7, %c0_59, %c0_60] : memref<8x8x512xf32, #tpu.memory_space<vmem>>, vector<1x8x512xf32>
    %219 = vector.shape_cast %218 : vector<1x8x512xf32> to vector<8x512xf32>
    %cst_61 = arith.constant dense<0.000000e+00> : vector<8x512xf32>
    %220 = tpu.matmul %217, %3, %cst_61 {dimension_numbers = #tpu.dot_dimension_numbers<[1], [0], [0], [1], [0, 0, 1, 1], [], []>} : vector<8x128xf32>, vector<128x512xf32>, vector<8x512xf32> -> vector<8x512xf32>
    %221 = arith.addf %219, %220 : vector<8x512xf32>
    %222 = vector.extract_strided_slice %221 {offsets = [0, 0], sizes = [8, 128], strides = [1, 1]} : vector<8x512xf32> to vector<8x128xf32>
    %223 = arith.negf %222 : vector<8x128xf32>
    %224 = math.exp %223 : vector<8x128xf32>
    %cst_62 = arith.constant 1.000000e+00 : f32
    %225 = vector.broadcast %cst_62 : f32 to vector<8x128xf32>
    %226 = arith.addf %225, %224 : vector<8x128xf32>
    %227 = arith.divf %225, %226 : vector<8x128xf32>
    %228 = vector.extract_strided_slice %221 {offsets = [0, 128], sizes = [8, 128], strides = [1, 1]} : vector<8x512xf32> to vector<8x128xf32>
    %229 = arith.negf %228 : vector<8x128xf32>
    %230 = math.exp %229 : vector<8x128xf32>
    %cst_63 = arith.constant 1.000000e+00 : f32
    %231 = vector.broadcast %cst_63 : f32 to vector<8x128xf32>
    %232 = arith.addf %231, %230 : vector<8x128xf32>
    %233 = arith.divf %231, %232 : vector<8x128xf32>
    %234 = vector.extract_strided_slice %221 {offsets = [0, 256], sizes = [8, 128], strides = [1, 1]} : vector<8x512xf32> to vector<8x128xf32>
    %235 = math.tanh %234 : vector<8x128xf32>
    %236 = vector.extract_strided_slice %221 {offsets = [0, 384], sizes = [8, 128], strides = [1, 1]} : vector<8x512xf32> to vector<8x128xf32>
    %237 = arith.negf %236 : vector<8x128xf32>
    %238 = math.exp %237 : vector<8x128xf32>
    %cst_64 = arith.constant 1.000000e+00 : f32
    %239 = vector.broadcast %cst_64 : f32 to vector<8x128xf32>
    %240 = arith.addf %239, %238 : vector<8x128xf32>
    %241 = arith.divf %239, %240 : vector<8x128xf32>
    %242 = arith.mulf %233, %215 : vector<8x128xf32>
    %243 = arith.mulf %227, %235 : vector<8x128xf32>
    %244 = arith.addf %242, %243 : vector<8x128xf32>
    %245 = math.tanh %244 : vector<8x128xf32>
    %246 = arith.mulf %241, %245 : vector<8x128xf32>
    %c0_65 = arith.constant 0 : index
    %c0_66 = arith.constant 0 : index
    %247 = vector.load %arg6[%c0_65, %c0_66] : memref<8x128xf32, #tpu.memory_space<vmem>>, vector<8x128xf32>
    tpu.vector_store %arg6[%c0_65, %c0_66], %246 {strides = array<i32>} : memref<8x128xf32, #tpu.memory_space<vmem>>, vector<8x128xf32>,
    %c0_67 = arith.constant 0 : index
    %c0_68 = arith.constant 0 : index
    %248 = vector.load %arg7[%c0_67, %c0_68] : memref<8x128xf32, #tpu.memory_space<vmem>>, vector<8x128xf32>
    tpu.vector_store %arg7[%c0_67, %c0_68], %244 {strides = array<i32>} : memref<8x128xf32, #tpu.memory_space<vmem>>, vector<8x128xf32>,
    return
  }
  func.func @transform_0(%arg0: i32, %arg1: i32) -> (i32, i32, i32) {
    %c0_i32 = arith.constant 0 : i32
    %c0_i32_0 = arith.constant 0 : i32
    return %arg1, %arg0, %c0_i32 : i32, i32, i32
  }
  func.func @transform_1(%arg0: i32, %arg1: i32) -> (i32, i32) {
    %c0_i32 = arith.constant 0 : i32
    %c0_i32_0 = arith.constant 0 : i32
    %c0_i32_1 = arith.constant 0 : i32
    return %c0_i32, %c0_i32_0 : i32, i32
  }
  func.func @transform_2(%arg0: i32, %arg1: i32) -> (i32, i32) {
    %c0_i32 = arith.constant 0 : i32
    %c0_i32_0 = arith.constant 0 : i32
    %c0_i32_1 = arith.constant 0 : i32
    return %c0_i32, %c0_i32_0 : i32, i32
  }
  func.func @transform_3(%arg0: i32, %arg1: i32) -> (i32, i32) {
    %c0_i32 = arith.constant 0 : i32
    %c0_i32_0 = arith.constant 0 : i32
    %c0_i32_1 = arith.constant 0 : i32
    return %c0_i32, %c0_i32_0 : i32, i32
  }
  func.func @transform_4(%arg0: i32, %arg1: i32) -> (i32, i32) {
    %c0_i32 = arith.constant 0 : i32
    %c0_i32_0 = arith.constant 0 : i32
    return %arg0, %c0_i32 : i32, i32
  }
}

module attributes {stable_mosaic.version = 11 : i64} {
  func.func @kernel(%arg0: i32, %arg1: i32, %arg2: memref<8x8x16xf32, #tpu.memory_space<vmem>>, %arg3: memref<16x512xf32, #tpu.memory_space<vmem>>, %arg4: memref<128x512xf32, #tpu.memory_space<vmem>>, %arg5: memref<1x512xf32, #tpu.memory_space<vmem>>, %arg6: memref<8x128xf32, #tpu.memory_space<vmem>>, %arg7: memref<8x128xf32, #tpu.memory_space<vmem>>, %arg8: memref<8x8x512xf32, #tpu.memory_space<vmem>>) attributes {dimension_semantics = [#tpu.dimension_semantics<parallel>, #tpu.dimension_semantics<arbitrary>], iteration_bounds = array<i64: 1, 1>, scalar_prefetch = 0 : i64, scratch_operands = 2 : i64, tpu.core_type = #tpu.core_type<tc>, window_params = [{transform_indices = @transform_0, window_bounds = array<i64: 8, 8, 16>}, {pipeline_mode = #tpu.pipeline_mode<synchronous>, transform_indices = @transform_1, window_bounds = array<i64: 16, 512>}, {pipeline_mode = #tpu.pipeline_mode<synchronous>, transform_indices = @transform_2, window_bounds = array<i64: 128, 512>}, {pipeline_mode = #tpu.pipeline_mode<synchronous>, transform_indices = @transform_3, window_bounds = array<i64: 1, 512>}, {transform_indices = @transform_4, window_bounds = array<i64: 8, 128>}]} {
    %c0_i32 = arith.constant 0 : i32
    %0 = arith.cmpi eq, %arg1, %c0_i32 : i32
    %1 = arith.extui %0 : i1 to i32
    %c0_i32_0 = arith.constant 0 : i32
    %2 = arith.cmpi ne, %1, %c0_i32_0 : i32
    scf.if %2 {
      %cst_69 = arith.constant 0.000000e+00 : f32
      %249 = vector.broadcast %cst_69 : f32 to vector<8x128xf32>
      %c0_70 = arith.constant 0 : index
      %c0_71 = arith.constant 0 : index
      %250 = vector.load %arg6[%c0_70, %c0_71] : memref<8x128xf32, #tpu.memory_space<vmem>>, vector<8x128xf32>
      tpu.vector_store %arg6[%c0_70, %c0_71], %249 {strides = array<i32>} : memref<8x128xf32, #tpu.memory_space<vmem>>, vector<8x128xf32>,
      %cst_72 = arith.constant 0.000000e+00 : f32
      %251 = vector.broadcast %cst_72 : f32 to vector<8x128xf32>
      %c0_73 = arith.constant 0 : index
      %c0_74 = arith.constant 0 : index
      %252 = vector.load %arg7[%c0_73, %c0_74] : memref<8x128xf32, #tpu.memory_space<vmem>>, vector<8x128xf32>
      tpu.vector_store %arg7[%c0_73, %c0_74], %251 {strides = array<i32>} : memref<8x128xf32, #tpu.memory_space<vmem>>, vector<8x128xf32>,
    } else {
    }
    %c0 = arith.constant 0 : index
    %c0_1 = arith.constant 0 : index
    %3 = vector.load %arg4[%c0, %c0_1] : memref<128x512xf32, #tpu.memory_space<vmem>>, vector<128x512xf32>
    %c0_2 = arith.constant 0 : index
    %c0_3 = arith.constant 0 : index
    %c0_4 = arith.constant 0 : index
    %4 = vector.load %arg2[%c0_2, %c0_3, %c0_4] : memref<8x8x16xf32, #tpu.memory_space<vmem>>, vector<8x8x16xf32>
    %5 = vector.shape_cast %4 : vector<8x8x16xf32> to vector<64x16xf32>
    %c0_5 = arith.constant 0 : index
    %c0_6 = arith.constant 0 : index
    %6 = vector.load %arg3[%c0_5, %c0_6] : memref<16x512xf32, #tpu.memory_space<vmem>>, vector<16x512xf32>
    %cst = arith.constant dense<0.000000e+00> : vector<64x512xf32>
    %7 = tpu.matmul %5, %6, %cst {dimension_numbers = #tpu.dot_dimension_numbers<[1], [0], [0], [1], [0, 0, 1, 1], [], []>} : vector<64x16xf32>, vector<16x512xf32>, vector<64x512xf32> -> vector<64x512xf32>
    %c0_7 = arith.constant 0 : index
    %c0_8 = arith.constant 0 : index
    %8 = vector.load %arg5[%c0_7, %c0_8] : memref<1x512xf32, #tpu.memory_space<vmem>>, vector<1x512xf32>
    %9 = vector.broadcast %8 : vector<1x512xf32> to vector<64x512xf32>
    %10 = arith.addf %7, %9 : vector<64x512xf32>
    %11 = vector.shape_cast %10 : vector<64x512xf32> to vector<8x8x512xf32>
    %c0_9 = arith.constant 0 : index
    %c0_10 = arith.constant 0 : index
    %c0_11 = arith.constant 0 : index
    %12 = vector.load %arg8[%c0_9, %c0_10, %c0_11] : memref<8x8x512xf32, #tpu.memory_space<vmem>>, vector<8x8x512xf32>
    tpu.vector_store %arg8[%c0_9, %c0_10, %c0_11], %11 {strides = array<i32>} : memref<8x8x512xf32, #tpu.memory_space<vmem>>, vector<8x8x512xf32>,
    %c0_12 = arith.constant 0 : index
    %c0_13 = arith.constant 0 : index
    %13 = vector.load %arg6[%c0_12, %c0_13] : memref<8x128xf32, #tpu.memory_space<vmem>>, vector<8x128xf32>
    %c0_14 = arith.constant 0 : index
    %c0_15 = arith.constant 0 : index
    %14 = vector.load %arg7[%c0_14, %c0_15] : memref<8x128xf32, #tpu.memory_space<vmem>>, vector<8x128xf32>
    %c0_16 = arith.constant 0 : index
    %c0_17 = arith.constant 0 : index
    %c0_18 = arith.constant 0 : index
    %15 = vector.load %arg8[%c0_16, %c0_17, %c0_18] : memref<8x8x512xf32, #tpu.memory_space<vmem>>, vector<1x8x512xf32>
    %16 = vector.shape_cast %15 : vector<1x8x512xf32> to vector<8x512xf32>
    %cst_19 = arith.constant dense<0.000000e+00> : vector<8x512xf32>
    %17 = tpu.matmul %13, %3, %cst_19 {dimension_numbers = #tpu.dot_dimension_numbers<[1], [0], [0], [1], [0, 0, 1, 1], [], []>} : vector<8x128xf32>, vector<128x512xf32>, vector<8x512xf32> -> vector<8x512xf32>
    %18 = arith.addf %16, %17 : vector<8x512xf32>
    %19 = vector.extract_strided_slice %18 {offsets = [0, 0], sizes = [8, 128], strides = [1, 1]} : vector<8x512xf32> to vector<8x128xf32>
    %20 = arith.negf %19 : vector<8x128xf32>
    %21 = math.exp %20 : vector<8x128xf32>
    %cst_20 = arith.constant 1.000000e+00 : f32
    %22 = vector.broadcast %cst_20 : f32 to vector<8x128xf32>
    %23 = arith.addf %22, %21 : vector<8x128xf32>
    %24 = arith.divf %22, %23 : vector<8x128xf32>
    %25 = vector.extract_strided_slice %18 {offsets = [0, 128], sizes = [8, 128], strides = [1, 1]} : vector<8x512xf32> to vector<8x128xf32>
    %26 = arith.negf %25 : vector<8x128xf32>
    %27 = math.exp %26 : vector<8x128xf32>
    %cst_21 = arith.constant 1.000000e+00 : f32
    %28 = vector.broadcast %cst_21 : f32 to vector<8x128xf32>
    %29 = arith.addf %28, %27 : vector<8x128xf32>
    %30 = arith.divf %28, %29 : vector<8x128xf32>
    %31 = vector.extract_strided_slice %18 {offsets = [0, 256], sizes = [8, 128], strides = [1, 1]} : vector<8x512xf32> to vector<8x128xf32>
    %32 = math.tanh %31 : vector<8x128xf32>
    %33 = vector.extract_strided_slice %18 {offsets = [0, 384], sizes = [8, 128], strides = [1, 1]} : vector<8x512xf32> to vector<8x128xf32>
    %34 = arith.negf %33 : vector<8x128xf32>
    %35 = math.exp %34 : vector<8x128xf32>
    %cst_22 = arith.constant 1.000000e+00 : f32
    %36 = vector.broadcast %cst_22 : f32 to vector<8x128xf32>
    %37 = arith.addf %36, %35 : vector<8x128xf32>
    %38 = arith.divf %36, %37 : vector<8x128xf32>
    %39 = arith.mulf %30, %14 : vector<8x128xf32>
    %40 = arith.mulf %24, %32 : vector<8x128xf32>
    %41 = arith.addf %39, %40 : vector<8x128xf32>
    %42 = math.tanh %41 : vector<8x128xf32>
    %43 = arith.mulf %38, %42 : vector<8x128xf32>
    %c1 = arith.constant 1 : index
    %c0_23 = arith.constant 0 : index
    %c0_24 = arith.constant 0 : index
    %44 = vector.load %arg8[%c1, %c0_23, %c0_24] : memref<8x8x512xf32, #tpu.memory_space<vmem>>, vector<1x8x512xf32>
    %45 = vector.shape_cast %44 : vector<1x8x512xf32> to vector<8x512xf32>
    %cst_25 = arith.constant dense<0.000000e+00> : vector<8x512xf32>
    %46 = tpu.matmul %43, %3, %cst_25 {dimension_numbers = #tpu.dot_dimension_numbers<[1], [0], [0], [1], [0, 0, 1, 1], [], []>} : vector<8x128xf32>, vector<128x512xf32>, vector<8x512xf32> -> vector<8x512xf32>
    %47 = arith.addf %45, %46 : vector<8x512xf32>
    %48 = vector.extract_strided_slice %47 {offsets = [0, 0], sizes = [8, 128], strides = [1, 1]} : vector<8x512xf32> to vector<8x128xf32>
    %49 = arith.negf %48 : vector<8x128xf32>
    %50 = math.exp %49 : vector<8x128xf32>
    %cst_26 = arith.constant 1.000000e+00 : f32
    %51 = vector.broadcast %cst_26 : f32 to vector<8x128xf32>
    %52 = arith.addf %51, %50 : vector<8x128xf32>
    %53 = arith.divf %51, %52 : vector<8x128xf32>
    %54 = vector.extract_strided_slice %47 {offsets = [0, 128], sizes = [8, 128], strides = [1, 1]} : vector<8x512xf32> to vector<8x128xf32>
    %55 = arith.negf %54 : vector<8x128xf32>
    %56 = math.exp %55 : vector<8x128xf32>
    %cst_27 = arith.constant 1.000000e+00 : f32
    %57 = vector.broadcast %cst_27 : f32 to vector<8x128xf32>
    %58 = arith.addf %57, %56 : vector<8x128xf32>
    %59 = arith.divf %57, %58 : vector<8x128xf32>
    %60 = vector.extract_strided_slice %47 {offsets = [0, 256], sizes = [8, 128], strides = [1, 1]} : vector<8x512xf32> to vector<8x128xf32>
    %61 = math.tanh %60 : vector<8x128xf32>
    %62 = vector.extract_strided_slice %47 {offsets = [0, 384], sizes = [8, 128], strides = [1, 1]} : vector<8x512xf32> to vector<8x128xf32>
    %63 = arith.negf %62 : vector<8x128xf32>
    %64 = math.exp %63 : vector<8x128xf32>
    %cst_28 = arith.constant 1.000000e+00 : f32
    %65 = vector.broadcast %cst_28 : f32 to vector<8x128xf32>
    %66 = arith.addf %65, %64 : vector<8x128xf32>
    %67 = arith.divf %65, %66 : vector<8x128xf32>
    %68 = arith.mulf %59, %41 : vector<8x128xf32>
    %69 = arith.mulf %53, %61 : vector<8x128xf32>
    %70 = arith.addf %68, %69 : vector<8x128xf32>
    %71 = math.tanh %70 : vector<8x128xf32>
    %72 = arith.mulf %67, %71 : vector<8x128xf32>
    %c2 = arith.constant 2 : index
    %c0_29 = arith.constant 0 : index
    %c0_30 = arith.constant 0 : index
    %73 = vector.load %arg8[%c2, %c0_29, %c0_30] : memref<8x8x512xf32, #tpu.memory_space<vmem>>, vector<1x8x512xf32>
    %74 = vector.shape_cast %73 : vector<1x8x512xf32> to vector<8x512xf32>
    %cst_31 = arith.constant dense<0.000000e+00> : vector<8x512xf32>
    %75 = tpu.matmul %72, %3, %cst_31 {dimension_numbers = #tpu.dot_dimension_numbers<[1], [0], [0], [1], [0, 0, 1, 1], [], []>} : vector<8x128xf32>, vector<128x512xf32>, vector<8x512xf32> -> vector<8x512xf32>
    %76 = arith.addf %74, %75 : vector<8x512xf32>
    %77 = vector.extract_strided_slice %76 {offsets = [0, 0], sizes = [8, 128], strides = [1, 1]} : vector<8x512xf32> to vector<8x128xf32>
    %78 = arith.negf %77 : vector<8x128xf32>
    %79 = math.exp %78 : vector<8x128xf32>
    %cst_32 = arith.constant 1.000000e+00 : f32
    %80 = vector.broadcast %cst_32 : f32 to vector<8x128xf32>
    %81 = arith.addf %80, %79 : vector<8x128xf32>
    %82 = arith.divf %80, %81 : vector<8x128xf32>
    %83 = vector.extract_strided_slice %76 {offsets = [0, 128], sizes = [8, 128], strides = [1, 1]} : vector<8x512xf32> to vector<8x128xf32>
    %84 = arith.negf %83 : vector<8x128xf32>
    %85 = math.exp %84 : vector<8x128xf32>
    %cst_33 = arith.constant 1.000000e+00 : f32
    %86 = vector.broadcast %cst_33 : f32 to vector<8x128xf32>
    %87 = arith.addf %86, %85 : vector<8x128xf32>
    %88 = arith.divf %86, %87 : vector<8x128xf32>
    %89 = vector.extract_strided_slice %76 {offsets = [0, 256], sizes = [8, 128], strides = [1, 1]} : vector<8x512xf32> to vector<8x128xf32>
    %90 = math.tanh %89 : vector<8x128xf32>
    %91 = vector.extract_strided_slice %76 {offsets = [0, 384], sizes = [8, 128], strides = [1, 1]} : vector<8x512xf32> to vector<8x128xf32>
    %92 = arith.negf %91 : vector<8x128xf32>
    %93 = math.exp %92 : vector<8x128xf32>
    %cst_34 = arith.constant 1.000000e+00 : f32
    %94 = vector.broadcast %cst_34 : f32 to vector<8x128xf32>
    %95 = arith.addf %94, %93 : vector<8x128xf32>
    %96 = arith.divf %94, %95 : vector<8x128xf32>
    %97 = arith.mulf %88, %70 : vector<8x128xf32>
    %98 = arith.mulf %82, %90 : vector<8x128xf32>
    %99 = arith.addf %97, %98 : vector<8x128xf32>
    %100 = math.tanh %99 : vector<8x128xf32>
    %101 = arith.mulf %96, %100 : vector<8x128xf32>
    %c3 = arith.constant 3 : index
    %c0_35 = arith.constant 0 : index
    %c0_36 = arith.constant 0 : index
    %102 = vector.load %arg8[%c3, %c0_35, %c0_36] : memref<8x8x512xf32, #tpu.memory_space<vmem>>, vector<1x8x512xf32>
    %103 = vector.shape_cast %102 : vector<1x8x512xf32> to vector<8x512xf32>
    %cst_37 = arith.constant dense<0.000000e+00> : vector<8x512xf32>
    %104 = tpu.matmul %101, %3, %cst_37 {dimension_numbers = #tpu.dot_dimension_numbers<[1], [0], [0], [1], [0, 0, 1, 1], [], []>} : vector<8x128xf32>, vector<128x512xf32>, vector<8x512xf32> -> vector<8x512xf32>
    %105 = arith.addf %103, %104 : vector<8x512xf32>
    %106 = vector.extract_strided_slice %105 {offsets = [0, 0], sizes = [8, 128], strides = [1, 1]} : vector<8x512xf32> to vector<8x128xf32>
    %107 = arith.negf %106 : vector<8x128xf32>
    %108 = math.exp %107 : vector<8x128xf32>
    %cst_38 = arith.constant 1.000000e+00 : f32
    %109 = vector.broadcast %cst_38 : f32 to vector<8x128xf32>
    %110 = arith.addf %109, %108 : vector<8x128xf32>
    %111 = arith.divf %109, %110 : vector<8x128xf32>
    %112 = vector.extract_strided_slice %105 {offsets = [0, 128], sizes = [8, 128], strides = [1, 1]} : vector<8x512xf32> to vector<8x128xf32>
    %113 = arith.negf %112 : vector<8x128xf32>
    %114 = math.exp %113 : vector<8x128xf32>
    %cst_39 = arith.constant 1.000000e+00 : f32
    %115 = vector.broadcast %cst_39 : f32 to vector<8x128xf32>
    %116 = arith.addf %115, %114 : vector<8x128xf32>
    %117 = arith.divf %115, %116 : vector<8x128xf32>
    %118 = vector.extract_strided_slice %105 {offsets = [0, 256], sizes = [8, 128], strides = [1, 1]} : vector<8x512xf32> to vector<8x128xf32>
    %119 = math.tanh %118 : vector<8x128xf32>
    %120 = vector.extract_strided_slice %105 {offsets = [0, 384], sizes = [8, 128], strides = [1, 1]} : vector<8x512xf32> to vector<8x128xf32>
    %121 = arith.negf %120 : vector<8x128xf32>
    %122 = math.exp %121 : vector<8x128xf32>
    %cst_40 = arith.constant 1.000000e+00 : f32
    %123 = vector.broadcast %cst_40 : f32 to vector<8x128xf32>
    %124 = arith.addf %123, %122 : vector<8x128xf32>
    %125 = arith.divf %123, %124 : vector<8x128xf32>
    %126 = arith.mulf %117, %99 : vector<8x128xf32>
    %127 = arith.mulf %111, %119 : vector<8x128xf32>
    %128 = arith.addf %126, %127 : vector<8x128xf32>
    %129 = math.tanh %128 : vector<8x128xf32>
    %130 = arith.mulf %125, %129 : vector<8x128xf32>
    %c4 = arith.constant 4 : index
    %c0_41 = arith.constant 0 : index
    %c0_42 = arith.constant 0 : index
    %131 = vector.load %arg8[%c4, %c0_41, %c0_42] : memref<8x8x512xf32, #tpu.memory_space<vmem>>, vector<1x8x512xf32>
    %132 = vector.shape_cast %131 : vector<1x8x512xf32> to vector<8x512xf32>
    %cst_43 = arith.constant dense<0.000000e+00> : vector<8x512xf32>
    %133 = tpu.matmul %130, %3, %cst_43 {dimension_numbers = #tpu.dot_dimension_numbers<[1], [0], [0], [1], [0, 0, 1, 1], [], []>} : vector<8x128xf32>, vector<128x512xf32>, vector<8x512xf32> -> vector<8x512xf32>
    %134 = arith.addf %132, %133 : vector<8x512xf32>
    %135 = vector.extract_strided_slice %134 {offsets = [0, 0], sizes = [8, 128], strides = [1, 1]} : vector<8x512xf32> to vector<8x128xf32>
    %136 = arith.negf %135 : vector<8x128xf32>
    %137 = math.exp %136 : vector<8x128xf32>
    %cst_44 = arith.constant 1.000000e+00 : f32
    %138 = vector.broadcast %cst_44 : f32 to vector<8x128xf32>
    %139 = arith.addf %138, %137 : vector<8x128xf32>
    %140 = arith.divf %138, %139 : vector<8x128xf32>
    %141 = vector.extract_strided_slice %134 {offsets = [0, 128], sizes = [8, 128], strides = [1, 1]} : vector<8x512xf32> to vector<8x128xf32>
    %142 = arith.negf %141 : vector<8x128xf32>
    %143 = math.exp %142 : vector<8x128xf32>
    %cst_45 = arith.constant 1.000000e+00 : f32
    %144 = vector.broadcast %cst_45 : f32 to vector<8x128xf32>
    %145 = arith.addf %144, %143 : vector<8x128xf32>
    %146 = arith.divf %144, %145 : vector<8x128xf32>
    %147 = vector.extract_strided_slice %134 {offsets = [0, 256], sizes = [8, 128], strides = [1, 1]} : vector<8x512xf32> to vector<8x128xf32>
    %148 = math.tanh %147 : vector<8x128xf32>
    %149 = vector.extract_strided_slice %134 {offsets = [0, 384], sizes = [8, 128], strides = [1, 1]} : vector<8x512xf32> to vector<8x128xf32>
    %150 = arith.negf %149 : vector<8x128xf32>
    %151 = math.exp %150 : vector<8x128xf32>
    %cst_46 = arith.constant 1.000000e+00 : f32
    %152 = vector.broadcast %cst_46 : f32 to vector<8x128xf32>
    %153 = arith.addf %152, %151 : vector<8x128xf32>
    %154 = arith.divf %152, %153 : vector<8x128xf32>
    %155 = arith.mulf %146, %128 : vector<8x128xf32>
    %156 = arith.mulf %140, %148 : vector<8x128xf32>
    %157 = arith.addf %155, %156 : vector<8x128xf32>
    %158 = math.tanh %157 : vector<8x128xf32>
    %159 = arith.mulf %154, %158 : vector<8x128xf32>
    %c5 = arith.constant 5 : index
    %c0_47 = arith.constant 0 : index
    %c0_48 = arith.constant 0 : index
    %160 = vector.load %arg8[%c5, %c0_47, %c0_48] : memref<8x8x512xf32, #tpu.memory_space<vmem>>, vector<1x8x512xf32>
    %161 = vector.shape_cast %160 : vector<1x8x512xf32> to vector<8x512xf32>
    %cst_49 = arith.constant dense<0.000000e+00> : vector<8x512xf32>
    %162 = tpu.matmul %159, %3, %cst_49 {dimension_numbers = #tpu.dot_dimension_numbers<[1], [0], [0], [1], [0, 0, 1, 1], [], []>} : vector<8x128xf32>, vector<128x512xf32>, vector<8x512xf32> -> vector<8x512xf32>
    %163 = arith.addf %161, %162 : vector<8x512xf32>
    %164 = vector.extract_strided_slice %163 {offsets = [0, 0], sizes = [8, 128], strides = [1, 1]} : vector<8x512xf32> to vector<8x128xf32>
    %165 = arith.negf %164 : vector<8x128xf32>
    %166 = math.exp %165 : vector<8x128xf32>
    %cst_50 = arith.constant 1.000000e+00 : f32
    %167 = vector.broadcast %cst_50 : f32 to vector<8x128xf32>
    %168 = arith.addf %167, %166 : vector<8x128xf32>
    %169 = arith.divf %167, %168 : vector<8x128xf32>
    %170 = vector.extract_strided_slice %163 {offsets = [0, 128], sizes = [8, 128], strides = [1, 1]} : vector<8x512xf32> to vector<8x128xf32>
    %171 = arith.negf %170 : vector<8x128xf32>
    %172 = math.exp %171 : vector<8x128xf32>
    %cst_51 = arith.constant 1.000000e+00 : f32
    %173 = vector.broadcast %cst_51 : f32 to vector<8x128xf32>
    %174 = arith.addf %173, %172 : vector<8x128xf32>
    %175 = arith.divf %173, %174 : vector<8x128xf32>
    %176 = vector.extract_strided_slice %163 {offsets = [0, 256], sizes = [8, 128], strides = [1, 1]} : vector<8x512xf32> to vector<8x128xf32>
    %177 = math.tanh %176 : vector<8x128xf32>
    %178 = vector.extract_strided_slice %163 {offsets = [0, 384], sizes = [8, 128], strides = [1, 1]} : vector<8x512xf32> to vector<8x128xf32>
    %179 = arith.negf %178 : vector<8x128xf32>
    %180 = math.exp %179 : vector<8x128xf32>
    %cst_52 = arith.constant 1.000000e+00 : f32
    %181 = vector.broadcast %cst_52 : f32 to vector<8x128xf32>
    %182 = arith.addf %181, %180 : vector<8x128xf32>
    %183 = arith.divf %181, %182 : vector<8x128xf32>
    %184 = arith.mulf %175, %157 : vector<8x128xf32>
    %185 = arith.mulf %169, %177 : vector<8x128xf32>
    %186 = arith.addf %184, %185 : vector<8x128xf32>
    %187 = math.tanh %186 : vector<8x128xf32>
    %188 = arith.mulf %183, %187 : vector<8x128xf32>
    %c6 = arith.constant 6 : index
    %c0_53 = arith.constant 0 : index
    %c0_54 = arith.constant 0 : index
    %189 = vector.load %arg8[%c6, %c0_53, %c0_54] : memref<8x8x512xf32, #tpu.memory_space<vmem>>, vector<1x8x512xf32>
    %190 = vector.shape_cast %189 : vector<1x8x512xf32> to vector<8x512xf32>
    %cst_55 = arith.constant dense<0.000000e+00> : vector<8x512xf32>
    %191 = tpu.matmul %188, %3, %cst_55 {dimension_numbers = #tpu.dot_dimension_numbers<[1], [0], [0], [1], [0, 0, 1, 1], [], []>} : vector<8x128xf32>, vector<128x512xf32>, vector<8x512xf32> -> vector<8x512xf32>
    %192 = arith.addf %190, %191 : vector<8x512xf32>
    %193 = vector.extract_strided_slice %192 {offsets = [0, 0], sizes = [8, 128], strides = [1, 1]} : vector<8x512xf32> to vector<8x128xf32>
    %194 = arith.negf %193 : vector<8x128xf32>
    %195 = math.exp %194 : vector<8x128xf32>
    %cst_56 = arith.constant 1.000000e+00 : f32
    %196 = vector.broadcast %cst_56 : f32 to vector<8x128xf32>
    %197 = arith.addf %196, %195 : vector<8x128xf32>
    %198 = arith.divf %196, %197 : vector<8x128xf32>
    %199 = vector.extract_strided_slice %192 {offsets = [0, 128], sizes = [8, 128], strides = [1, 1]} : vector<8x512xf32> to vector<8x128xf32>
    %200 = arith.negf %199 : vector<8x128xf32>
    %201 = math.exp %200 : vector<8x128xf32>
    %cst_57 = arith.constant 1.000000e+00 : f32
    %202 = vector.broadcast %cst_57 : f32 to vector<8x128xf32>
    %203 = arith.addf %202, %201 : vector<8x128xf32>
    %204 = arith.divf %202, %203 : vector<8x128xf32>
    %205 = vector.extract_strided_slice %192 {offsets = [0, 256], sizes = [8, 128], strides = [1, 1]} : vector<8x512xf32> to vector<8x128xf32>
    %206 = math.tanh %205 : vector<8x128xf32>
    %207 = vector.extract_strided_slice %192 {offsets = [0, 384], sizes = [8, 128], strides = [1, 1]} : vector<8x512xf32> to vector<8x128xf32>
    %208 = arith.negf %207 : vector<8x128xf32>
    %209 = math.exp %208 : vector<8x128xf32>
    %cst_58 = arith.constant 1.000000e+00 : f32
    %210 = vector.broadcast %cst_58 : f32 to vector<8x128xf32>
    %211 = arith.addf %210, %209 : vector<8x128xf32>
    %212 = arith.divf %210, %211 : vector<8x128xf32>
    %213 = arith.mulf %204, %186 : vector<8x128xf32>
    %214 = arith.mulf %198, %206 : vector<8x128xf32>
    %215 = arith.addf %213, %214 : vector<8x128xf32>
    %216 = math.tanh %215 : vector<8x128xf32>
    %217 = arith.mulf %212, %216 : vector<8x128xf32>
    %c7 = arith.constant 7 : index
    %c0_59 = arith.constant 0 : index
    %c0_60 = arith.constant 0 : index
    %218 = vector.load %arg8[%c7, %c0_59, %c0_60] : memref<8x8x512xf32, #tpu.memory_space<vmem>>, vector<1x8x512xf32>
    %219 = vector.shape_cast %218 : vector<1x8x512xf32> to vector<8x512xf32>
    %cst_61 = arith.constant dense<0.000000e+00> : vector<8x512xf32>
    %220 = tpu.matmul %217, %3, %cst_61 {dimension_numbers = #tpu.dot_dimension_numbers<[1], [0], [0], [1], [0, 0, 1, 1], [], []>} : vector<8x128xf32>, vector<128x512xf32>, vector<8x512xf32> -> vector<8x512xf32>
    %221 = arith.addf %219, %220 : vector<8x512xf32>
    %222 = vector.extract_strided_slice %221 {offsets = [0, 0], sizes = [8, 128], strides = [1, 1]} : vector<8x512xf32> to vector<8x128xf32>
    %223 = arith.negf %222 : vector<8x128xf32>
    %224 = math.exp %223 : vector<8x128xf32>
    %cst_62 = arith.constant 1.000000e+00 : f32
    %225 = vector.broadcast %cst_62 : f32 to vector<8x128xf32>
    %226 = arith.addf %225, %224 : vector<8x128xf32>
    %227 = arith.divf %225, %226 : vector<8x128xf32>
    %228 = vector.extract_strided_slice %221 {offsets = [0, 128], sizes = [8, 128], strides = [1, 1]} : vector<8x512xf32> to vector<8x128xf32>
    %229 = arith.negf %228 : vector<8x128xf32>
    %230 = math.exp %229 : vector<8x128xf32>
    %cst_63 = arith.constant 1.000000e+00 : f32
    %231 = vector.broadcast %cst_63 : f32 to vector<8x128xf32>
    %232 = arith.addf %231, %230 : vector<8x128xf32>
    %233 = arith.divf %231, %232 : vector<8x128xf32>
    %234 = vector.extract_strided_slice %221 {offsets = [0, 256], sizes = [8, 128], strides = [1, 1]} : vector<8x512xf32> to vector<8x128xf32>
    %235 = math.tanh %234 : vector<8x128xf32>
    %236 = vector.extract_strided_slice %221 {offsets = [0, 384], sizes = [8, 128], strides = [1, 1]} : vector<8x512xf32> to vector<8x128xf32>
    %237 = arith.negf %236 : vector<8x128xf32>
    %238 = math.exp %237 : vector<8x128xf32>
    %cst_64 = arith.constant 1.000000e+00 : f32
    %239 = vector.broadcast %cst_64 : f32 to vector<8x128xf32>
    %240 = arith.addf %239, %238 : vector<8x128xf32>
    %241 = arith.divf %239, %240 : vector<8x128xf32>
    %242 = arith.mulf %233, %215 : vector<8x128xf32>
    %243 = arith.mulf %227, %235 : vector<8x128xf32>
    %244 = arith.addf %242, %243 : vector<8x128xf32>
    %245 = math.tanh %244 : vector<8x128xf32>
    %246 = arith.mulf %241, %245 : vector<8x128xf32>
    %c0_65 = arith.constant 0 : index
    %c0_66 = arith.constant 0 : index
    %247 = vector.load %arg6[%c0_65, %c0_66] : memref<8x128xf32, #tpu.memory_space<vmem>>, vector<8x128xf32>
    tpu.vector_store %arg6[%c0_65, %c0_66], %246 {strides = array<i32>} : memref<8x128xf32, #tpu.memory_space<vmem>>, vector<8x128xf32>,
    %c0_67 = arith.constant 0 : index
    %c0_68 = arith.constant 0 : index
    %248 = vector.load %arg7[%c0_67, %c0_68] : memref<8x128xf32, #tpu.memory_space<vmem>>, vector<8x128xf32>
    tpu.vector_store %arg7[%c0_67, %c0_68], %244 {strides = array<i32>} : memref<8x128xf32, #tpu.memory_space<vmem>>, vector<8x128xf32>,
    return
  }
  func.func @transform_0(%arg0: i32, %arg1: i32) -> (i32, i32, i32) {
    %c0_i32 = arith.constant 0 : i32
    %c0_i32_0 = arith.constant 0 : i32
    return %arg1, %arg0, %c0_i32 : i32, i32, i32
  }
  func.func @transform_1(%arg0: i32, %arg1: i32) -> (i32, i32) {
    %c0_i32 = arith.constant 0 : i32
    %c0_i32_0 = arith.constant 0 : i32
    %c0_i32_1 = arith.constant 0 : i32
    return %c0_i32, %c0_i32_0 : i32, i32
  }
  func.func @transform_2(%arg0: i32, %arg1: i32) -> (i32, i32) {
    %c0_i32 = arith.constant 0 : i32
    %c0_i32_0 = arith.constant 0 : i32
    %c0_i32_1 = arith.constant 0 : i32
    return %c0_i32, %c0_i32_0 : i32, i32
  }
  func.func @transform_3(%arg0: i32, %arg1: i32) -> (i32, i32) {
    %c0_i32 = arith.constant 0 : i32
    %c0_i32_0 = arith.constant 0 : i32
    %c0_i32_1 = arith.constant 0 : i32
    return %c0_i32, %c0_i32_0 : i32, i32
  }
  func.func @transform_4(%arg0: i32, %arg1: i32) -> (i32, i32) {
    %c0_i32 = arith.constant 0 : i32
    %c0_i32_0 = arith.constant 0 : i32
    return %arg0, %c0_i32 : i32, i32
  }
}

</mosaic_0001>

<bundles_post_ra>
// kernel: tpu_custom_call.1
= control target key start
LH: loop header
LB: loop body
LE: loop exit
PB: predicated region body
PF: predicated region fallthrough
CT: control target
= control target key end

     0   :  { %9 = vsyncpa [#allocation5], 0  ;;  %s3249_s0 = inlined_call_operand.hbm [shape: f32[8,8,16], index: 0, kind: input, shape index: {}]   ;;  %s3250_s1 = inlined_call_operand.hbm [shape: f32[16,512], index: 1, kind: input, shape index: {}]   ;;  %s3251_s2 = inlined_call_operand.hbm [shape: f32[128,512], index: 2, kind: input, shape index: {}]   ;;  %s3252_s3 = inlined_call_operand.vmem [shape: f32[1,512], index: 3, kind: input, shape index: {}]   ;;  %s3253_s4 = inlined_call_operand.hbm [shape: f32[8,128], index: 4, kind: output, shape index: {}]  }
   0x1   :  { %10 = vsyncpa [#allocation8], 0 }
   0x2   :  { %11 = vsyncpa [#allocation6], 0  ;;  %s2724_s15 = smov [#allocation7]   ;;  %s2630_s19 = scalar_lea.hbm %s3250_s1, 1024 }
   0x3   :  { %s29_s16 = sshll.u32 %s2724_s15, 4  ;;  %p2631_p0 = scmp.ne.s32.totalorder %s3250_s1, %s2630_s19  ;;  %s30_s16 = int_to_ptr.vmem [resolvable:$true] %s29_s16 }
   0x4   :  { %p2634_p1 = scmp.lt.u32.totalorder %s2630_s19, %s3250_s1 }
   0x6   :  { %p2636_p2 = pnand %p2634_p1, %p2631_p0 }
   0x8   :  { %2639 = shalt.err (!%p2636_p2)
}
   0x9   :  { %s2640_s24 = scalar_lea.vmem %s30_s16, 1024  ;;  %p2645_p4 = scmp.lt.s32.totalorder %s30_s16, %s30_s16 }
   0xa   :  { %p2641_p3 = scmp.ne.s32.totalorder %s30_s16, %s2640_s24  ;;  %p2646_p5 = scmp.lt.s32.totalorder %s2640_s24, %s2640_s24 }
   0xc   :  { %p2647_p6 = por %p2646_p5, %p2645_p4 }
   0xe   :  { %p2648_p7 = pnand %p2647_p6, %p2641_p3 }
  0x10   :  { %2651 = shalt.err (!%p2648_p7)
}
  0x11   :  { %s2725_s25 = smov 512   ;;  %s2726_s26 = smov 32  }
  0x12   :  { %35 = dma.hbm_to_vmem [thread:$0]  %s3250_s1, 1024, %s30_s16, [#allocation8], %s2725_s25, %s2725_s25, %s2726_s26  }
  0x13   :  { %s2727_s29 = smov [#allocation4]   ;;  %s2652_s7 = scalar_lea.hbm %s3249_s0, 1024 }
  0x14   :  { %s17_s30 = sshll.u32 %s2727_s29, 4  ;;  %p2653_p8 = scmp.ne.s32.totalorder %s3249_s0, %s2652_s7  ;;  %s18_s30 = int_to_ptr.vmem [resolvable:$true] %s17_s30 }
  0x15   :  { %p2656_p9 = scmp.lt.u32.totalorder %s2652_s7, %s3249_s0 }
  0x17   :  { %p2658_p10 = pnand %p2656_p9, %p2653_p8 }
  0x19   :  { %2661 = shalt.err (!%p2658_p10)
}
  0x1a   :  { %s2662_s12 = scalar_lea.vmem %s18_s30, 1024  ;;  %p2667_p12 = scmp.lt.s32.totalorder %s18_s30, %s18_s30 }
  0x1b   :  { %p2663_p11 = scmp.ne.s32.totalorder %s18_s30, %s2662_s12  ;;  %p2668_p13 = scmp.lt.s32.totalorder %s2662_s12, %s2662_s12 }
  0x1d   :  { %p2669_p0 = por %p2668_p13, %p2667_p12 }
  0x1f   :  { %p2670_p1 = pnand %p2669_p0, %p2663_p11 }
  0x21   :  { %2673 = shalt.err (!%p2670_p1)
}
  0x22   :  { %s2728_s1 = smov 128   ;;  %s2729_s13 = smov 8  }
  0x23   :  { %23 = dma.hbm_to_vmem [thread:$0]  %s3249_s0, 1024, %s18_s30, [#allocation5], %s2728_s1, %s2728_s1, %s2729_s13  }
  0x24   :  { %s2730_s16 = smov [#allocation9]   ;;  %s2674_s20 = scalar_lea.hbm %s3251_s2, 8192 }
  0x25   :  { %s41_s17 = sshll.u32 %s2730_s16, 4  ;;  %p2675_p2 = scmp.ne.s32.totalorder %s3251_s2, %s2674_s20  ;;  %s42_s17 = int_to_ptr.vmem [resolvable:$true] %s41_s17 }
  0x26   :  { %p2678_p3 = scmp.lt.u32.totalorder %s2674_s20, %s3251_s2 }
  0x28   :  { %p2680_p4 = pnand %p2678_p3, %p2675_p2 }
  0x2a   :  { %2683 = shalt.err (!%p2680_p4)
}
  0x2b   :  { %s2684_s27 = scalar_lea.vmem %s42_s17, 8192  ;;  %p2689_p6 = scmp.lt.s32.totalorder %s42_s17, %s42_s17 }
  0x2c   :  { %p2685_p5 = scmp.ne.s32.totalorder %s42_s17, %s2684_s27  ;;  %p2690_p7 = scmp.lt.s32.totalorder %s2684_s27, %s2684_s27 }
  0x2e   :  { %p2691_p8 = por %p2690_p7, %p2689_p6 }
  0x30   :  { %p2692_p9 = pnand %p2691_p8, %p2685_p5 }
  0x32   :  { %2695 = shalt.err (!%p2692_p9)
}
  0x33   :  { %47 = dma.hbm_to_vmem [thread:$0]  %s3251_s2, 8192, %s42_s17, [#allocation8], %s2725_s25, %s2725_s25, %s2726_s26  }
  0x34   :  { %2718 = dma.done.wait [#allocation5], 1024  }
  0x35   :  { %2719 = vsyncadd [#allocation5], 4294966272 }
  0x36   :  { %2720 = dma.done.wait [#allocation8], 9216  }
  0x37   :  { %2721 = vsyncadd [#allocation8], 4294958080  ;;  %v2731_v0 = vmov 0.0   ;;  %v138_v1 = vld [vmem:[#allocation7 + $0x8] sm:$0xff]  ;;  %v140_v3 = vld [vmem:[#allocation7 + $0x18] sm:$0xff]  ;;  %vm167_vm0 = vcmask 130048  }
  0x38   :  { %256 = vmatprep.mubr.f32.mxu0 %v2731_v0  ;;  %369 = vmatprep.mubr.f32.mxu1 %v2731_v0  ;;  %v142_v2 = vld [vmem:[#allocation7 + $0x28] sm:$0xff]  ;;  %v144_v5 = vld [vmem:[#allocation7 + $0x38] sm:$0xff]  ;;  %v137_v6 = vld [vmem:[#allocation7] sm:$0xff] }
  0x39   :  { %v1909_v4 = vpack.c.bf16 %v142_v2, %v138_v1  ;;  %v141_v7 = vld [vmem:[#allocation7 + $0x20] sm:$0xff]  ;;  %v1913_v8 = vpack.c.bf16 %v144_v5, %v140_v3  ;;  %v139_v10 = vld [vmem:[#allocation7 + $0x10] sm:$0xff]  ;;  %v66_v14 = vld [vmem:[#allocation9 + $0x8] sm:$0xff] }
  0x3a   :  { %v1911_v9 = vpack.c.bf16 %v141_v7, %v137_v6  ;;  %v143_v11 = vld [vmem:[#allocation7 + $0x30] sm:$0xff]  ;;  %v129_v12 = vld [vmem:[#allocation4] sm:$0xff]  ;;  %v70_v15 = vld [vmem:[#allocation9 + $0x28] sm:$0xff] }
  0x3b   :  { %1910 = vmatprep.subr.bf16.mxu0 %v1909_v4  ;;  %v1915_v13 = vpack.c.bf16 %v143_v11, %v139_v10  ;;  %v68_v16 = vld [vmem:[#allocation9 + $0x18] sm:$0xff]  ;;  %1914 = vmatprep.subr.bf16.mxu1 %v1913_v8  ;;  %v2802_v17 = vpack.c.bf16 %v70_v15, %v66_v14  ;;  %v65_v19 = vld [vmem:[#allocation9] sm:$0xff]  ;;  %v67_v23 = vld [vmem:[#allocation9 + $0x10] sm:$0xff] }
  0x3c   :  { %1912 = vmatpush1.bf16.msra.mxu0 %v1911_v9  ;;  %v72_v18 = vld [vmem:[#allocation9 + $0x38] sm:$0xff]  ;;  %v69_v20 = vld [vmem:[#allocation9 + $0x20] sm:$0xff]  ;;  %v71_v24 = vld [vmem:[#allocation9 + $0x30] sm:$0xff] }
  0x3d   :  { %1916 = vmatpush1.bf16.msra.mxu1 %v1915_v13  ;;  %v2804_v21 = vpack.c.bf16 %v72_v18, %v68_v16  ;;  %v2806_v22 = vpack.c.bf16 %v69_v20, %v65_v19  ;;  %1918 = vmatprep.subr.bf16.mxu0 %v2802_v17  ;;  %v2809_v25 = vpack.c.bf16 %v71_v24, %v67_v23  ;;  %v74_v26 = vld [vmem:[#allocation9 + $0x48] sm:$0xff]  ;;  %v76_v28 = vld [vmem:[#allocation9 + $0x58] sm:$0xff]  ;;  %v73_v31 = vld [vmem:[#allocation9 + $0x40] sm:$0xff] }
  0x3e   :  { %v78_v27 = vld [vmem:[#allocation9 + $0x68] sm:$0xff]  ;;  %v80_v30 = vld [vmem:[#allocation9 + $0x78] sm:$0xff]  ;;  %v77_v32 = vld [vmem:[#allocation9 + $0x60] sm:$0xff] }
  0x3f   :  { %1869 = vmatmul.mubr.msk.f32.vlgmr.msra.gmra.mrb[0].mxu0 %vm167_vm0, %v129_v12  ;;  %1950 = vmatprep.subr.bf16.mxu1 %v2804_v21  ;;  %v2813_v29 = vpack.c.bf16 %v78_v27, %v74_v26  ;;  %v130_v33 = vld [vmem:[#allocation4 + $0x8] sm:$0xff]  ;;  %v2817_v34 = vpack.c.bf16 %v80_v30, %v76_v28  ;;  %v2819_v35 = vpack.c.bf16 %v77_v32, %v73_v31  ;;  %v75_v36 = vld [vmem:[#allocation9 + $0x50] sm:$0xff]  ;;  %v84_v41 = vld [vmem:[#allocation9 + $0x98] sm:$0xff] }
  0x40   :  { %1877 = vmatmul.mubr.msk.f32.vlgmr.msra.gmra.mrb[0].mxu1 %vm167_vm0, %v129_v12  ;;  %1920 = vmatpush1.bf16.msra.mxu0 %v2806_v22  ;;  %v79_v37 = vld [vmem:[#allocation9 + $0x70] sm:$0xff]  ;;  %v82_v39 = vld [vmem:[#allocation9 + $0x88] sm:$0xff]  ;;  %v88_v43 = vld [vmem:[#allocation9 + $0xb8] sm:$0xff] }
  0x41   :  { %1952 = vmatpush1.bf16.msra.mxu1 %v2809_v25  ;;  %262 = vmatprep.mubr.f32.mxu0 %v2731_v0  ;;  %v2823_v38 = vpack.c.bf16 %v79_v37, %v75_v36  ;;  %v86_v40 = vld [vmem:[#allocation9 + $0xa8] sm:$0xff]  ;;  %v81_v44 = vld [vmem:[#allocation9 + $0x80] sm:$0xff]  ;;  %v131_v46 = vld [vmem:[#allocation4 + $0x10] sm:$0xff]  ;;  %v2831_v47 = vpack.c.bf16 %v88_v43, %v84_v41 }
  0x42   :  { %375 = vmatprep.mubr.f32.mxu1 %v2731_v0  ;;  %1922 = vmatprep.subr.bf16.mxu0 %v2813_v29  ;;  %v2827_v42 = vpack.c.bf16 %v86_v40, %v82_v39  ;;  %v85_v45 = vld [vmem:[#allocation9 + $0xa0] sm:$0xff]  ;;  %v83_v48 = vld [vmem:[#allocation9 + $0x90] sm:$0xff]  ;;  %v90_v51 = vld [vmem:[#allocation9 + $0xc8] sm:$0xff] }
  0x43   :  { %1870 = vmatmul.mubr.msk.f32.gmra.mrb[2].mxu0 %vm167_vm0, %v130_v33  ;;  %1954 = vmatprep.subr.bf16.mxu1 %v2817_v34  ;;  %v87_v49 = vld [vmem:[#allocation9 + $0xb0] sm:$0xff]  ;;  %v2835_v50 = vpack.c.bf16 %v85_v45, %v81_v44  ;;  %v94_v52 = vld [vmem:[#allocation9 + $0xe8] sm:$0xff]  ;;  %v92_v53 = vld [vmem:[#allocation9 + $0xd8] sm:$0xff] }
  0x44   :  { %1878 = vmatmul.mubr.msk.f32.gmra.mrb[2].mxu1 %vm167_vm0, %v130_v33  ;;  %1924 = vmatpush1.bf16.msra.mxu0 %v2819_v35  ;;  %v2839_v54 = vpack.c.bf16 %v87_v49, %v83_v48  ;;  %v96_v55 = vld [vmem:[#allocation9 + $0xf8] sm:$0xff]  ;;  %v89_v56 = vld [vmem:[#allocation9 + $0xc0] sm:$0xff]  ;;  %v2843_v58 = vpack.c.bf16 %v94_v52, %v90_v51  ;;  %v91_v59 = vld [vmem:[#allocation9 + $0xd0] sm:$0xff] }
  0x45   :  { %1956 = vmatpush1.bf16.msra.mxu1 %v2823_v38  ;;  %268 = vmatprep.mubr.f32.mxu0 %v2731_v0  ;;  %v93_v57 = vld [vmem:[#allocation9 + $0xe0] sm:$0xff]  ;;  %v95_v60 = vld [vmem:[#allocation9 + $0xf0] sm:$0xff]  ;;  %v2847_v61 = vpack.c.bf16 %v96_v55, %v92_v53  ;;  %v98_v62 = vld [vmem:[#allocation9 + $0x108] sm:$0xff] }
  0x46   :  { %381 = vmatprep.mubr.f32.mxu1 %v2731_v0  ;;  %1926 = vmatprep.subr.bf16.mxu0 %v2827_v42  ;;  %v102_v63 = vld [vmem:[#allocation9 + $0x128] sm:$0xff]  ;;  %v132_v1 = vld [vmem:[#allocation4 + $0x18] sm:$0xff]  ;;  %v2851_v2 = vpack.c.bf16 %v93_v57, %v89_v56  ;;  %v2855_v5 = vpack.c.bf16 %v95_v60, %v91_v59  ;;  %v97_v6 = vld [vmem:[#allocation9 + $0x100] sm:$0xff] }
  0x47   :  { %1871 = vmatmul.mubr.msk.f32.gmra.mrb[4].mxu0 %vm167_vm0, %v131_v46  ;;  %1958 = vmatprep.subr.bf16.mxu1 %v2831_v47  ;;  %v100_v3 = vld [vmem:[#allocation9 + $0x118] sm:$0xff]  ;;  %v101_v7 = vld [vmem:[#allocation9 + $0x120] sm:$0xff]  ;;  %v2859_v8 = vpack.c.bf16 %v102_v63, %v98_v62  ;;  %v99_v9 = vld [vmem:[#allocation9 + $0x110] sm:$0xff] }
  0x48   :  { %1879 = vmatmul.mubr.msk.f32.gmra.mrb[4].mxu1 %vm167_vm0, %v131_v46  ;;  %1928 = vmatpush1.bf16.msra.mxu0 %v2835_v50  ;;  %v104_v4 = vld [vmem:[#allocation9 + $0x138] sm:$0xff]  ;;  %v103_v10 = vld [vmem:[#allocation9 + $0x130] sm:$0xff]  ;;  %v106_v12 = vld [vmem:[#allocation9 + $0x148] sm:$0xff]  ;;  %v2867_v15 = vpack.c.bf16 %v101_v7, %v97_v6  ;;  %v147_v7 = vlaneseq }
  0x49   :  { %1960 = vmatpush1.bf16.msra.mxu1 %v2839_v54  ;;  %274 = vmatprep.mubr.f32.mxu0 %v2731_v0  ;;  %v2863_v11 = vpack.c.bf16 %v104_v4, %v100_v3  ;;  %v110_v13 = vld [vmem:[#allocation9 + $0x168] sm:$0xff]  ;;  %v133_v14 = vld [vmem:[#allocation4 + $0x20] sm:$0xff]  ;;  %v108_v16 = vld [vmem:[#allocation9 + $0x158] sm:$0xff]  ;;  %v2871_v19 = vpack.c.bf16 %v103_v10, %v99_v9 }
  0x4a   :  { %387 = vmatprep.mubr.f32.mxu1 %v2731_v0  ;;  %1930 = vmatprep.subr.bf16.mxu0 %v2843_v58  ;;  %v112_v18 = vld [vmem:[#allocation9 + $0x178] sm:$0xff]  ;;  %v105_v20 = vld [vmem:[#allocation9 + $0x140] sm:$0xff]  ;;  %v2875_v24 = vpack.c.bf16 %v110_v13, %v106_v12  ;;  %v107_v26 = vld [vmem:[#allocation9 + $0x150] sm:$0xff]  ;;  %v148_v9 = vshrl.u32 %v147_v7, 7 }
  0x4b   :  { %1872 = vmatmul.mubr.msk.f32.gmra.mrb[6].mxu0 %vm167_vm0, %v132_v1  ;;  %1962 = vmatprep.subr.bf16.mxu1 %v2847_v61  ;;  %v109_v23 = vld [vmem:[#allocation9 + $0x160] sm:$0xff]  ;;  %v111_v27 = vld [vmem:[#allocation9 + $0x170] sm:$0xff]  ;;  %v2879_v28 = vpack.c.bf16 %v112_v18, %v108_v16  ;;  %v114_v30 = vld [vmem:[#allocation9 + $0x188] sm:$0xff] }
  0x4c   :  { %1880 = vmatmul.mubr.msk.f32.gmra.mrb[6].mxu1 %vm167_vm0, %v132_v1  ;;  %1932 = vmatpush1.bf16.msra.mxu0 %v2851_v2  ;;  %v118_v31 = vld [vmem:[#allocation9 + $0x1a8] sm:$0xff]  ;;  %v2883_v33 = vpack.c.bf16 %v109_v23, %v105_v20  ;;  %v116_v36 = vld [vmem:[#allocation9 + $0x198] sm:$0xff]  ;;  %v2887_v39 = vpack.c.bf16 %v111_v27, %v107_v26  ;;  %v113_v40 = vld [vmem:[#allocation9 + $0x180] sm:$0xff]  ;;  %v149_v10 = vsub.s32 0, %v148_v9  ;;  %v153_v13 = vsub.s32 1, %v148_v9 }
  0x4d   :  { %1964 = vmatpush1.bf16.msra.mxu1 %v2855_v5  ;;  %280 = vmatprep.mubr.f32.mxu0 %v2731_v0  ;;  %v134_v32 = vld [vmem:[#allocation4 + $0x28] sm:$0xff]  ;;  %v120_v37 = vld [vmem:[#allocation9 + $0x1b8] sm:$0xff]  ;;  %v117_v41 = vld [vmem:[#allocation9 + $0x1a0] sm:$0xff]  ;;  %v2891_v43 = vpack.c.bf16 %v118_v31, %v114_v30  ;;  %v161_v20 = vsub.s32 3, %v148_v9 }
  0x4e   :  { %393 = vmatprep.mubr.f32.mxu1 %v2731_v0  ;;  %1934 = vmatprep.subr.bf16.mxu0 %v2859_v8  ;;  %v115_v44 = vld [vmem:[#allocation9 + $0x190] sm:$0xff]  ;;  %v2895_v46 = vpack.c.bf16 %v120_v37, %v116_v36  ;;  %v122_v48 = vld [vmem:[#allocation9 + $0x1c8] sm:$0xff]  ;;  %v2899_v52 = vpack.c.bf16 %v117_v41, %v113_v40  ;;  %v124_v53 = vld [vmem:[#allocation9 + $0x1d8] sm:$0xff]  ;;  %v157_v40 = vsub.s32 2, %v148_v9 }
  0x4f   :  { %1873 = vmatmul.mubr.msk.f32.gmra.mrb[8].mxu0 %vm167_vm0, %v133_v14  ;;  %1966 = vmatprep.subr.bf16.mxu1 %v2863_v11  ;;  %v119_v45 = vld [vmem:[#allocation9 + $0x1b0] sm:$0xff]  ;;  %v126_v49 = vld [vmem:[#allocation9 + $0x1e8] sm:$0xff]  ;;  %v128_v55 = vld [vmem:[#allocation9 + $0x1f8] sm:$0xff] }
  0x50   :  { %1881 = vmatmul.mubr.msk.f32.gmra.mrb[8].mxu1 %vm167_vm0, %v133_v14  ;;  %1936 = vmatpush1.bf16.msra.mxu0 %v2867_v15  ;;  %v135_v51 = vld [vmem:[#allocation4 + $0x30] sm:$0xff]  ;;  %v2903_v56 = vpack.c.bf16 %v119_v45, %v115_v44  ;;  %v121_v57 = vld [vmem:[#allocation9 + $0x1c0] sm:$0xff]  ;;  %v2907_v60 = vpack.c.bf16 %v126_v49, %v122_v48  ;;  %v2911_v1 = vpack.c.bf16 %v128_v55, %v124_v53  ;;  %v136_v3 = vld [vmem:[#allocation4 + $0x38] sm:$0xff] }
  0x51   :  { %1968 = vmatpush1.bf16.msra.mxu1 %v2871_v19  ;;  %286 = vmatprep.mubr.f32.mxu0 %v2731_v0  ;;  %v125_v59 = vld [vmem:[#allocation9 + $0x1e0] sm:$0xff]  ;;  %v123_v62 = vld [vmem:[#allocation9 + $0x1d0] sm:$0xff] }
  0x52   :  { %399 = vmatprep.mubr.f32.mxu1 %v2731_v0  ;;  %1938 = vmatprep.subr.bf16.mxu0 %v2875_v24  ;;  %v127_v63 = vld [vmem:[#allocation9 + $0x1f0] sm:$0xff]  ;;  %v2915_v4 = vpack.c.bf16 %v125_v59, %v121_v57  ;;  %v145_v12 = vld [vmem:[%s3252_s3] sm:$0xf]  ;;  %s2732_s3 = smov [#allocation10]  }
  0x53   :  { %1874 = vmatmul.mubr.msk.f32.gmra.mrb[10].mxu0 %vm167_vm0, %v134_v32  ;;  %1970 = vmatprep.subr.bf16.mxu1 %v2879_v28  ;;  %v2919_v6 = vpack.c.bf16 %v127_v63, %v123_v62  ;;  %v2971_v14 = vrot.slane %v145_v12, %v149_v10  ;;  %v2973_v16 = vrot.slane %v145_v12, %v153_v13  ;;  %s1859_s26 = sshll.u32 %s2732_s3, 4  ;;  %s1860_s26 = int_to_ptr.vmem [resolvable:$true] %s1859_s26 }
  0x54   :  { %1882 = vmatmul.mubr.msk.f32.gmra.mrb[10].mxu1 %vm167_vm0, %v134_v32  ;;  %1940 = vmatpush1.bf16.msra.mxu0 %v2883_v33  ;;  %v2977_v37 = vrot.slane %v145_v12, %v161_v20  ;;  %v2980_v44 = vrot.slane %v145_v12, %v157_v40  ;;  %s2696_s29 = scalar_lea.vmem %s1860_s26, 128  ;;  %p2701_p11 = scmp.lt.s32.totalorder %s1860_s26, %s1860_s26 }
  0x55   :  { %1972 = vmatpush1.bf16.msra.mxu1 %v2887_v39  ;;  %292 = vmatprep.mubr.f32.mxu0 %v2731_v0  ;;  %p2697_p10 = scmp.ne.s32.totalorder %s1860_s26, %s2696_s29  ;;  %p2702_p12 = scmp.lt.s32.totalorder %s2696_s29, %s2696_s29 }
  0x56   :  { %405 = vmatprep.mubr.f32.mxu1 %v2731_v0  ;;  %1942 = vmatprep.subr.bf16.mxu0 %v2891_v43 }
  0x57   :  { %1875 = vmatmul.mubr.msk.f32.gmra.mrb[12].mxu0 %vm167_vm0, %v135_v51  ;;  %1974 = vmatprep.subr.bf16.mxu1 %v2895_v46  ;;  %p2703_p13 = por %p2702_p12, %p2701_p11 }
  0x58   :  { %1883 = vmatmul.mubr.msk.f32.gmra.mrb[12].mxu1 %vm167_vm0, %v135_v51  ;;  %1944 = vmatpush1.bf16.msra.mxu0 %v2899_v52 }
  0x59   :  { %1976 = vmatpush1.bf16.msra.mxu1 %v2903_v56  ;;  %298 = vmatprep.mubr.f32.mxu0 %v2731_v0  ;;  %p2704_p0 = pnand %p2703_p13, %p2697_p10 }
  0x5a   :  { %411 = vmatprep.mubr.f32.mxu1 %v2731_v0  ;;  %1946 = vmatprep.subr.bf16.mxu0 %v2907_v60 }
  0x5b   :  { %1876 = vmatmul.mubr.msk.f32.gmra.mrb[14].mxu0 %vm167_vm0, %v136_v3  ;;  %1978 = vmatprep.subr.bf16.mxu1 %v2911_v1 }
  0x5c   :  { %1884 = vmatmul.mubr.msk.f32.gmra.mrb[14].mxu1 %vm167_vm0, %v136_v3  ;;  %1948 = vmatpush1.bf16.msra.mxu0 %v2915_v4 }
  0x5d   :  { %1980 = vmatpush1.bf16.msra.mxu1 %v2919_v6  ;;  %520 = vmatprep.mubr.f32.mxu0 %v2731_v0 }
  0x5e   :  { %591 = vmatprep.mubr.f32.mxu1 %v2731_v0  ;;  %1982 = vmatprep.subr.bf16.mxu0 %v2802_v17 }
  0x5f   :  { %521 = vmatmul.mubr.f32.vlgmr.msra.gmra.mrb[0].mxu0 %v2731_v0  ;;  %2014 = vmatprep.subr.bf16.mxu1 %v2804_v21 }
  0x60   :  { %592 = vmatmul.mubr.f32.vlgmr.msra.gmra.mrb[0].mxu1 %v2731_v0  ;;  %1984 = vmatpush1.bf16.msra.mxu0 %v2806_v22 }
  0x61   :  { %2016 = vmatpush1.bf16.msra.mxu1 %v2809_v25  ;;  %1986 = vmatprep.subr.bf16.mxu0 %v2813_v29 }
  0x62   :  { %2018 = vmatprep.subr.bf16.mxu1 %v2817_v34  ;;  %695 = vmatprep.mubr.f32.mxu0 %v2731_v0 }
  0x63   :  { %766 = vmatprep.mubr.f32.mxu1 %v2731_v0 }
  0x64   :  { %1988 = vmatpush1.bf16.msra.mxu0 %v2819_v35 }
  0x65   :  { %2020 = vmatpush1.bf16.msra.mxu1 %v2823_v38  ;;  %1990 = vmatprep.subr.bf16.mxu0 %v2827_v42 }
  0x66   :  { %2022 = vmatprep.subr.bf16.mxu1 %v2831_v47 }
  0x68   :  { %1992 = vmatpush1.bf16.msra.mxu0 %v2835_v50 }
  0x69   :  { %2024 = vmatpush1.bf16.msra.mxu1 %v2839_v54  ;;  %1994 = vmatprep.subr.bf16.mxu0 %v2843_v58 }
  0x6a   :  { %2026 = vmatprep.subr.bf16.mxu1 %v2847_v61 }
  0x6c   :  { %1996 = vmatpush1.bf16.msra.mxu0 %v2851_v2 }
  0x6d   :  { %2028 = vmatpush1.bf16.msra.mxu1 %v2855_v5  ;;  %1998 = vmatprep.subr.bf16.mxu0 %v2859_v8 }
  0x6e   :  { %2030 = vmatprep.subr.bf16.mxu1 %v2863_v11 }
  0x70   :  { %2000 = vmatpush1.bf16.msra.mxu0 %v2867_v15 }
  0x71   :  { %2032 = vmatpush1.bf16.msra.mxu1 %v2871_v19  ;;  %2002 = vmatprep.subr.bf16.mxu0 %v2875_v24 }
  0x72   :  { %2034 = vmatprep.subr.bf16.mxu1 %v2879_v28 }
  0x74   :  { %2004 = vmatpush1.bf16.msra.mxu0 %v2883_v33 }
  0x75   :  { %2036 = vmatpush1.bf16.msra.mxu1 %v2887_v39  ;;  %2006 = vmatprep.subr.bf16.mxu0 %v2891_v43 }
  0x76   :  { %2038 = vmatprep.subr.bf16.mxu1 %v2895_v46 }
  0x78   :  { %2008 = vmatpush1.bf16.msra.mxu0 %v2899_v52 }
  0x79   :  { %2040 = vmatpush1.bf16.msra.mxu1 %v2903_v56  ;;  %2010 = vmatprep.subr.bf16.mxu0 %v2907_v60 }
  0x7a   :  { %2042 = vmatprep.subr.bf16.mxu1 %v2911_v1 }
  0x7c   :  { %2012 = vmatpush1.bf16.msra.mxu0 %v2915_v4 }
  0x7d   :  { %2044 = vmatpush1.bf16.msra.mxu1 %v2919_v6  ;;  %2046 = vmatprep.subr.bf16.mxu0 %v2802_v17 }
  0x7e   :  { %2078 = vmatprep.subr.bf16.mxu1 %v2804_v21 }
 0x132   :  { %v522_v18 = vpop.f32.mrb[0].mxu0 }
 0x133   :  { %v2429_v23 = vadd.f32 %v522_v18, %v2971_v14  ;;  %v593_v26 = vpop.f32.mrb[0].mxu1  ;;  %v524_v27 = vpop.f32.mrb[1].mxu0 }
 0x134   :  { %v2430_v30 = vadd.f32 %v524_v27, %v2973_v16  ;;  %v595_v31 = vpop.f32.mrb[1].mxu1  ;;  %v2445_v48 = vadd.f32 %v593_v26, %v2980_v44 }
 0x135   :  { %v1885_v32 = vmul.f32 -1.442695, %v2429_v23  ;;  %v2446_v41 = vadd.f32 %v595_v31, %v2977_v37 }
 0x136   :  { %v1886_v36 = vmul.f32 -1.442695, %v2430_v30 }
 0x137   :  { %2502 = vpow2.f32 %v1885_v32  ;;  %v1887_v45 = vmul.f32 -1.442695, %v2446_v41 }
 0x138   :  { %2504 = vpow2.f32 %v1886_v36 }
 0x139   :  { %2506 = vpow2.f32 %v1887_v45 }
 0x13a   :  { %2508 = vtanh.f32 %v2445_v48 }
 0x141   :  { %v2503_v49 = vpop.eup %2502 }
 0x142   :  { %v2505_v51 = vpop.eup %2504  ;;  %v605_v53 = vadd.f32 1.0, %v2503_v49 }
 0x143   :  { %v611_v55 = vadd.f32 1.0, %v2505_v51  ;;  %v2507_v57 = vpop.eup %2506 }
 0x144   :  { %2510 = vrcp.f32 %v605_v53  ;;  %v2509_v59 = vpop.eup %2508  ;;  %v618_v7 = vadd.f32 1.0, %v2507_v57 }
 0x145   :  { %2512 = vrcp.f32 %v611_v55 }
 0x146   :  { %2514 = vrcp.f32 %v618_v7 }
 0x14e   :  { %v2511_v62 = vpop.eup %2510 }
 0x14f   :  { %v2513_v63 = vpop.eup %2512  ;;  %v622_v3 = vmul.f32 %v2511_v62, %v2509_v59 }
 0x150   :  { %v621_v9 = vmul.f32 0.0, %v2513_v63  ;;  %v2515_v12 = vpop.eup %2514 }
 0x152   :  { %v2983_v10 = vadd.f32 %v622_v3, %v621_v9 }
 0x154   :  { %2516 = vtanh.f32 %v2983_v10 }
 0x15e   :  { %v2517_v13 = vpop.eup %2516 }
 0x15f   :  { %v625_v18 = vmul.f32 %v2517_v13, %v2515_v12 }
 0x161   :  { %696 = vmatmul.mubr.f32.vlgmr.msra.gmra.mrb[2].mxu0 %v625_v18  ;;  %767 = vmatmul.mubr.f32.vlgmr.msra.gmra.mrb[2].mxu1 %v625_v18 }
 0x162   :  { %2048 = vmatpush1.bf16.msra.mxu0 %v2806_v22  ;;  %2080 = vmatpush1.bf16.msra.mxu1 %v2809_v25 }
 0x163   :  { %2050 = vmatprep.subr.bf16.mxu0 %v2813_v29  ;;  %2082 = vmatprep.subr.bf16.mxu1 %v2817_v34 }
 0x164   :  { %870 = vmatprep.mubr.f32.mxu0 %v2731_v0  ;;  %941 = vmatprep.mubr.f32.mxu1 %v2731_v0 }
 0x166   :  { %2052 = vmatpush1.bf16.msra.mxu0 %v2819_v35  ;;  %2084 = vmatpush1.bf16.msra.mxu1 %v2823_v38 }
 0x167   :  { %2054 = vmatprep.subr.bf16.mxu0 %v2827_v42  ;;  %2086 = vmatprep.subr.bf16.mxu1 %v2831_v47 }
 0x16a   :  { %2056 = vmatpush1.bf16.msra.mxu0 %v2835_v50  ;;  %2088 = vmatpush1.bf16.msra.mxu1 %v2839_v54 }
 0x16b   :  { %2058 = vmatprep.subr.bf16.mxu0 %v2843_v58  ;;  %2090 = vmatprep.subr.bf16.mxu1 %v2847_v61 }
 0x16e   :  { %2060 = vmatpush1.bf16.msra.mxu0 %v2851_v2  ;;  %2092 = vmatpush1.bf16.msra.mxu1 %v2855_v5 }
 0x16f   :  { %2062 = vmatprep.subr.bf16.mxu0 %v2859_v8  ;;  %2094 = vmatprep.subr.bf16.mxu1 %v2863_v11 }
 0x172   :  { %2064 = vmatpush1.bf16.msra.mxu0 %v2867_v15  ;;  %2096 = vmatpush1.bf16.msra.mxu1 %v2871_v19 }
 0x173   :  { %2066 = vmatprep.subr.bf16.mxu0 %v2875_v24  ;;  %2098 = vmatprep.subr.bf16.mxu1 %v2879_v28 }
 0x176   :  { %2068 = vmatpush1.bf16.msra.mxu0 %v2883_v33  ;;  %2100 = vmatpush1.bf16.msra.mxu1 %v2887_v39 }
 0x177   :  { %2070 = vmatprep.subr.bf16.mxu0 %v2891_v43  ;;  %2102 = vmatprep.subr.bf16.mxu1 %v2895_v46 }
 0x17a   :  { %2072 = vmatpush1.bf16.msra.mxu0 %v2899_v52  ;;  %2104 = vmatpush1.bf16.msra.mxu1 %v2903_v56 }
 0x17b   :  { %2074 = vmatprep.subr.bf16.mxu0 %v2907_v60  ;;  %2106 = vmatprep.subr.bf16.mxu1 %v2911_v1 }
 0x17e   :  { %2076 = vmatpush1.bf16.msra.mxu0 %v2915_v4  ;;  %2108 = vmatpush1.bf16.msra.mxu1 %v2919_v6 }
 0x17f   :  { %2110 = vmatprep.subr.bf16.mxu0 %v2802_v17  ;;  %2142 = vmatprep.subr.bf16.mxu1 %v2804_v21 }
 0x234   :  { %v697_v20 = vpop.f32.mrb[2].mxu0  ;;  %v768_v23 = vpop.f32.mrb[2].mxu1 }
 0x235   :  { %v2431_v26 = vadd.f32 %v697_v20, %v2971_v14  ;;  %v699_v27 = vpop.f32.mrb[3].mxu0  ;;  %v770_v30 = vpop.f32.mrb[3].mxu1  ;;  %v2447_v45 = vadd.f32 %v768_v23, %v2980_v44 }
 0x236   :  { %v2432_v31 = vadd.f32 %v699_v27, %v2973_v16  ;;  %v2448_v40 = vadd.f32 %v770_v30, %v2977_v37 }
 0x237   :  { %v1888_v32 = vmul.f32 -1.442695, %v2431_v26 }
 0x238   :  { %v1889_v36 = vmul.f32 -1.442695, %v2432_v31  ;;  %v1890_v41 = vmul.f32 -1.442695, %v2448_v40 }
 0x239   :  { %2518 = vpow2.f32 %v1888_v32 }
 0x23a   :  { %2520 = vpow2.f32 %v1889_v36 }
 0x23b   :  { %2522 = vpow2.f32 %v1890_v41 }
 0x23c   :  { %2524 = vtanh.f32 %v2447_v45 }
 0x243   :  { %v2519_v48 = vpop.eup %2518 }
 0x244   :  { %v2521_v49 = vpop.eup %2520  ;;  %v780_v51 = vadd.f32 1.0, %v2519_v48 }
 0x245   :  { %v786_v53 = vadd.f32 1.0, %v2521_v49  ;;  %v2523_v55 = vpop.eup %2522 }
 0x246   :  { %2526 = vrcp.f32 %v780_v51  ;;  %v2525_v57 = vpop.eup %2524  ;;  %v793_v3 = vadd.f32 1.0, %v2523_v55 }
 0x247   :  { %2528 = vrcp.f32 %v786_v53 }
 0x248   :  { %2530 = vrcp.f32 %v793_v3 }
 0x250   :  { %v2527_v59 = vpop.eup %2526 }
 0x251   :  { %v2529_v62 = vpop.eup %2528  ;;  %v797_v63 = vmul.f32 %v2527_v59, %v2525_v57 }
 0x252   :  { %v796_v7 = vmul.f32 %v2529_v62, %v2983_v10  ;;  %v2531_v12 = vpop.eup %2530 }
 0x254   :  { %v3025_v9 = vadd.f32 %v797_v63, %v796_v7 }
 0x256   :  { %2532 = vtanh.f32 %v3025_v9 }
 0x260   :  { %v2533_v13 = vpop.eup %2532 }
 0x261   :  { %v800_v18 = vmul.f32 %v2533_v13, %v2531_v12 }
 0x263   :  { %871 = vmatmul.mubr.f32.vlgmr.msra.gmra.mrb[4].mxu0 %v800_v18  ;;  %942 = vmatmul.mubr.f32.vlgmr.msra.gmra.mrb[4].mxu1 %v800_v18 }
 0x264   :  { %2112 = vmatpush1.bf16.msra.mxu0 %v2806_v22  ;;  %2144 = vmatpush1.bf16.msra.mxu1 %v2809_v25 }
 0x265   :  { %2114 = vmatprep.subr.bf16.mxu0 %v2813_v29  ;;  %2146 = vmatprep.subr.bf16.mxu1 %v2817_v34 }
 0x266   :  { %1045 = vmatprep.mubr.f32.mxu0 %v2731_v0  ;;  %1116 = vmatprep.mubr.f32.mxu1 %v2731_v0 }
 0x268   :  { %2116 = vmatpush1.bf16.msra.mxu0 %v2819_v35  ;;  %2148 = vmatpush1.bf16.msra.mxu1 %v2823_v38 }
 0x269   :  { %2118 = vmatprep.subr.bf16.mxu0 %v2827_v42  ;;  %2150 = vmatprep.subr.bf16.mxu1 %v2831_v47 }
 0x26c   :  { %2120 = vmatpush1.bf16.msra.mxu0 %v2835_v50  ;;  %2152 = vmatpush1.bf16.msra.mxu1 %v2839_v54 }
 0x26d   :  { %2122 = vmatprep.subr.bf16.mxu0 %v2843_v58  ;;  %2154 = vmatprep.subr.bf16.mxu1 %v2847_v61 }
 0x270   :  { %2124 = vmatpush1.bf16.msra.mxu0 %v2851_v2  ;;  %2156 = vmatpush1.bf16.msra.mxu1 %v2855_v5 }
 0x271   :  { %2126 = vmatprep.subr.bf16.mxu0 %v2859_v8  ;;  %2158 = vmatprep.subr.bf16.mxu1 %v2863_v11 }
 0x274   :  { %2128 = vmatpush1.bf16.msra.mxu0 %v2867_v15  ;;  %2160 = vmatpush1.bf16.msra.mxu1 %v2871_v19 }
 0x275   :  { %2130 = vmatprep.subr.bf16.mxu0 %v2875_v24  ;;  %2162 = vmatprep.subr.bf16.mxu1 %v2879_v28 }
 0x278   :  { %2132 = vmatpush1.bf16.msra.mxu0 %v2883_v33  ;;  %2164 = vmatpush1.bf16.msra.mxu1 %v2887_v39 }
 0x279   :  { %2134 = vmatprep.subr.bf16.mxu0 %v2891_v43  ;;  %2166 = vmatprep.subr.bf16.mxu1 %v2895_v46 }
 0x27c   :  { %2136 = vmatpush1.bf16.msra.mxu0 %v2899_v52  ;;  %2168 = vmatpush1.bf16.msra.mxu1 %v2903_v56 }
 0x27d   :  { %2138 = vmatprep.subr.bf16.mxu0 %v2907_v60  ;;  %2170 = vmatprep.subr.bf16.mxu1 %v2911_v1 }
 0x280   :  { %2140 = vmatpush1.bf16.msra.mxu0 %v2915_v4  ;;  %2172 = vmatpush1.bf16.msra.mxu1 %v2919_v6 }
 0x281   :  { %2174 = vmatprep.subr.bf16.mxu0 %v2802_v17  ;;  %2206 = vmatprep.subr.bf16.mxu1 %v2804_v21 }
 0x336   :  { %v872_v10 = vpop.f32.mrb[4].mxu0  ;;  %v943_v20 = vpop.f32.mrb[4].mxu1 }
 0x337   :  { %v2433_v23 = vadd.f32 %v872_v10, %v2971_v14  ;;  %v874_v26 = vpop.f32.mrb[5].mxu0  ;;  %v945_v27 = vpop.f32.mrb[5].mxu1  ;;  %v2449_v41 = vadd.f32 %v943_v20, %v2980_v44 }
 0x338   :  { %v2434_v30 = vadd.f32 %v874_v26, %v2973_v16  ;;  %v2450_v36 = vadd.f32 %v945_v27, %v2977_v37 }
 0x339   :  { %v1891_v31 = vmul.f32 -1.442695, %v2433_v23 }
 0x33a   :  { %v1892_v32 = vmul.f32 -1.442695, %v2434_v30  ;;  %v1893_v40 = vmul.f32 -1.442695, %v2450_v36 }
 0x33b   :  { %2534 = vpow2.f32 %v1891_v31 }
 0x33c   :  { %2536 = vpow2.f32 %v1892_v32 }
 0x33d   :  { %2538 = vpow2.f32 %v1893_v40 }
 0x33e   :  { %2540 = vtanh.f32 %v2449_v41 }
 0x345   :  { %v2535_v45 = vpop.eup %2534 }
 0x346   :  { %v2537_v48 = vpop.eup %2536  ;;  %v955_v49 = vadd.f32 1.0, %v2535_v45 }
 0x347   :  { %v961_v51 = vadd.f32 1.0, %v2537_v48  ;;  %v2539_v53 = vpop.eup %2538 }
 0x348   :  { %2542 = vrcp.f32 %v955_v49  ;;  %v2541_v55 = vpop.eup %2540  ;;  %v968_v63 = vadd.f32 1.0, %v2539_v53 }
 0x349   :  { %2544 = vrcp.f32 %v961_v51 }
 0x34a   :  { %2546 = vrcp.f32 %v968_v63 }
 0x352   :  { %v2543_v57 = vpop.eup %2542 }
 0x353   :  { %v2545_v59 = vpop.eup %2544  ;;  %v972_v62 = vmul.f32 %v2543_v57, %v2541_v55 }
 0x354   :  { %v971_v3 = vmul.f32 %v2545_v59, %v3025_v9  ;;  %v2547_v12 = vpop.eup %2546 }
 0x356   :  { %v3067_v7 = vadd.f32 %v972_v62, %v971_v3 }
 0x358   :  { %2548 = vtanh.f32 %v3067_v7 }
 0x362   :  { %v2549_v13 = vpop.eup %2548 }
 0x363   :  { %v975_v18 = vmul.f32 %v2549_v13, %v2547_v12 }
 0x365   :  { %1046 = vmatmul.mubr.f32.vlgmr.msra.gmra.mrb[6].mxu0 %v975_v18  ;;  %1117 = vmatmul.mubr.f32.vlgmr.msra.gmra.mrb[6].mxu1 %v975_v18 }
 0x366   :  { %2176 = vmatpush1.bf16.msra.mxu0 %v2806_v22  ;;  %2208 = vmatpush1.bf16.msra.mxu1 %v2809_v25 }
 0x367   :  { %2178 = vmatprep.subr.bf16.mxu0 %v2813_v29  ;;  %2210 = vmatprep.subr.bf16.mxu1 %v2817_v34 }
 0x368   :  { %1220 = vmatprep.mubr.f32.mxu0 %v2731_v0  ;;  %1291 = vmatprep.mubr.f32.mxu1 %v2731_v0 }
 0x36a   :  { %2180 = vmatpush1.bf16.msra.mxu0 %v2819_v35  ;;  %2212 = vmatpush1.bf16.msra.mxu1 %v2823_v38 }
 0x36b   :  { %2182 = vmatprep.subr.bf16.mxu0 %v2827_v42  ;;  %2214 = vmatprep.subr.bf16.mxu1 %v2831_v47 }
 0x36e   :  { %2184 = vmatpush1.bf16.msra.mxu0 %v2835_v50  ;;  %2216 = vmatpush1.bf16.msra.mxu1 %v2839_v54 }
 0x36f   :  { %2186 = vmatprep.subr.bf16.mxu0 %v2843_v58  ;;  %2218 = vmatprep.subr.bf16.mxu1 %v2847_v61 }
 0x372   :  { %2188 = vmatpush1.bf16.msra.mxu0 %v2851_v2  ;;  %2220 = vmatpush1.bf16.msra.mxu1 %v2855_v5 }
 0x373   :  { %2190 = vmatprep.subr.bf16.mxu0 %v2859_v8  ;;  %2222 = vmatprep.subr.bf16.mxu1 %v2863_v11 }
 0x376   :  { %2192 = vmatpush1.bf16.msra.mxu0 %v2867_v15  ;;  %2224 = vmatpush1.bf16.msra.mxu1 %v2871_v19 }
 0x377   :  { %2194 = vmatprep.subr.bf16.mxu0 %v2875_v24  ;;  %2226 = vmatprep.subr.bf16.mxu1 %v2879_v28 }
 0x37a   :  { %2196 = vmatpush1.bf16.msra.mxu0 %v2883_v33  ;;  %2228 = vmatpush1.bf16.msra.mxu1 %v2887_v39 }
 0x37b   :  { %2198 = vmatprep.subr.bf16.mxu0 %v2891_v43  ;;  %2230 = vmatprep.subr.bf16.mxu1 %v2895_v46 }
 0x37e   :  { %2200 = vmatpush1.bf16.msra.mxu0 %v2899_v52  ;;  %2232 = vmatpush1.bf16.msra.mxu1 %v2903_v56 }
 0x37f   :  { %2202 = vmatprep.subr.bf16.mxu0 %v2907_v60  ;;  %2234 = vmatprep.subr.bf16.mxu1 %v2911_v1 }
 0x382   :  { %2204 = vmatpush1.bf16.msra.mxu0 %v2915_v4  ;;  %2236 = vmatpush1.bf16.msra.mxu1 %v2919_v6 }
 0x383   :  { %2238 = vmatprep.subr.bf16.mxu0 %v2802_v17  ;;  %2270 = vmatprep.subr.bf16.mxu1 %v2804_v21 }
 0x438   :  { %v1047_v9 = vpop.f32.mrb[6].mxu0  ;;  %v1118_v10 = vpop.f32.mrb[6].mxu1 }
 0x439   :  { %v2435_v20 = vadd.f32 %v1047_v9, %v2971_v14  ;;  %v1049_v23 = vpop.f32.mrb[7].mxu0  ;;  %v1120_v26 = vpop.f32.mrb[7].mxu1  ;;  %v2451_v40 = vadd.f32 %v1118_v10, %v2980_v44 }
 0x43a   :  { %v2436_v27 = vadd.f32 %v1049_v23, %v2973_v16  ;;  %v2452_v32 = vadd.f32 %v1120_v26, %v2977_v37 }
 0x43b   :  { %v1894_v30 = vmul.f32 -1.442695, %v2435_v20 }
 0x43c   :  { %v1895_v31 = vmul.f32 -1.442695, %v2436_v27  ;;  %v1896_v36 = vmul.f32 -1.442695, %v2452_v32 }
 0x43d   :  { %2550 = vpow2.f32 %v1894_v30 }
 0x43e   :  { %2552 = vpow2.f32 %v1895_v31 }
 0x43f   :  { %2554 = vpow2.f32 %v1896_v36 }
 0x440   :  { %2556 = vtanh.f32 %v2451_v40 }
 0x447   :  { %v2551_v41 = vpop.eup %2550 }
 0x448   :  { %v2553_v45 = vpop.eup %2552  ;;  %v1130_v48 = vadd.f32 1.0, %v2551_v41 }
 0x449   :  { %v1136_v49 = vadd.f32 1.0, %v2553_v45  ;;  %v2555_v51 = vpop.eup %2554 }
 0x44a   :  { %2558 = vrcp.f32 %v1130_v48  ;;  %v2557_v53 = vpop.eup %2556  ;;  %v1143_v62 = vadd.f32 1.0, %v2555_v51 }
 0x44b   :  { %2560 = vrcp.f32 %v1136_v49 }
 0x44c   :  { %2562 = vrcp.f32 %v1143_v62 }
 0x454   :  { %v2559_v55 = vpop.eup %2558 }
 0x455   :  { %v2561_v57 = vpop.eup %2560  ;;  %v1147_v59 = vmul.f32 %v2559_v55, %v2557_v53 }
 0x456   :  { %v1146_v63 = vmul.f32 %v2561_v57, %v3067_v7  ;;  %v2563_v12 = vpop.eup %2562 }
 0x458   :  { %v3109_v3 = vadd.f32 %v1147_v59, %v1146_v63 }
 0x45a   :  { %2564 = vtanh.f32 %v3109_v3 }
 0x464   :  { %v2565_v13 = vpop.eup %2564 }
 0x465   :  { %v1150_v18 = vmul.f32 %v2565_v13, %v2563_v12 }
 0x467   :  { %1221 = vmatmul.mubr.f32.vlgmr.msra.gmra.mrb[8].mxu0 %v1150_v18  ;;  %1292 = vmatmul.mubr.f32.vlgmr.msra.gmra.mrb[8].mxu1 %v1150_v18 }
 0x468   :  { %2240 = vmatpush1.bf16.msra.mxu0 %v2806_v22  ;;  %2272 = vmatpush1.bf16.msra.mxu1 %v2809_v25 }
 0x469   :  { %2242 = vmatprep.subr.bf16.mxu0 %v2813_v29  ;;  %2274 = vmatprep.subr.bf16.mxu1 %v2817_v34 }
 0x46a   :  { %1395 = vmatprep.mubr.f32.mxu0 %v2731_v0  ;;  %1466 = vmatprep.mubr.f32.mxu1 %v2731_v0 }
 0x46c   :  { %2244 = vmatpush1.bf16.msra.mxu0 %v2819_v35  ;;  %2276 = vmatpush1.bf16.msra.mxu1 %v2823_v38 }
 0x46d   :  { %2246 = vmatprep.subr.bf16.mxu0 %v2827_v42  ;;  %2278 = vmatprep.subr.bf16.mxu1 %v2831_v47 }
 0x470   :  { %2248 = vmatpush1.bf16.msra.mxu0 %v2835_v50  ;;  %2280 = vmatpush1.bf16.msra.mxu1 %v2839_v54 }
 0x471   :  { %2250 = vmatprep.subr.bf16.mxu0 %v2843_v58  ;;  %2282 = vmatprep.subr.bf16.mxu1 %v2847_v61 }
 0x474   :  { %2252 = vmatpush1.bf16.msra.mxu0 %v2851_v2  ;;  %2284 = vmatpush1.bf16.msra.mxu1 %v2855_v5 }
 0x475   :  { %2254 = vmatprep.subr.bf16.mxu0 %v2859_v8  ;;  %2286 = vmatprep.subr.bf16.mxu1 %v2863_v11 }
 0x478   :  { %2256 = vmatpush1.bf16.msra.mxu0 %v2867_v15  ;;  %2288 = vmatpush1.bf16.msra.mxu1 %v2871_v19 }
 0x479   :  { %2258 = vmatprep.subr.bf16.mxu0 %v2875_v24  ;;  %2290 = vmatprep.subr.bf16.mxu1 %v2879_v28 }
 0x47c   :  { %2260 = vmatpush1.bf16.msra.mxu0 %v2883_v33  ;;  %2292 = vmatpush1.bf16.msra.mxu1 %v2887_v39 }
 0x47d   :  { %2262 = vmatprep.subr.bf16.mxu0 %v2891_v43  ;;  %2294 = vmatprep.subr.bf16.mxu1 %v2895_v46 }
 0x480   :  { %2264 = vmatpush1.bf16.msra.mxu0 %v2899_v52  ;;  %2296 = vmatpush1.bf16.msra.mxu1 %v2903_v56 }
 0x481   :  { %2266 = vmatprep.subr.bf16.mxu0 %v2907_v60  ;;  %2298 = vmatprep.subr.bf16.mxu1 %v2911_v1 }
 0x484   :  { %2268 = vmatpush1.bf16.msra.mxu0 %v2915_v4  ;;  %2300 = vmatpush1.bf16.msra.mxu1 %v2919_v6 }
 0x485   :  { %2302 = vmatprep.subr.bf16.mxu0 %v2802_v17  ;;  %2334 = vmatprep.subr.bf16.mxu1 %v2804_v21 }
 0x53a   :  { %v1222_v7 = vpop.f32.mrb[8].mxu0  ;;  %v1293_v9 = vpop.f32.mrb[8].mxu1 }
 0x53b   :  { %v2437_v10 = vadd.f32 %v1222_v7, %v2971_v14  ;;  %v1224_v20 = vpop.f32.mrb[9].mxu0  ;;  %v1295_v23 = vpop.f32.mrb[9].mxu1  ;;  %v2453_v36 = vadd.f32 %v1293_v9, %v2980_v44 }
 0x53c   :  { %v2438_v26 = vadd.f32 %v1224_v20, %v2973_v16  ;;  %v2454_v31 = vadd.f32 %v1295_v23, %v2977_v37 }
 0x53d   :  { %v1897_v27 = vmul.f32 -1.442695, %v2437_v10 }
 0x53e   :  { %v1898_v30 = vmul.f32 -1.442695, %v2438_v26  ;;  %v1899_v32 = vmul.f32 -1.442695, %v2454_v31 }
 0x53f   :  { %2566 = vpow2.f32 %v1897_v27 }
 0x540   :  { %2568 = vpow2.f32 %v1898_v30 }
 0x541   :  { %2570 = vpow2.f32 %v1899_v32 }
 0x542   :  { %2572 = vtanh.f32 %v2453_v36 }
 0x549   :  { %v2567_v40 = vpop.eup %2566 }
 0x54a   :  { %v2569_v41 = vpop.eup %2568  ;;  %v1305_v45 = vadd.f32 1.0, %v2567_v40 }
 0x54b   :  { %v1311_v48 = vadd.f32 1.0, %v2569_v41  ;;  %v2571_v49 = vpop.eup %2570 }
 0x54c   :  { %2574 = vrcp.f32 %v1305_v45  ;;  %v2573_v51 = vpop.eup %2572  ;;  %v1318_v59 = vadd.f32 1.0, %v2571_v49 }
 0x54d   :  { %2576 = vrcp.f32 %v1311_v48 }
 0x54e   :  { %2578 = vrcp.f32 %v1318_v59 }
 0x556   :  { %v2575_v53 = vpop.eup %2574 }
 0x557   :  { %v2577_v55 = vpop.eup %2576  ;;  %v1322_v57 = vmul.f32 %v2575_v53, %v2573_v51 }
 0x558   :  { %v1321_v62 = vmul.f32 %v2577_v55, %v3109_v3  ;;  %v2579_v12 = vpop.eup %2578 }
 0x55a   :  { %v3151_v63 = vadd.f32 %v1322_v57, %v1321_v62 }
 0x55c   :  { %2580 = vtanh.f32 %v3151_v63 }
 0x566   :  { %v2581_v13 = vpop.eup %2580 }
 0x567   :  { %v1325_v18 = vmul.f32 %v2581_v13, %v2579_v12 }
 0x569   :  { %1396 = vmatmul.mubr.f32.vlgmr.msra.gmra.mrb[10].mxu0 %v1325_v18  ;;  %1467 = vmatmul.mubr.f32.vlgmr.msra.gmra.mrb[10].mxu1 %v1325_v18 }
 0x56a   :  { %2304 = vmatpush1.bf16.msra.mxu0 %v2806_v22  ;;  %2336 = vmatpush1.bf16.msra.mxu1 %v2809_v25 }
 0x56b   :  { %2306 = vmatprep.subr.bf16.mxu0 %v2813_v29  ;;  %2338 = vmatprep.subr.bf16.mxu1 %v2817_v34 }
 0x56c   :  { %1570 = vmatprep.mubr.f32.mxu0 %v2731_v0  ;;  %1641 = vmatprep.mubr.f32.mxu1 %v2731_v0 }
 0x56e   :  { %2308 = vmatpush1.bf16.msra.mxu0 %v2819_v35  ;;  %2340 = vmatpush1.bf16.msra.mxu1 %v2823_v38 }
 0x56f   :  { %2310 = vmatprep.subr.bf16.mxu0 %v2827_v42  ;;  %2342 = vmatprep.subr.bf16.mxu1 %v2831_v47 }
 0x572   :  { %2312 = vmatpush1.bf16.msra.mxu0 %v2835_v50  ;;  %2344 = vmatpush1.bf16.msra.mxu1 %v2839_v54 }
 0x573   :  { %2314 = vmatprep.subr.bf16.mxu0 %v2843_v58  ;;  %2346 = vmatprep.subr.bf16.mxu1 %v2847_v61 }
 0x576   :  { %2316 = vmatpush1.bf16.msra.mxu0 %v2851_v2  ;;  %2348 = vmatpush1.bf16.msra.mxu1 %v2855_v5 }
 0x577   :  { %2318 = vmatprep.subr.bf16.mxu0 %v2859_v8  ;;  %2350 = vmatprep.subr.bf16.mxu1 %v2863_v11 }
 0x57a   :  { %2320 = vmatpush1.bf16.msra.mxu0 %v2867_v15  ;;  %2352 = vmatpush1.bf16.msra.mxu1 %v2871_v19 }
 0x57b   :  { %2322 = vmatprep.subr.bf16.mxu0 %v2875_v24  ;;  %2354 = vmatprep.subr.bf16.mxu1 %v2879_v28 }
 0x57e   :  { %2324 = vmatpush1.bf16.msra.mxu0 %v2883_v33  ;;  %2356 = vmatpush1.bf16.msra.mxu1 %v2887_v39 }
 0x57f   :  { %2326 = vmatprep.subr.bf16.mxu0 %v2891_v43  ;;  %2358 = vmatprep.subr.bf16.mxu1 %v2895_v46 }
 0x582   :  { %2328 = vmatpush1.bf16.msra.mxu0 %v2899_v52  ;;  %2360 = vmatpush1.bf16.msra.mxu1 %v2903_v56 }
 0x583   :  { %2330 = vmatprep.subr.bf16.mxu0 %v2907_v60  ;;  %2362 = vmatprep.subr.bf16.mxu1 %v2911_v1 }
 0x586   :  { %2332 = vmatpush1.bf16.msra.mxu0 %v2915_v4  ;;  %2364 = vmatpush1.bf16.msra.mxu1 %v2919_v6 }
 0x587   :  { %2366 = vmatprep.subr.bf16.mxu0 %v2802_v17  ;;  %2398 = vmatprep.subr.bf16.mxu1 %v2804_v21 }
 0x63c   :  { %v1397_v3 = vpop.f32.mrb[10].mxu0  ;;  %v1468_v7 = vpop.f32.mrb[10].mxu1 }
 0x63d   :  { %v2439_v9 = vadd.f32 %v1397_v3, %v2971_v14  ;;  %v1399_v10 = vpop.f32.mrb[11].mxu0  ;;  %v1470_v20 = vpop.f32.mrb[11].mxu1  ;;  %v2455_v32 = vadd.f32 %v1468_v7, %v2980_v44 }
 0x63e   :  { %v2440_v23 = vadd.f32 %v1399_v10, %v2973_v16  ;;  %v2456_v30 = vadd.f32 %v1470_v20, %v2977_v37 }
 0x63f   :  { %v1900_v26 = vmul.f32 -1.442695, %v2439_v9 }
 0x640   :  { %v1901_v27 = vmul.f32 -1.442695, %v2440_v23  ;;  %v1902_v31 = vmul.f32 -1.442695, %v2456_v30 }
 0x641   :  { %2582 = vpow2.f32 %v1900_v26 }
 0x642   :  { %2584 = vpow2.f32 %v1901_v27 }
 0x643   :  { %2586 = vpow2.f32 %v1902_v31 }
 0x644   :  { %2588 = vtanh.f32 %v2455_v32 }
 0x64b   :  { %v2583_v17 = vpop.eup %2582 }
 0x64c   :  { %v2585_v36 = vpop.eup %2584  ;;  %v1480_v21 = vadd.f32 1.0, %v2583_v17 }
 0x64d   :  { %v1486_v40 = vadd.f32 1.0, %v2585_v36  ;;  %v2587_v41 = vpop.eup %2586 }
 0x64e   :  { %2590 = vrcp.f32 %v1480_v21  ;;  %v2589_v45 = vpop.eup %2588  ;;  %v1493_v53 = vadd.f32 1.0, %v2587_v41 }
 0x64f   :  { %2592 = vrcp.f32 %v1486_v40 }
 0x650   :  { %2594 = vrcp.f32 %v1493_v53 }
 0x658   :  { %v2591_v48 = vpop.eup %2590 }
 0x659   :  { %v2593_v49 = vpop.eup %2592  ;;  %v1497_v51 = vmul.f32 %v2591_v48, %v2589_v45 }
 0x65a   :  { %v1496_v55 = vmul.f32 %v2593_v49, %v3151_v63  ;;  %v2595_v59 = vpop.eup %2594 }
 0x65c   :  { %v3193_v57 = vadd.f32 %v1497_v51, %v1496_v55 }
 0x65e   :  { %2596 = vtanh.f32 %v3193_v57 }
 0x668   :  { %v2597_v62 = vpop.eup %2596 }
 0x669   :  { %v1500_v12 = vmul.f32 %v2597_v62, %v2595_v59 }
 0x66b   :  { %1571 = vmatmul.mubr.f32.vlgmr.msra.gmra.mrb[12].mxu0 %v1500_v12  ;;  %1642 = vmatmul.mubr.f32.vlgmr.msra.gmra.mrb[12].mxu1 %v1500_v12 }
 0x66c   :  { %2368 = vmatpush1.bf16.msra.mxu0 %v2806_v22  ;;  %2400 = vmatpush1.bf16.msra.mxu1 %v2809_v25 }
 0x66d   :  { %2370 = vmatprep.subr.bf16.mxu0 %v2813_v29  ;;  %2402 = vmatprep.subr.bf16.mxu1 %v2817_v34 }
 0x66e   :  { %1745 = vmatprep.mubr.f32.mxu0 %v2731_v0  ;;  %1816 = vmatprep.mubr.f32.mxu1 %v2731_v0 }
 0x670   :  { %2372 = vmatpush1.bf16.msra.mxu0 %v2819_v35  ;;  %2404 = vmatpush1.bf16.msra.mxu1 %v2823_v38 }
 0x671   :  { %2374 = vmatprep.subr.bf16.mxu0 %v2827_v42  ;;  %2406 = vmatprep.subr.bf16.mxu1 %v2831_v47 }
 0x674   :  { %2376 = vmatpush1.bf16.msra.mxu0 %v2835_v50  ;;  %2408 = vmatpush1.bf16.msra.mxu1 %v2839_v54 }
 0x675   :  { %2378 = vmatprep.subr.bf16.mxu0 %v2843_v58  ;;  %2410 = vmatprep.subr.bf16.mxu1 %v2847_v61 }
 0x678   :  { %2380 = vmatpush1.bf16.msra.mxu0 %v2851_v2  ;;  %2412 = vmatpush1.bf16.msra.mxu1 %v2855_v5 }
 0x679   :  { %2382 = vmatprep.subr.bf16.mxu0 %v2859_v8  ;;  %2414 = vmatprep.subr.bf16.mxu1 %v2863_v11 }
 0x67c   :  { %2384 = vmatpush1.bf16.msra.mxu0 %v2867_v15  ;;  %2416 = vmatpush1.bf16.msra.mxu1 %v2871_v19 }
 0x67d   :  { %2386 = vmatprep.subr.bf16.mxu0 %v2875_v24  ;;  %2418 = vmatprep.subr.bf16.mxu1 %v2879_v28 }
 0x680   :  { %2388 = vmatpush1.bf16.msra.mxu0 %v2883_v33  ;;  %2420 = vmatpush1.bf16.msra.mxu1 %v2887_v39 }
 0x681   :  { %2390 = vmatprep.subr.bf16.mxu0 %v2891_v43  ;;  %2422 = vmatprep.subr.bf16.mxu1 %v2895_v46 }
 0x684   :  { %2392 = vmatpush1.bf16.msra.mxu0 %v2899_v52  ;;  %2424 = vmatpush1.bf16.msra.mxu1 %v2903_v56 }
 0x685   :  { %2394 = vmatprep.subr.bf16.mxu0 %v2907_v60  ;;  %2426 = vmatprep.subr.bf16.mxu1 %v2911_v1 }
 0x688   :  { %2396 = vmatpush1.bf16.msra.mxu0 %v2915_v4  ;;  %2428 = vmatpush1.bf16.msra.mxu1 %v2919_v6 }
 0x73e   :  { %v1572_v0 = vpop.f32.mrb[12].mxu0  ;;  %v1643_v22 = vpop.f32.mrb[12].mxu1 }
 0x73f   :  { %v2441_v25 = vadd.f32 %v1572_v0, %v2971_v14  ;;  %v1574_v29 = vpop.f32.mrb[13].mxu0  ;;  %v1645_v34 = vpop.f32.mrb[13].mxu1  ;;  %v2457_v54 = vadd.f32 %v1643_v22, %v2980_v44 }
 0x740   :  { %v2442_v35 = vadd.f32 %v1574_v29, %v2973_v16  ;;  %v2458_v47 = vadd.f32 %v1645_v34, %v2977_v37 }
 0x741   :  { %v1903_v38 = vmul.f32 -1.442695, %v2441_v25 }
 0x742   :  { %v1904_v42 = vmul.f32 -1.442695, %v2442_v35  ;;  %v1905_v50 = vmul.f32 -1.442695, %v2458_v47 }
 0x743   :  { %2598 = vpow2.f32 %v1903_v38 }
 0x744   :  { %2600 = vpow2.f32 %v1904_v42 }
 0x745   :  { %2602 = vpow2.f32 %v1905_v50 }
 0x746   :  { %2604 = vtanh.f32 %v2457_v54 }
 0x74d   :  { %v2599_v58 = vpop.eup %2598 }
 0x74e   :  { %v2601_v61 = vpop.eup %2600  ;;  %v1655_v2 = vadd.f32 1.0, %v2599_v58 }
 0x74f   :  { %v1661_v5 = vadd.f32 1.0, %v2601_v61  ;;  %v2603_v8 = vpop.eup %2602 }
 0x750   :  { %2606 = vrcp.f32 %v1655_v2  ;;  %v2605_v11 = vpop.eup %2604  ;;  %v1668_v28 = vadd.f32 1.0, %v2603_v8 }
 0x751   :  { %2608 = vrcp.f32 %v1661_v5 }
 0x752   :  { %2610 = vrcp.f32 %v1668_v28 }
 0x75a   :  { %v2607_v15 = vpop.eup %2606 }
 0x75b   :  { %v2609_v19 = vpop.eup %2608  ;;  %v1672_v24 = vmul.f32 %v2607_v15, %v2605_v11 }
 0x75c   :  { %v1671_v33 = vmul.f32 %v2609_v19, %v3193_v57  ;;  %v2611_v43 = vpop.eup %2610 }
 0x75e   :  { %v1673_v39 = vadd.f32 %v1672_v24, %v1671_v33 }
 0x760   :  { %2612 = vtanh.f32 %v1673_v39 }
 0x76a   :  { %v2613_v46 = vpop.eup %2612 }
 0x76b   :  { %v1675_v52 = vmul.f32 %v2613_v46, %v2611_v43 }
 0x76d   :  { %1746 = vmatmul.mubr.f32.vlgmr.msra.gmra.mrb[14].mxu0 %v1675_v52  ;;  %1817 = vmatmul.mubr.f32.vlgmr.msra.gmra.mrb[14].mxu1 %v1675_v52 }
 0x840   :  { %v1747_v56 = vpop.f32.mrb[14].mxu0  ;;  %v1818_v60 = vpop.f32.mrb[14].mxu1 }
 0x841   :  { %v2443_v1 = vadd.f32 %v1747_v56, %v2971_v14  ;;  %v1749_v4 = vpop.f32.mrb[15].mxu0  ;;  %v1820_v6 = vpop.f32.mrb[15].mxu1  ;;  %v2459_v9 = vadd.f32 %v1818_v60, %v2980_v44 }
 0x842   :  { %v2444_v63 = vadd.f32 %v1749_v4, %v2973_v16  ;;  %v2460_v3 = vadd.f32 %v1820_v6, %v2977_v37 }
 0x843   :  { %v1906_v13 = vmul.f32 -1.442695, %v2443_v1 }
 0x844   :  { %v1907_v18 = vmul.f32 -1.442695, %v2444_v63  ;;  %v1908_v7 = vmul.f32 -1.442695, %v2460_v3 }
 0x845   :  { %2614 = vpow2.f32 %v1906_v13 }
 0x846   :  { %2616 = vpow2.f32 %v1907_v18 }
 0x847   :  { %2618 = vpow2.f32 %v1908_v7 }
 0x848   :  { %2620 = vtanh.f32 %v2459_v9 }
 0x84f   :  { %v2615_v10 = vpop.eup %2614 }
 0x850   :  { %v2617_v20 = vpop.eup %2616  ;;  %v1830_v23 = vadd.f32 1.0, %v2615_v10 }
 0x851   :  { %v1836_v26 = vadd.f32 1.0, %v2617_v20  ;;  %v2619_v14 = vpop.eup %2618 }
 0x852   :  { %2622 = vrcp.f32 %v1830_v23  ;;  %v2621_v27 = vpop.eup %2620  ;;  %v1843_v32 = vadd.f32 1.0, %v2619_v14 }
 0x853   :  { %2624 = vrcp.f32 %v1836_v26 }
 0x854   :  { %2626 = vrcp.f32 %v1843_v32 }
 0x85c   :  { %v2623_v16 = vpop.eup %2622 }
 0x85d   :  { %v2625_v30 = vpop.eup %2624  ;;  %v1847_v31 = vmul.f32 %v2623_v16, %v2621_v27 }
 0x85e   :  { %v1846_v17 = vmul.f32 %v2625_v30, %v1673_v39  ;;  %v2627_v37 = vpop.eup %2626 }
 0x860   :  { %v1848_v36 = vadd.f32 %v1847_v31, %v1846_v17 }
 0x862   :  { %2628 = vtanh.f32 %v1848_v36 }
 0x86c   :  { %v2629_v44 = vpop.eup %2628 }
 0x86d   :  { %v1850_v21 = vmul.f32 %v2629_v44, %v2627_v37 }
 0x86f   :  { %1851 = vst [vmem:[#allocation10] sm:$0xff] %v1850_v21 }
 0x870   :  { %2707 = shalt.err (!%p2704_p0)
}
 0x871   :  { %s2708_s6 = scalar_lea.hbm %s3253_s4, 128 }
 0x872   :  { %p2709_p1 = scmp.ne.s32.totalorder %s3253_s4, %s2708_s6  ;;  %p2712_p2 = scmp.lt.u32.totalorder %s2708_s6, %s3253_s4 }
 0x874   :  { %p2714_p3 = pnand %p2712_p2, %p2709_p1 }
 0x876   :  { %2717 = shalt.err (!%p2714_p3)
}
 0x877   :  { %1862 = dma.vmem_to_hbm [thread:$0]  %s1860_s26, 128, %s3253_s4, [#allocation6]  }
 0x878   :  { %2722 = dma.done.wait [#allocation6], 128  }
 0x879   :  { %2723 = vsyncadd [#allocation6], 4294967168 }
 0x87a   :  { %1866 = vsyncpa [#allocation5], 1 }
 0x87b   :  { %1867 = vsyncpa [#allocation8], 1 }
 0x87c   :  { %1868 = vsyncpa [#allocation6], 1 }

// kernel: tpu_custom_call.1
= control target key start
LH: loop header
LB: loop body
LE: loop exit
PB: predicated region body
PF: predicated region fallthrough
CT: control target
= control target key end

     0   :  { %9 = vsyncpa [#allocation5], 0  ;;  %s3249_s0 = inlined_call_operand.hbm [shape: f32[8,8,16], index: 0, kind: input, shape index: {}]   ;;  %s3250_s1 = inlined_call_operand.hbm [shape: f32[16,512], index: 1, kind: input, shape index: {}]   ;;  %s3251_s2 = inlined_call_operand.hbm [shape: f32[128,512], index: 2, kind: input, shape index: {}]   ;;  %s3252_s3 = inlined_call_operand.vmem [shape: f32[1,512], index: 3, kind: input, shape index: {}]   ;;  %s3253_s4 = inlined_call_operand.hbm [shape: f32[8,128], index: 4, kind: output, shape index: {}]  }
   0x1   :  { %10 = vsyncpa [#allocation8], 0 }
   0x2   :  { %11 = vsyncpa [#allocation6], 0  ;;  %s2724_s15 = smov [#allocation7]   ;;  %s2630_s19 = scalar_lea.hbm %s3250_s1, 1024 }
   0x3   :  { %s29_s16 = sshll.u32 %s2724_s15, 4  ;;  %p2631_p0 = scmp.ne.s32.totalorder %s3250_s1, %s2630_s19  ;;  %s30_s16 = int_to_ptr.vmem [resolvable:$true] %s29_s16 }
   0x4   :  { %p2634_p1 = scmp.lt.u32.totalorder %s2630_s19, %s3250_s1 }
   0x6   :  { %p2636_p2 = pnand %p2634_p1, %p2631_p0 }
   0x8   :  { %2639 = shalt.err (!%p2636_p2)
}
   0x9   :  { %s2640_s24 = scalar_lea.vmem %s30_s16, 1024  ;;  %p2645_p4 = scmp.lt.s32.totalorder %s30_s16, %s30_s16 }
   0xa   :  { %p2641_p3 = scmp.ne.s32.totalorder %s30_s16, %s2640_s24  ;;  %p2646_p5 = scmp.lt.s32.totalorder %s2640_s24, %s2640_s24 }
   0xc   :  { %p2647_p6 = por %p2646_p5, %p2645_p4 }
   0xe   :  { %p2648_p7 = pnand %p2647_p6, %p2641_p3 }
  0x10   :  { %2651 = shalt.err (!%p2648_p7)
}
  0x11   :  { %s2725_s25 = smov 512   ;;  %s2726_s26 = smov 32  }
  0x12   :  { %35 = dma.hbm_to_vmem [thread:$0]  %s3250_s1, 1024, %s30_s16, [#allocation8], %s2725_s25, %s2725_s25, %s2726_s26  }
  0x13   :  { %s2727_s29 = smov [#allocation4]   ;;  %s2652_s7 = scalar_lea.hbm %s3249_s0, 1024 }
  0x14   :  { %s17_s30 = sshll.u32 %s2727_s29, 4  ;;  %p2653_p8 = scmp.ne.s32.totalorder %s3249_s0, %s2652_s7  ;;  %s18_s30 = int_to_ptr.vmem [resolvable:$true] %s17_s30 }
  0x15   :  { %p2656_p9 = scmp.lt.u32.totalorder %s2652_s7, %s3249_s0 }
  0x17   :  { %p2658_p10 = pnand %p2656_p9, %p2653_p8 }
  0x19   :  { %2661 = shalt.err (!%p2658_p10)
}
  0x1a   :  { %s2662_s12 = scalar_lea.vmem %s18_s30, 1024  ;;  %p2667_p12 = scmp.lt.s32.totalorder %s18_s30, %s18_s30 }
  0x1b   :  { %p2663_p11 = scmp.ne.s32.totalorder %s18_s30, %s2662_s12  ;;  %p2668_p13 = scmp.lt.s32.totalorder %s2662_s12, %s2662_s12 }
  0x1d   :  { %p2669_p0 = por %p2668_p13, %p2667_p12 }
  0x1f   :  { %p2670_p1 = pnand %p2669_p0, %p2663_p11 }
  0x21   :  { %2673 = shalt.err (!%p2670_p1)
}
  0x22   :  { %s2728_s1 = smov 128   ;;  %s2729_s13 = smov 8  }
  0x23   :  { %23 = dma.hbm_to_vmem [thread:$0]  %s3249_s0, 1024, %s18_s30, [#allocation5], %s2728_s1, %s2728_s1, %s2729_s13  }
  0x24   :  { %s2730_s16 = smov [#allocation9]   ;;  %s2674_s20 = scalar_lea.hbm %s3251_s2, 8192 }
  0x25   :  { %s41_s17 = sshll.u32 %s2730_s16, 4  ;;  %p2675_p2 = scmp.ne.s32.totalorder %s3251_s2, %s2674_s20  ;;  %s42_s17 = int_to_ptr.vmem [resolvable:$true] %s41_s17 }
  0x26   :  { %p2678_p3 = scmp.lt.u32.totalorder %s2674_s20, %s3251_s2 }
  0x28   :  { %p2680_p4 = pnand %p2678_p3, %p2675_p2 }
  0x2a   :  { %2683 = shalt.err (!%p2680_p4)
}
  0x2b   :  { %s2684_s27 = scalar_lea.vmem %s42_s17, 8192  ;;  %p2689_p6 = scmp.lt.s32.totalorder %s42_s17, %s42_s17 }
  0x2c   :  { %p2685_p5 = scmp.ne.s32.totalorder %s42_s17, %s2684_s27  ;;  %p2690_p7 = scmp.lt.s32.totalorder %s2684_s27, %s2684_s27 }
  0x2e   :  { %p2691_p8 = por %p2690_p7, %p2689_p6 }
  0x30   :  { %p2692_p9 = pnand %p2691_p8, %p2685_p5 }
  0x32   :  { %2695 = shalt.err (!%p2692_p9)
}
  0x33   :  { %47 = dma.hbm_to_vmem [thread:$0]  %s3251_s2, 8192, %s42_s17, [#allocation8], %s2725_s25, %s2725_s25, %s2726_s26  }
  0x34   :  { %2718 = dma.done.wait [#allocation5], 1024  }
  0x35   :  { %2719 = vsyncadd [#allocation5], 4294966272 }
  0x36   :  { %2720 = dma.done.wait [#allocation8], 9216  }
  0x37   :  { %2721 = vsyncadd [#allocation8], 4294958080  ;;  %v2731_v0 = vmov 0.0   ;;  %v138_v1 = vld [vmem:[#allocation7 + $0x8] sm:$0xff]  ;;  %v140_v3 = vld [vmem:[#allocation7 + $0x18] sm:$0xff]  ;;  %vm167_vm0 = vcmask 130048  }
  0x38   :  { %256 = vmatprep.mubr.f32.mxu0 %v2731_v0  ;;  %369 = vmatprep.mubr.f32.mxu1 %v2731_v0  ;;  %v142_v2 = vld [vmem:[#allocation7 + $0x28] sm:$0xff]  ;;  %v144_v5 = vld [vmem:[#allocation7 + $0x38] sm:$0xff]  ;;  %v137_v6 = vld [vmem:[#allocation7] sm:$0xff] }
  0x39   :  { %v1909_v4 = vpack.c.bf16 %v142_v2, %v138_v1  ;;  %v141_v7 = vld [vmem:[#allocation7 + $0x20] sm:$0xff]  ;;  %v1913_v8 = vpack.c.bf16 %v144_v5, %v140_v3  ;;  %v139_v10 = vld [vmem:[#allocation7 + $0x10] sm:$0xff]  ;;  %v66_v14 = vld [vmem:[#allocation9 + $0x8] sm:$0xff] }
  0x3a   :  { %v1911_v9 = vpack.c.bf16 %v141_v7, %v137_v6  ;;  %v143_v11 = vld [vmem:[#allocation7 + $0x30] sm:$0xff]  ;;  %v129_v12 = vld [vmem:[#allocation4] sm:$0xff]  ;;  %v70_v15 = vld [vmem:[#allocation9 + $0x28] sm:$0xff] }
  0x3b   :  { %1910 = vmatprep.subr.bf16.mxu0 %v1909_v4  ;;  %v1915_v13 = vpack.c.bf16 %v143_v11, %v139_v10  ;;  %v68_v16 = vld [vmem:[#allocation9 + $0x18] sm:$0xff]  ;;  %1914 = vmatprep.subr.bf16.mxu1 %v1913_v8  ;;  %v2802_v17 = vpack.c.bf16 %v70_v15, %v66_v14  ;;  %v65_v19 = vld [vmem:[#allocation9] sm:$0xff]  ;;  %v67_v23 = vld [vmem:[#allocation9 + $0x10] sm:$0xff] }
  0x3c   :  { %1912 = vmatpush1.bf16.msra.mxu0 %v1911_v9  ;;  %v72_v18 = vld [vmem:[#allocation9 + $0x38] sm:$0xff]  ;;  %v69_v20 = vld [vmem:[#allocation9 + $0x20] sm:$0xff]  ;;  %v71_v24 = vld [vmem:[#allocation9 + $0x30] sm:$0xff] }
  0x3d   :  { %1916 = vmatpush1.bf16.msra.mxu1 %v1915_v13  ;;  %v2804_v21 = vpack.c.bf16 %v72_v18, %v68_v16  ;;  %v2806_v22 = vpack.c.bf16 %v69_v20, %v65_v19  ;;  %1918 = vmatprep.subr.bf16.mxu0 %v2802_v17  ;;  %v2809_v25 = vpack.c.bf16 %v71_v24, %v67_v23  ;;  %v74_v26 = vld [vmem:[#allocation9 + $0x48] sm:$0xff]  ;;  %v76_v28 = vld [vmem:[#allocation9 + $0x58] sm:$0xff]  ;;  %v73_v31 = vld [vmem:[#allocation9 + $0x40] sm:$0xff] }
  0x3e   :  { %v78_v27 = vld [vmem:[#allocation9 + $0x68] sm:$0xff]  ;;  %v80_v30 = vld [vmem:[#allocation9 + $0x78] sm:$0xff]  ;;  %v77_v32 = vld [vmem:[#allocation9 + $0x60] sm:$0xff] }
  0x3f   :  { %1869 = vmatmul.mubr.msk.f32.vlgmr.msra.gmra.mrb[0].mxu0 %vm167_vm0, %v129_v12  ;;  %1950 = vmatprep.subr.bf16.mxu1 %v2804_v21  ;;  %v2813_v29 = vpack.c.bf16 %v78_v27, %v74_v26  ;;  %v130_v33 = vld [vmem:[#allocation4 + $0x8] sm:$0xff]  ;;  %v2817_v34 = vpack.c.bf16 %v80_v30, %v76_v28  ;;  %v2819_v35 = vpack.c.bf16 %v77_v32, %v73_v31  ;;  %v75_v36 = vld [vmem:[#allocation9 + $0x50] sm:$0xff]  ;;  %v84_v41 = vld [vmem:[#allocation9 + $0x98] sm:$0xff] }
  0x40   :  { %1877 = vmatmul.mubr.msk.f32.vlgmr.msra.gmra.mrb[0].mxu1 %vm167_vm0, %v129_v12  ;;  %1920 = vmatpush1.bf16.msra.mxu0 %v2806_v22  ;;  %v79_v37 = vld [vmem:[#allocation9 + $0x70] sm:$0xff]  ;;  %v82_v39 = vld [vmem:[#allocation9 + $0x88] sm:$0xff]  ;;  %v88_v43 = vld [vmem:[#allocation9 + $0xb8] sm:$0xff] }
  0x41   :  { %1952 = vmatpush1.bf16.msra.mxu1 %v2809_v25  ;;  %262 = vmatprep.mubr.f32.mxu0 %v2731_v0  ;;  %v2823_v38 = vpack.c.bf16 %v79_v37, %v75_v36  ;;  %v86_v40 = vld [vmem:[#allocation9 + $0xa8] sm:$0xff]  ;;  %v81_v44 = vld [vmem:[#allocation9 + $0x80] sm:$0xff]  ;;  %v131_v46 = vld [vmem:[#allocation4 + $0x10] sm:$0xff]  ;;  %v2831_v47 = vpack.c.bf16 %v88_v43, %v84_v41 }
  0x42   :  { %375 = vmatprep.mubr.f32.mxu1 %v2731_v0  ;;  %1922 = vmatprep.subr.bf16.mxu0 %v2813_v29  ;;  %v2827_v42 = vpack.c.bf16 %v86_v40, %v82_v39  ;;  %v85_v45 = vld [vmem:[#allocation9 + $0xa0] sm:$0xff]  ;;  %v83_v48 = vld [vmem:[#allocation9 + $0x90] sm:$0xff]  ;;  %v90_v51 = vld [vmem:[#allocation9 + $0xc8] sm:$0xff] }
  0x43   :  { %1870 = vmatmul.mubr.msk.f32.gmra.mrb[2].mxu0 %vm167_vm0, %v130_v33  ;;  %1954 = vmatprep.subr.bf16.mxu1 %v2817_v34  ;;  %v87_v49 = vld [vmem:[#allocation9 + $0xb0] sm:$0xff]  ;;  %v2835_v50 = vpack.c.bf16 %v85_v45, %v81_v44  ;;  %v94_v52 = vld [vmem:[#allocation9 + $0xe8] sm:$0xff]  ;;  %v92_v53 = vld [vmem:[#allocation9 + $0xd8] sm:$0xff] }
  0x44   :  { %1878 = vmatmul.mubr.msk.f32.gmra.mrb[2].mxu1 %vm167_vm0, %v130_v33  ;;  %1924 = vmatpush1.bf16.msra.mxu0 %v2819_v35  ;;  %v2839_v54 = vpack.c.bf16 %v87_v49, %v83_v48  ;;  %v96_v55 = vld [vmem:[#allocation9 + $0xf8] sm:$0xff]  ;;  %v89_v56 = vld [vmem:[#allocation9 + $0xc0] sm:$0xff]  ;;  %v2843_v58 = vpack.c.bf16 %v94_v52, %v90_v51  ;;  %v91_v59 = vld [vmem:[#allocation9 + $0xd0] sm:$0xff] }
  0x45   :  { %1956 = vmatpush1.bf16.msra.mxu1 %v2823_v38  ;;  %268 = vmatprep.mubr.f32.mxu0 %v2731_v0  ;;  %v93_v57 = vld [vmem:[#allocation9 + $0xe0] sm:$0xff]  ;;  %v95_v60 = vld [vmem:[#allocation9 + $0xf0] sm:$0xff]  ;;  %v2847_v61 = vpack.c.bf16 %v96_v55, %v92_v53  ;;  %v98_v62 = vld [vmem:[#allocation9 + $0x108] sm:$0xff] }
  0x46   :  { %381 = vmatprep.mubr.f32.mxu1 %v2731_v0  ;;  %1926 = vmatprep.subr.bf16.mxu0 %v2827_v42  ;;  %v102_v63 = vld [vmem:[#allocation9 + $0x128] sm:$0xff]  ;;  %v132_v1 = vld [vmem:[#allocation4 + $0x18] sm:$0xff]  ;;  %v2851_v2 = vpack.c.bf16 %v93_v57, %v89_v56  ;;  %v2855_v5 = vpack.c.bf16 %v95_v60, %v91_v59  ;;  %v97_v6 = vld [vmem:[#allocation9 + $0x100] sm:$0xff] }
  0x47   :  { %1871 = vmatmul.mubr.msk.f32.gmra.mrb[4].mxu0 %vm167_vm0, %v131_v46  ;;  %1958 = vmatprep.subr.bf16.mxu1 %v2831_v47  ;;  %v100_v3 = vld [vmem:[#allocation9 + $0x118] sm:$0xff]  ;;  %v101_v7 = vld [vmem:[#allocation9 + $0x120] sm:$0xff]  ;;  %v2859_v8 = vpack.c.bf16 %v102_v63, %v98_v62  ;;  %v99_v9 = vld [vmem:[#allocation9 + $0x110] sm:$0xff] }
  0x48   :  { %1879 = vmatmul.mubr.msk.f32.gmra.mrb[4].mxu1 %vm167_vm0, %v131_v46  ;;  %1928 = vmatpush1.bf16.msra.mxu0 %v2835_v50  ;;  %v104_v4 = vld [vmem:[#allocation9 + $0x138] sm:$0xff]  ;;  %v103_v10 = vld [vmem:[#allocation9 + $0x130] sm:$0xff]  ;;  %v106_v12 = vld [vmem:[#allocation9 + $0x148] sm:$0xff]  ;;  %v2867_v15 = vpack.c.bf16 %v101_v7, %v97_v6  ;;  %v147_v7 = vlaneseq }
  0x49   :  { %1960 = vmatpush1.bf16.msra.mxu1 %v2839_v54  ;;  %274 = vmatprep.mubr.f32.mxu0 %v2731_v0  ;;  %v2863_v11 = vpack.c.bf16 %v104_v4, %v100_v3  ;;  %v110_v13 = vld [vmem:[#allocation9 + $0x168] sm:$0xff]  ;;  %v133_v14 = vld [vmem:[#allocation4 + $0x20] sm:$0xff]  ;;  %v108_v16 = vld [vmem:[#allocation9 + $0x158] sm:$0xff]  ;;  %v2871_v19 = vpack.c.bf16 %v103_v10, %v99_v9 }
  0x4a   :  { %387 = vmatprep.mubr.f32.mxu1 %v2731_v0  ;;  %1930 = vmatprep.subr.bf16.mxu0 %v2843_v58  ;;  %v112_v18 = vld [vmem:[#allocation9 + $0x178] sm:$0xff]  ;;  %v105_v20 = vld [vmem:[#allocation9 + $0x140] sm:$0xff]  ;;  %v2875_v24 = vpack.c.bf16 %v110_v13, %v106_v12  ;;  %v107_v26 = vld [vmem:[#allocation9 + $0x150] sm:$0xff]  ;;  %v148_v9 = vshrl.u32 %v147_v7, 7 }
  0x4b   :  { %1872 = vmatmul.mubr.msk.f32.gmra.mrb[6].mxu0 %vm167_vm0, %v132_v1  ;;  %1962 = vmatprep.subr.bf16.mxu1 %v2847_v61  ;;  %v109_v23 = vld [vmem:[#allocation9 + $0x160] sm:$0xff]  ;;  %v111_v27 = vld [vmem:[#allocation9 + $0x170] sm:$0xff]  ;;  %v2879_v28 = vpack.c.bf16 %v112_v18, %v108_v16  ;;  %v114_v30 = vld [vmem:[#allocation9 + $0x188] sm:$0xff] }
  0x4c   :  { %1880 = vmatmul.mubr.msk.f32.gmra.mrb[6].mxu1 %vm167_vm0, %v132_v1  ;;  %1932 = vmatpush1.bf16.msra.mxu0 %v2851_v2  ;;  %v118_v31 = vld [vmem:[#allocation9 + $0x1a8] sm:$0xff]  ;;  %v2883_v33 = vpack.c.bf16 %v109_v23, %v105_v20  ;;  %v116_v36 = vld [vmem:[#allocation9 + $0x198] sm:$0xff]  ;;  %v2887_v39 = vpack.c.bf16 %v111_v27, %v107_v26  ;;  %v113_v40 = vld [vmem:[#allocation9 + $0x180] sm:$0xff]  ;;  %v149_v10 = vsub.s32 0, %v148_v9  ;;  %v153_v13 = vsub.s32 1, %v148_v9 }
  0x4d   :  { %1964 = vmatpush1.bf16.msra.mxu1 %v2855_v5  ;;  %280 = vmatprep.mubr.f32.mxu0 %v2731_v0  ;;  %v134_v32 = vld [vmem:[#allocation4 + $0x28] sm:$0xff]  ;;  %v120_v37 = vld [vmem:[#allocation9 + $0x1b8] sm:$0xff]  ;;  %v117_v41 = vld [vmem:[#allocation9 + $0x1a0] sm:$0xff]  ;;  %v2891_v43 = vpack.c.bf16 %v118_v31, %v114_v30  ;;  %v161_v20 = vsub.s32 3, %v148_v9 }
  0x4e   :  { %393 = vmatprep.mubr.f32.mxu1 %v2731_v0  ;;  %1934 = vmatprep.subr.bf16.mxu0 %v2859_v8  ;;  %v115_v44 = vld [vmem:[#allocation9 + $0x190] sm:$0xff]  ;;  %v2895_v46 = vpack.c.bf16 %v120_v37, %v116_v36  ;;  %v122_v48 = vld [vmem:[#allocation9 + $0x1c8] sm:$0xff]  ;;  %v2899_v52 = vpack.c.bf16 %v117_v41, %v113_v40  ;;  %v124_v53 = vld [vmem:[#allocation9 + $0x1d8] sm:$0xff]  ;;  %v157_v40 = vsub.s32 2, %v148_v9 }
  0x4f   :  { %1873 = vmatmul.mubr.msk.f32.gmra.mrb[8].mxu0 %vm167_vm0, %v133_v14  ;;  %1966 = vmatprep.subr.bf16.mxu1 %v2863_v11  ;;  %v119_v45 = vld [vmem:[#allocation9 + $0x1b0] sm:$0xff]  ;;  %v126_v49 = vld [vmem:[#allocation9 + $0x1e8] sm:$0xff]  ;;  %v128_v55 = vld [vmem:[#allocation9 + $0x1f8] sm:$0xff] }
  0x50   :  { %1881 = vmatmul.mubr.msk.f32.gmra.mrb[8].mxu1 %vm167_vm0, %v133_v14  ;;  %1936 = vmatpush1.bf16.msra.mxu0 %v2867_v15  ;;  %v135_v51 = vld [vmem:[#allocation4 + $0x30] sm:$0xff]  ;;  %v2903_v56 = vpack.c.bf16 %v119_v45, %v115_v44  ;;  %v121_v57 = vld [vmem:[#allocation9 + $0x1c0] sm:$0xff]  ;;  %v2907_v60 = vpack.c.bf16 %v126_v49, %v122_v48  ;;  %v2911_v1 = vpack.c.bf16 %v128_v55, %v124_v53  ;;  %v136_v3 = vld [vmem:[#allocation4 + $0x38] sm:$0xff] }
  0x51   :  { %1968 = vmatpush1.bf16.msra.mxu1 %v2871_v19  ;;  %286 = vmatprep.mubr.f32.mxu0 %v2731_v0  ;;  %v125_v59 = vld [vmem:[#allocation9 + $0x1e0] sm:$0xff]  ;;  %v123_v62 = vld [vmem:[#allocation9 + $0x1d0] sm:$0xff] }
  0x52   :  { %399 = vmatprep.mubr.f32.mxu1 %v2731_v0  ;;  %1938 = vmatprep.subr.bf16.mxu0 %v2875_v24  ;;  %v127_v63 = vld [vmem:[#allocation9 + $0x1f0] sm:$0xff]  ;;  %v2915_v4 = vpack.c.bf16 %v125_v59, %v121_v57  ;;  %v145_v12 = vld [vmem:[%s3252_s3] sm:$0xf]  ;;  %s2732_s3 = smov [#allocation10]  }
  0x53   :  { %1874 = vmatmul.mubr.msk.f32.gmra.mrb[10].mxu0 %vm167_vm0, %v134_v32  ;;  %1970 = vmatprep.subr.bf16.mxu1 %v2879_v28  ;;  %v2919_v6 = vpack.c.bf16 %v127_v63, %v123_v62  ;;  %v2971_v14 = vrot.slane %v145_v12, %v149_v10  ;;  %v2973_v16 = vrot.slane %v145_v12, %v153_v13  ;;  %s1859_s26 = sshll.u32 %s2732_s3, 4  ;;  %s1860_s26 = int_to_ptr.vmem [resolvable:$true] %s1859_s26 }
  0x54   :  { %1882 = vmatmul.mubr.msk.f32.gmra.mrb[10].mxu1 %vm167_vm0, %v134_v32  ;;  %1940 = vmatpush1.bf16.msra.mxu0 %v2883_v33  ;;  %v2977_v37 = vrot.slane %v145_v12, %v161_v20  ;;  %v2980_v44 = vrot.slane %v145_v12, %v157_v40  ;;  %s2696_s29 = scalar_lea.vmem %s1860_s26, 128  ;;  %p2701_p11 = scmp.lt.s32.totalorder %s1860_s26, %s1860_s26 }
  0x55   :  { %1972 = vmatpush1.bf16.msra.mxu1 %v2887_v39  ;;  %292 = vmatprep.mubr.f32.mxu0 %v2731_v0  ;;  %p2697_p10 = scmp.ne.s32.totalorder %s1860_s26, %s2696_s29  ;;  %p2702_p12 = scmp.lt.s32.totalorder %s2696_s29, %s2696_s29 }
  0x56   :  { %405 = vmatprep.mubr.f32.mxu1 %v2731_v0  ;;  %1942 = vmatprep.subr.bf16.mxu0 %v2891_v43 }
  0x57   :  { %1875 = vmatmul.mubr.msk.f32.gmra.mrb[12].mxu0 %vm167_vm0, %v135_v51  ;;  %1974 = vmatprep.subr.bf16.mxu1 %v2895_v46  ;;  %p2703_p13 = por %p2702_p12, %p2701_p11 }
  0x58   :  { %1883 = vmatmul.mubr.msk.f32.gmra.mrb[12].mxu1 %vm167_vm0, %v135_v51  ;;  %1944 = vmatpush1.bf16.msra.mxu0 %v2899_v52 }
  0x59   :  { %1976 = vmatpush1.bf16.msra.mxu1 %v2903_v56  ;;  %298 = vmatprep.mubr.f32.mxu0 %v2731_v0  ;;  %p2704_p0 = pnand %p2703_p13, %p2697_p10 }
  0x5a   :  { %411 = vmatprep.mubr.f32.mxu1 %v2731_v0  ;;  %1946 = vmatprep.subr.bf16.mxu0 %v2907_v60 }
  0x5b   :  { %1876 = vmatmul.mubr.msk.f32.gmra.mrb[14].mxu0 %vm167_vm0, %v136_v3  ;;  %1978 = vmatprep.subr.bf16.mxu1 %v2911_v1 }
  0x5c   :  { %1884 = vmatmul.mubr.msk.f32.gmra.mrb[14].mxu1 %vm167_vm0, %v136_v3  ;;  %1948 = vmatpush1.bf16.msra.mxu0 %v2915_v4 }
  0x5d   :  { %1980 = vmatpush1.bf16.msra.mxu1 %v2919_v6  ;;  %520 = vmatprep.mubr.f32.mxu0 %v2731_v0 }
  0x5e   :  { %591 = vmatprep.mubr.f32.mxu1 %v2731_v0  ;;  %1982 = vmatprep.subr.bf16.mxu0 %v2802_v17 }
  0x5f   :  { %521 = vmatmul.mubr.f32.vlgmr.msra.gmra.mrb[0].mxu0 %v2731_v0  ;;  %2014 = vmatprep.subr.bf16.mxu1 %v2804_v21 }
  0x60   :  { %592 = vmatmul.mubr.f32.vlgmr.msra.gmra.mrb[0].mxu1 %v2731_v0  ;;  %1984 = vmatpush1.bf16.msra.mxu0 %v2806_v22 }
  0x61   :  { %2016 = vmatpush1.bf16.msra.mxu1 %v2809_v25  ;;  %1986 = vmatprep.subr.bf16.mxu0 %v2813_v29 }
  0x62   :  { %2018 = vmatprep.subr.bf16.mxu1 %v2817_v34  ;;  %695 = vmatprep.mubr.f32.mxu0 %v2731_v0 }
  0x63   :  { %766 = vmatprep.mubr.f32.mxu1 %v2731_v0 }
  0x64   :  { %1988 = vmatpush1.bf16.msra.mxu0 %v2819_v35 }
  0x65   :  { %2020 = vmatpush1.bf16.msra.mxu1 %v2823_v38  ;;  %1990 = vmatprep.subr.bf16.mxu0 %v2827_v42 }
  0x66   :  { %2022 = vmatprep.subr.bf16.mxu1 %v2831_v47 }
  0x68   :  { %1992 = vmatpush1.bf16.msra.mxu0 %v2835_v50 }
  0x69   :  { %2024 = vmatpush1.bf16.msra.mxu1 %v2839_v54  ;;  %1994 = vmatprep.subr.bf16.mxu0 %v2843_v58 }
  0x6a   :  { %2026 = vmatprep.subr.bf16.mxu1 %v2847_v61 }
  0x6c   :  { %1996 = vmatpush1.bf16.msra.mxu0 %v2851_v2 }
  0x6d   :  { %2028 = vmatpush1.bf16.msra.mxu1 %v2855_v5  ;;  %1998 = vmatprep.subr.bf16.mxu0 %v2859_v8 }
  0x6e   :  { %2030 = vmatprep.subr.bf16.mxu1 %v2863_v11 }
  0x70   :  { %2000 = vmatpush1.bf16.msra.mxu0 %v2867_v15 }
  0x71   :  { %2032 = vmatpush1.bf16.msra.mxu1 %v2871_v19  ;;  %2002 = vmatprep.subr.bf16.mxu0 %v2875_v24 }
  0x72   :  { %2034 = vmatprep.subr.bf16.mxu1 %v2879_v28 }
  0x74   :  { %2004 = vmatpush1.bf16.msra.mxu0 %v2883_v33 }
  0x75   :  { %2036 = vmatpush1.bf16.msra.mxu1 %v2887_v39  ;;  %2006 = vmatprep.subr.bf16.mxu0 %v2891_v43 }
  0x76   :  { %2038 = vmatprep.subr.bf16.mxu1 %v2895_v46 }
  0x78   :  { %2008 = vmatpush1.bf16.msra.mxu0 %v2899_v52 }
  0x79   :  { %2040 = vmatpush1.bf16.msra.mxu1 %v2903_v56  ;;  %2010 = vmatprep.subr.bf16.mxu0 %v2907_v60 }
  0x7a   :  { %2042 = vmatprep.subr.bf16.mxu1 %v2911_v1 }
  0x7c   :  { %2012 = vmatpush1.bf16.msra.mxu0 %v2915_v4 }
  0x7d   :  { %2044 = vmatpush1.bf16.msra.mxu1 %v2919_v6  ;;  %2046 = vmatprep.subr.bf16.mxu0 %v2802_v17 }
  0x7e   :  { %2078 = vmatprep.subr.bf16.mxu1 %v2804_v21 }
 0x132   :  { %v522_v18 = vpop.f32.mrb[0].mxu0 }
 0x133   :  { %v2429_v23 = vadd.f32 %v522_v18, %v2971_v14  ;;  %v593_v26 = vpop.f32.mrb[0].mxu1  ;;  %v524_v27 = vpop.f32.mrb[1].mxu0 }
 0x134   :  { %v2430_v30 = vadd.f32 %v524_v27, %v2973_v16  ;;  %v595_v31 = vpop.f32.mrb[1].mxu1  ;;  %v2445_v48 = vadd.f32 %v593_v26, %v2980_v44 }
 0x135   :  { %v1885_v32 = vmul.f32 -1.442695, %v2429_v23  ;;  %v2446_v41 = vadd.f32 %v595_v31, %v2977_v37 }
 0x136   :  { %v1886_v36 = vmul.f32 -1.442695, %v2430_v30 }
 0x137   :  { %2502 = vpow2.f32 %v1885_v32  ;;  %v1887_v45 = vmul.f32 -1.442695, %v2446_v41 }
 0x138   :  { %2504 = vpow2.f32 %v1886_v36 }
 0x139   :  { %2506 = vpow2.f32 %v1887_v45 }
 0x13a   :  { %2508 = vtanh.f32 %v2445_v48 }
 0x141   :  { %v2503_v49 = vpop.eup %2502 }
 0x142   :  { %v2505_v51 = vpop.eup %2504  ;;  %v605_v53 = vadd.f32 1.0, %v2503_v49 }
 0x143   :  { %v611_v55 = vadd.f32 1.0, %v2505_v51  ;;  %v2507_v57 = vpop.eup %2506 }
 0x144   :  { %2510 = vrcp.f32 %v605_v53  ;;  %v2509_v59 = vpop.eup %2508  ;;  %v618_v7 = vadd.f32 1.0, %v2507_v57 }
 0x145   :  { %2512 = vrcp.f32 %v611_v55 }
 0x146   :  { %2514 = vrcp.f32 %v618_v7 }
 0x14e   :  { %v2511_v62 = vpop.eup %2510 }
 0x14f   :  { %v2513_v63 = vpop.eup %2512  ;;  %v622_v3 = vmul.f32 %v2511_v62, %v2509_v59 }
 0x150   :  { %v621_v9 = vmul.f32 0.0, %v2513_v63  ;;  %v2515_v12 = vpop.eup %2514 }
 0x152   :  { %v2983_v10 = vadd.f32 %v622_v3, %v621_v9 }
 0x154   :  { %2516 = vtanh.f32 %v2983_v10 }
 0x15e   :  { %v2517_v13 = vpop.eup %2516 }
 0x15f   :  { %v625_v18 = vmul.f32 %v2517_v13, %v2515_v12 }
 0x161   :  { %696 = vmatmul.mubr.f32.vlgmr.msra.gmra.mrb[2].mxu0 %v625_v18  ;;  %767 = vmatmul.mubr.f32.vlgmr.msra.gmra.mrb[2].mxu1 %v625_v18 }
 0x162   :  { %2048 = vmatpush1.bf16.msra.mxu0 %v2806_v22  ;;  %2080 = vmatpush1.bf16.msra.mxu1 %v2809_v25 }
 0x163   :  { %2050 = vmatprep.subr.bf16.mxu0 %v2813_v29  ;;  %2082 = vmatprep.subr.bf16.mxu1 %v2817_v34 }
 0x164   :  { %870 = vmatprep.mubr.f32.mxu0 %v2731_v0  ;;  %941 = vmatprep.mubr.f32.mxu1 %v2731_v0 }
 0x166   :  { %2052 = vmatpush1.bf16.msra.mxu0 %v2819_v35  ;;  %2084 = vmatpush1.bf16.msra.mxu1 %v2823_v38 }
 0x167   :  { %2054 = vmatprep.subr.bf16.mxu0 %v2827_v42  ;;  %2086 = vmatprep.subr.bf16.mxu1 %v2831_v47 }
 0x16a   :  { %2056 = vmatpush1.bf16.msra.mxu0 %v2835_v50  ;;  %2088 = vmatpush1.bf16.msra.mxu1 %v2839_v54 }
 0x16b   :  { %2058 = vmatprep.subr.bf16.mxu0 %v2843_v58  ;;  %2090 = vmatprep.subr.bf16.mxu1 %v2847_v61 }
 0x16e   :  { %2060 = vmatpush1.bf16.msra.mxu0 %v2851_v2  ;;  %2092 = vmatpush1.bf16.msra.mxu1 %v2855_v5 }
 0x16f   :  { %2062 = vmatprep.subr.bf16.mxu0 %v2859_v8  ;;  %2094 = vmatprep.subr.bf16.mxu1 %v2863_v11 }
 0x172   :  { %2064 = vmatpush1.bf16.msra.mxu0 %v2867_v15  ;;  %2096 = vmatpush1.bf16.msra.mxu1 %v2871_v19 }
 0x173   :  { %2066 = vmatprep.subr.bf16.mxu0 %v2875_v24  ;;  %2098 = vmatprep.subr.bf16.mxu1 %v2879_v28 }
 0x176   :  { %2068 = vmatpush1.bf16.msra.mxu0 %v2883_v33  ;;  %2100 = vmatpush1.bf16.msra.mxu1 %v2887_v39 }
 0x177   :  { %2070 = vmatprep.subr.bf16.mxu0 %v2891_v43  ;;  %2102 = vmatprep.subr.bf16.mxu1 %v2895_v46 }
 0x17a   :  { %2072 = vmatpush1.bf16.msra.mxu0 %v2899_v52  ;;  %2104 = vmatpush1.bf16.msra.mxu1 %v2903_v56 }
 0x17b   :  { %2074 = vmatprep.subr.bf16.mxu0 %v2907_v60  ;;  %2106 = vmatprep.subr.bf16.mxu1 %v2911_v1 }
 0x17e   :  { %2076 = vmatpush1.bf16.msra.mxu0 %v2915_v4  ;;  %2108 = vmatpush1.bf16.msra.mxu1 %v2919_v6 }
 0x17f   :  { %2110 = vmatprep.subr.bf16.mxu0 %v2802_v17  ;;  %2142 = vmatprep.subr.bf16.mxu1 %v2804_v21 }
 0x234   :  { %v697_v20 = vpop.f32.mrb[2].mxu0  ;;  %v768_v23 = vpop.f32.mrb[2].mxu1 }
 0x235   :  { %v2431_v26 = vadd.f32 %v697_v20, %v2971_v14  ;;  %v699_v27 = vpop.f32.mrb[3].mxu0  ;;  %v770_v30 = vpop.f32.mrb[3].mxu1  ;;  %v2447_v45 = vadd.f32 %v768_v23, %v2980_v44 }
 0x236   :  { %v2432_v31 = vadd.f32 %v699_v27, %v2973_v16  ;;  %v2448_v40 = vadd.f32 %v770_v30, %v2977_v37 }
 0x237   :  { %v1888_v32 = vmul.f32 -1.442695, %v2431_v26 }
 0x238   :  { %v1889_v36 = vmul.f32 -1.442695, %v2432_v31  ;;  %v1890_v41 = vmul.f32 -1.442695, %v2448_v40 }
 0x239   :  { %2518 = vpow2.f32 %v1888_v32 }
 0x23a   :  { %2520 = vpow2.f32 %v1889_v36 }
 0x23b   :  { %2522 = vpow2.f32 %v1890_v41 }
 0x23c   :  { %2524 = vtanh.f32 %v2447_v45 }
 0x243   :  { %v2519_v48 = vpop.eup %2518 }
 0x244   :  { %v2521_v49 = vpop.eup %2520  ;;  %v780_v51 = vadd.f32 1.0, %v2519_v48 }
 0x245   :  { %v786_v53 = vadd.f32 1.0, %v2521_v49  ;;  %v2523_v55 = vpop.eup %2522 }
 0x246   :  { %2526 = vrcp.f32 %v780_v51  ;;  %v2525_v57 = vpop.eup %2524  ;;  %v793_v3 = vadd.f32 1.0, %v2523_v55 }
 0x247   :  { %2528 = vrcp.f32 %v786_v53 }
 0x248   :  { %2530 = vrcp.f32 %v793_v3 }
 0x250   :  { %v2527_v59 = vpop.eup %2526 }
 0x251   :  { %v2529_v62 = vpop.eup %2528  ;;  %v797_v63 = vmul.f32 %v2527_v59, %v2525_v57 }
 0x252   :  { %v796_v7 = vmul.f32 %v2529_v62, %v2983_v10  ;;  %v2531_v12 = vpop.eup %2530 }
 0x254   :  { %v3025_v9 = vadd.f32 %v797_v63, %v796_v7 }
 0x256   :  { %2532 = vtanh.f32 %v3025_v9 }
 0x260   :  { %v2533_v13 = vpop.eup %2532 }
 0x261   :  { %v800_v18 = vmul.f32 %v2533_v13, %v2531_v12 }
 0x263   :  { %871 = vmatmul.mubr.f32.vlgmr.msra.gmra.mrb[4].mxu0 %v800_v18  ;;  %942 = vmatmul.mubr.f32.vlgmr.msra.gmra.mrb[4].mxu1 %v800_v18 }
 0x264   :  { %2112 = vmatpush1.bf16.msra.mxu0 %v2806_v22  ;;  %2144 = vmatpush1.bf16.msra.mxu1 %v2809_v25 }
 0x265   :  { %2114 = vmatprep.subr.bf16.mxu0 %v2813_v29  ;;  %2146 = vmatprep.subr.bf16.mxu1 %v2817_v34 }
 0x266   :  { %1045 = vmatprep.mubr.f32.mxu0 %v2731_v0  ;;  %1116 = vmatprep.mubr.f32.mxu1 %v2731_v0 }
 0x268   :  { %2116 = vmatpush1.bf16.msra.mxu0 %v2819_v35  ;;  %2148 = vmatpush1.bf16.msra.mxu1 %v2823_v38 }
 0x269   :  { %2118 = vmatprep.subr.bf16.mxu0 %v2827_v42  ;;  %2150 = vmatprep.subr.bf16.mxu1 %v2831_v47 }
 0x26c   :  { %2120 = vmatpush1.bf16.msra.mxu0 %v2835_v50  ;;  %2152 = vmatpush1.bf16.msra.mxu1 %v2839_v54 }
 0x26d   :  { %2122 = vmatprep.subr.bf16.mxu0 %v2843_v58  ;;  %2154 = vmatprep.subr.bf16.mxu1 %v2847_v61 }
 0x270   :  { %2124 = vmatpush1.bf16.msra.mxu0 %v2851_v2  ;;  %2156 = vmatpush1.bf16.msra.mxu1 %v2855_v5 }
 0x271   :  { %2126 = vmatprep.subr.bf16.mxu0 %v2859_v8  ;;  %2158 = vmatprep.subr.bf16.mxu1 %v2863_v11 }
 0x274   :  { %2128 = vmatpush1.bf16.msra.mxu0 %v2867_v15  ;;  %2160 = vmatpush1.bf16.msra.mxu1 %v2871_v19 }
 0x275   :  { %2130 = vmatprep.subr.bf16.mxu0 %v2875_v24  ;;  %2162 = vmatprep.subr.bf16.mxu1 %v2879_v28 }
 0x278   :  { %2132 = vmatpush1.bf16.msra.mxu0 %v2883_v33  ;;  %2164 = vmatpush1.bf16.msra.mxu1 %v2887_v39 }
 0x279   :  { %2134 = vmatprep.subr.bf16.mxu0 %v2891_v43  ;;  %2166 = vmatprep.subr.bf16.mxu1 %v2895_v46 }
 0x27c   :  { %2136 = vmatpush1.bf16.msra.mxu0 %v2899_v52  ;;  %2168 = vmatpush1.bf16.msra.mxu1 %v2903_v56 }
 0x27d   :  { %2138 = vmatprep.subr.bf16.mxu0 %v2907_v60  ;;  %2170 = vmatprep.subr.bf16.mxu1 %v2911_v1 }
 0x280   :  { %2140 = vmatpush1.bf16.msra.mxu0 %v2915_v4  ;;  %2172 = vmatpush1.bf16.msra.mxu1 %v2919_v6 }
 0x281   :  { %2174 = vmatprep.subr.bf16.mxu0 %v2802_v17  ;;  %2206 = vmatprep.subr.bf16.mxu1 %v2804_v21 }
 0x336   :  { %v872_v10 = vpop.f32.mrb[4].mxu0  ;;  %v943_v20 = vpop.f32.mrb[4].mxu1 }
 0x337   :  { %v2433_v23 = vadd.f32 %v872_v10, %v2971_v14  ;;  %v874_v26 = vpop.f32.mrb[5].mxu0  ;;  %v945_v27 = vpop.f32.mrb[5].mxu1  ;;  %v2449_v41 = vadd.f32 %v943_v20, %v2980_v44 }
 0x338   :  { %v2434_v30 = vadd.f32 %v874_v26, %v2973_v16  ;;  %v2450_v36 = vadd.f32 %v945_v27, %v2977_v37 }
 0x339   :  { %v1891_v31 = vmul.f32 -1.442695, %v2433_v23 }
 0x33a   :  { %v1892_v32 = vmul.f32 -1.442695, %v2434_v30  ;;  %v1893_v40 = vmul.f32 -1.442695, %v2450_v36 }
 0x33b   :  { %2534 = vpow2.f32 %v1891_v31 }
 0x33c   :  { %2536 = vpow2.f32 %v1892_v32 }
 0x33d   :  { %2538 = vpow2.f32 %v1893_v40 }
 0x33e   :  { %2540 = vtanh.f32 %v2449_v41 }
 0x345   :  { %v2535_v45 = vpop.eup %2534 }
 0x346   :  { %v2537_v48 = vpop.eup %2536  ;;  %v955_v49 = vadd.f32 1.0, %v2535_v45 }
 0x347   :  { %v961_v51 = vadd.f32 1.0, %v2537_v48  ;;  %v2539_v53 = vpop.eup %2538 }
 0x348   :  { %2542 = vrcp.f32 %v955_v49  ;;  %v2541_v55 = vpop.eup %2540  ;;  %v968_v63 = vadd.f32 1.0, %v2539_v53 }
 0x349   :  { %2544 = vrcp.f32 %v961_v51 }
 0x34a   :  { %2546 = vrcp.f32 %v968_v63 }
 0x352   :  { %v2543_v57 = vpop.eup %2542 }
 0x353   :  { %v2545_v59 = vpop.eup %2544  ;;  %v972_v62 = vmul.f32 %v2543_v57, %v2541_v55 }
 0x354   :  { %v971_v3 = vmul.f32 %v2545_v59, %v3025_v9  ;;  %v2547_v12 = vpop.eup %2546 }
 0x356   :  { %v3067_v7 = vadd.f32 %v972_v62, %v971_v3 }
 0x358   :  { %2548 = vtanh.f32 %v3067_v7 }
 0x362   :  { %v2549_v13 = vpop.eup %2548 }
 0x363   :  { %v975_v18 = vmul.f32 %v2549_v13, %v2547_v12 }
 0x365   :  { %1046 = vmatmul.mubr.f32.vlgmr.msra.gmra.mrb[6].mxu0 %v975_v18  ;;  %1117 = vmatmul.mubr.f32.vlgmr.msra.gmra.mrb[6].mxu1 %v975_v18 }
 0x366   :  { %2176 = vmatpush1.bf16.msra.mxu0 %v2806_v22  ;;  %2208 = vmatpush1.bf16.msra.mxu1 %v2809_v25 }
 0x367   :  { %2178 = vmatprep.subr.bf16.mxu0 %v2813_v29  ;;  %2210 = vmatprep.subr.bf16.mxu1 %v2817_v34 }
 0x368   :  { %1220 = vmatprep.mubr.f32.mxu0 %v2731_v0  ;;  %1291 = vmatprep.mubr.f32.mxu1 %v2731_v0 }
 0x36a   :  { %2180 = vmatpush1.bf16.msra.mxu0 %v2819_v35  ;;  %2212 = vmatpush1.bf16.msra.mxu1 %v2823_v38 }
 0x36b   :  { %2182 = vmatprep.subr.bf16.mxu0 %v2827_v42  ;;  %2214 = vmatprep.subr.bf16.mxu1 %v2831_v47 }
 0x36e   :  { %2184 = vmatpush1.bf16.msra.mxu0 %v2835_v50  ;;  %2216 = vmatpush1.bf16.msra.mxu1 %v2839_v54 }
 0x36f   :  { %2186 = vmatprep.subr.bf16.mxu0 %v2843_v58  ;;  %2218 = vmatprep.subr.bf16.mxu1 %v2847_v61 }
 0x372   :  { %2188 = vmatpush1.bf16.msra.mxu0 %v2851_v2  ;;  %2220 = vmatpush1.bf16.msra.mxu1 %v2855_v5 }
 0x373   :  { %2190 = vmatprep.subr.bf16.mxu0 %v2859_v8  ;;  %2222 = vmatprep.subr.bf16.mxu1 %v2863_v11 }
 0x376   :  { %2192 = vmatpush1.bf16.msra.mxu0 %v2867_v15  ;;  %2224 = vmatpush1.bf16.msra.mxu1 %v2871_v19 }
 0x377   :  { %2194 = vmatprep.subr.bf16.mxu0 %v2875_v24  ;;  %2226 = vmatprep.subr.bf16.mxu1 %v2879_v28 }
 0x37a   :  { %2196 = vmatpush1.bf16.msra.mxu0 %v2883_v33  ;;  %2228 = vmatpush1.bf16.msra.mxu1 %v2887_v39 }
 0x37b   :  { %2198 = vmatprep.subr.bf16.mxu0 %v2891_v43  ;;  %2230 = vmatprep.subr.bf16.mxu1 %v2895_v46 }
 0x37e   :  { %2200 = vmatpush1.bf16.msra.mxu0 %v2899_v52  ;;  %2232 = vmatpush1.bf16.msra.mxu1 %v2903_v56 }
 0x37f   :  { %2202 = vmatprep.subr.bf16.mxu0 %v2907_v60  ;;  %2234 = vmatprep.subr.bf16.mxu1 %v2911_v1 }
 0x382   :  { %2204 = vmatpush1.bf16.msra.mxu0 %v2915_v4  ;;  %2236 = vmatpush1.bf16.msra.mxu1 %v2919_v6 }
 0x383   :  { %2238 = vmatprep.subr.bf16.mxu0 %v2802_v17  ;;  %2270 = vmatprep.subr.bf16.mxu1 %v2804_v21 }
 0x438   :  { %v1047_v9 = vpop.f32.mrb[6].mxu0  ;;  %v1118_v10 = vpop.f32.mrb[6].mxu1 }
 0x439   :  { %v2435_v20 = vadd.f32 %v1047_v9, %v2971_v14  ;;  %v1049_v23 = vpop.f32.mrb[7].mxu0  ;;  %v1120_v26 = vpop.f32.mrb[7].mxu1  ;;  %v2451_v40 = vadd.f32 %v1118_v10, %v2980_v44 }
 0x43a   :  { %v2436_v27 = vadd.f32 %v1049_v23, %v2973_v16  ;;  %v2452_v32 = vadd.f32 %v1120_v26, %v2977_v37 }
 0x43b   :  { %v1894_v30 = vmul.f32 -1.442695, %v2435_v20 }
 0x43c   :  { %v1895_v31 = vmul.f32 -1.442695, %v2436_v27  ;;  %v1896_v36 = vmul.f32 -1.442695, %v2452_v32 }
 0x43d   :  { %2550 = vpow2.f32 %v1894_v30 }
 0x43e   :  { %2552 = vpow2.f32 %v1895_v31 }
 0x43f   :  { %2554 = vpow2.f32 %v1896_v36 }
 0x440   :  { %2556 = vtanh.f32 %v2451_v40 }
 0x447   :  { %v2551_v41 = vpop.eup %2550 }
 0x448   :  { %v2553_v45 = vpop.eup %2552  ;;  %v1130_v48 = vadd.f32 1.0, %v2551_v41 }
 0x449   :  { %v1136_v49 = vadd.f32 1.0, %v2553_v45  ;;  %v2555_v51 = vpop.eup %2554 }
 0x44a   :  { %2558 = vrcp.f32 %v1130_v48  ;;  %v2557_v53 = vpop.eup %2556  ;;  %v1143_v62 = vadd.f32 1.0, %v2555_v51 }
 0x44b   :  { %2560 = vrcp.f32 %v1136_v49 }
 0x44c   :  { %2562 = vrcp.f32 %v1143_v62 }
 0x454   :  { %v2559_v55 = vpop.eup %2558 }
 0x455   :  { %v2561_v57 = vpop.eup %2560  ;;  %v1147_v59 = vmul.f32 %v2559_v55, %v2557_v53 }
 0x456   :  { %v1146_v63 = vmul.f32 %v2561_v57, %v3067_v7  ;;  %v2563_v12 = vpop.eup %2562 }
 0x458   :  { %v3109_v3 = vadd.f32 %v1147_v59, %v1146_v63 }
 0x45a   :  { %2564 = vtanh.f32 %v3109_v3 }
 0x464   :  { %v2565_v13 = vpop.eup %2564 }
 0x465   :  { %v1150_v18 = vmul.f32 %v2565_v13, %v2563_v12 }
 0x467   :  { %1221 = vmatmul.mubr.f32.vlgmr.msra.gmra.mrb[8].mxu0 %v1150_v18  ;;  %1292 = vmatmul.mubr.f32.vlgmr.msra.gmra.mrb[8].mxu1 %v1150_v18 }
 0x468   :  { %2240 = vmatpush1.bf16.msra.mxu0 %v2806_v22  ;;  %2272 = vmatpush1.bf16.msra.mxu1 %v2809_v25 }
 0x469   :  { %2242 = vmatprep.subr.bf16.mxu0 %v2813_v29  ;;  %2274 = vmatprep.subr.bf16.mxu1 %v2817_v34 }
 0x46a   :  { %1395 = vmatprep.mubr.f32.mxu0 %v2731_v0  ;;  %1466 = vmatprep.mubr.f32.mxu1 %v2731_v0 }
 0x46c   :  { %2244 = vmatpush1.bf16.msra.mxu0 %v2819_v35  ;;  %2276 = vmatpush1.bf16.msra.mxu1 %v2823_v38 }
 0x46d   :  { %2246 = vmatprep.subr.bf16.mxu0 %v2827_v42  ;;  %2278 = vmatprep.subr.bf16.mxu1 %v2831_v47 }
 0x470   :  { %2248 = vmatpush1.bf16.msra.mxu0 %v2835_v50  ;;  %2280 = vmatpush1.bf16.msra.mxu1 %v2839_v54 }
 0x471   :  { %2250 = vmatprep.subr.bf16.mxu0 %v2843_v58  ;;  %2282 = vmatprep.subr.bf16.mxu1 %v2847_v61 }
 0x474   :  { %2252 = vmatpush1.bf16.msra.mxu0 %v2851_v2  ;;  %2284 = vmatpush1.bf16.msra.mxu1 %v2855_v5 }
 0x475   :  { %2254 = vmatprep.subr.bf16.mxu0 %v2859_v8  ;;  %2286 = vmatprep.subr.bf16.mxu1 %v2863_v11 }
 0x478   :  { %2256 = vmatpush1.bf16.msra.mxu0 %v2867_v15  ;;  %2288 = vmatpush1.bf16.msra.mxu1 %v2871_v19 }
 0x479   :  { %2258 = vmatprep.subr.bf16.mxu0 %v2875_v24  ;;  %2290 = vmatprep.subr.bf16.mxu1 %v2879_v28 }
 0x47c   :  { %2260 = vmatpush1.bf16.msra.mxu0 %v2883_v33  ;;  %2292 = vmatpush1.bf16.msra.mxu1 %v2887_v39 }
 0x47d   :  { %2262 = vmatprep.subr.bf16.mxu0 %v2891_v43  ;;  %2294 = vmatprep.subr.bf16.mxu1 %v2895_v46 }
 0x480   :  { %2264 = vmatpush1.bf16.msra.mxu0 %v2899_v52  ;;  %2296 = vmatpush1.bf16.msra.mxu1 %v2903_v56 }
 0x481   :  { %2266 = vmatprep.subr.bf16.mxu0 %v2907_v60  ;;  %2298 = vmatprep.subr.bf16.mxu1 %v2911_v1 }
 0x484   :  { %2268 = vmatpush1.bf16.msra.mxu0 %v2915_v4  ;;  %2300 = vmatpush1.bf16.msra.mxu1 %v2919_v6 }
 0x485   :  { %2302 = vmatprep.subr.bf16.mxu0 %v2802_v17  ;;  %2334 = vmatprep.subr.bf16.mxu1 %v2804_v21 }
 0x53a   :  { %v1222_v7 = vpop.f32.mrb[8].mxu0  ;;  %v1293_v9 = vpop.f32.mrb[8].mxu1 }
 0x53b   :  { %v2437_v10 = vadd.f32 %v1222_v7, %v2971_v14  ;;  %v1224_v20 = vpop.f32.mrb[9].mxu0  ;;  %v1295_v23 = vpop.f32.mrb[9].mxu1  ;;  %v2453_v36 = vadd.f32 %v1293_v9, %v2980_v44 }
 0x53c   :  { %v2438_v26 = vadd.f32 %v1224_v20, %v2973_v16  ;;  %v2454_v31 = vadd.f32 %v1295_v23, %v2977_v37 }
 0x53d   :  { %v1897_v27 = vmul.f32 -1.442695, %v2437_v10 }
 0x53e   :  { %v1898_v30 = vmul.f32 -1.442695, %v2438_v26  ;;  %v1899_v32 = vmul.f32 -1.442695, %v2454_v31 }
 0x53f   :  { %2566 = vpow2.f32 %v1897_v27 }
 0x540   :  { %2568 = vpow2.f32 %v1898_v30 }
 0x541   :  { %2570 = vpow2.f32 %v1899_v32 }
 0x542   :  { %2572 = vtanh.f32 %v2453_v36 }
 0x549   :  { %v2567_v40 = vpop.eup %2566 }
 0x54a   :  { %v2569_v41 = vpop.eup %2568  ;;  %v1305_v45 = vadd.f32 1.0, %v2567_v40 }
 0x54b   :  { %v1311_v48 = vadd.f32 1.0, %v2569_v41  ;;  %v2571_v49 = vpop.eup %2570 }
 0x54c   :  { %2574 = vrcp.f32 %v1305_v45  ;;  %v2573_v51 = vpop.eup %2572  ;;  %v1318_v59 = vadd.f32 1.0, %v2571_v49 }
 0x54d   :  { %2576 = vrcp.f32 %v1311_v48 }
 0x54e   :  { %2578 = vrcp.f32 %v1318_v59 }
 0x556   :  { %v2575_v53 = vpop.eup %2574 }
 0x557   :  { %v2577_v55 = vpop.eup %2576  ;;  %v1322_v57 = vmul.f32 %v2575_v53, %v2573_v51 }
 0x558   :  { %v1321_v62 = vmul.f32 %v2577_v55, %v3109_v3  ;;  %v2579_v12 = vpop.eup %2578 }
 0x55a   :  { %v3151_v63 = vadd.f32 %v1322_v57, %v1321_v62 }
 0x55c   :  { %2580 = vtanh.f32 %v3151_v63 }
 0x566   :  { %v2581_v13 = vpop.eup %2580 }
 0x567   :  { %v1325_v18 = vmul.f32 %v2581_v13, %v2579_v12 }
 0x569   :  { %1396 = vmatmul.mubr.f32.vlgmr.msra.gmra.mrb[10].mxu0 %v1325_v18  ;;  %1467 = vmatmul.mubr.f32.vlgmr.msra.gmra.mrb[10].mxu1 %v1325_v18 }
 0x56a   :  { %2304 = vmatpush1.bf16.msra.mxu0 %v2806_v22  ;;  %2336 = vmatpush1.bf16.msra.mxu1 %v2809_v25 }
 0x56b   :  { %2306 = vmatprep.subr.bf16.mxu0 %v2813_v29  ;;  %2338 = vmatprep.subr.bf16.mxu1 %v2817_v34 }
 0x56c   :  { %1570 = vmatprep.mubr.f32.mxu0 %v2731_v0  ;;  %1641 = vmatprep.mubr.f32.mxu1 %v2731_v0 }
 0x56e   :  { %2308 = vmatpush1.bf16.msra.mxu0 %v2819_v35  ;;  %2340 = vmatpush1.bf16.msra.mxu1 %v2823_v38 }
 0x56f   :  { %2310 = vmatprep.subr.bf16.mxu0 %v2827_v42  ;;  %2342 = vmatprep.subr.bf16.mxu1 %v2831_v47 }
 0x572   :  { %2312 = vmatpush1.bf16.msra.mxu0 %v2835_v50  ;;  %2344 = vmatpush1.bf16.msra.mxu1 %v2839_v54 }
 0x573   :  { %2314 = vmatprep.subr.bf16.mxu0 %v2843_v58  ;;  %2346 = vmatprep.subr.bf16.mxu1 %v2847_v61 }
 0x576   :  { %2316 = vmatpush1.bf16.msra.mxu0 %v2851_v2  ;;  %2348 = vmatpush1.bf16.msra.mxu1 %v2855_v5 }
 0x577   :  { %2318 = vmatprep.subr.bf16.mxu0 %v2859_v8  ;;  %2350 = vmatprep.subr.bf16.mxu1 %v2863_v11 }
 0x57a   :  { %2320 = vmatpush1.bf16.msra.mxu0 %v2867_v15  ;;  %2352 = vmatpush1.bf16.msra.mxu1 %v2871_v19 }
 0x57b   :  { %2322 = vmatprep.subr.bf16.mxu0 %v2875_v24  ;;  %2354 = vmatprep.subr.bf16.mxu1 %v2879_v28 }
 0x57e   :  { %2324 = vmatpush1.bf16.msra.mxu0 %v2883_v33  ;;  %2356 = vmatpush1.bf16.msra.mxu1 %v2887_v39 }
 0x57f   :  { %2326 = vmatprep.subr.bf16.mxu0 %v2891_v43  ;;  %2358 = vmatprep.subr.bf16.mxu1 %v2895_v46 }
 0x582   :  { %2328 = vmatpush1.bf16.msra.mxu0 %v2899_v52  ;;  %2360 = vmatpush1.bf16.msra.mxu1 %v2903_v56 }
 0x583   :  { %2330 = vmatprep.subr.bf16.mxu0 %v2907_v60  ;;  %2362 = vmatprep.subr.bf16.mxu1 %v2911_v1 }
 0x586   :  { %2332 = vmatpush1.bf16.msra.mxu0 %v2915_v4  ;;  %2364 = vmatpush1.bf16.msra.mxu1 %v2919_v6 }
 0x587   :  { %2366 = vmatprep.subr.bf16.mxu0 %v2802_v17  ;;  %2398 = vmatprep.subr.bf16.mxu1 %v2804_v21 }
 0x63c   :  { %v1397_v3 = vpop.f32.mrb[10].mxu0  ;;  %v1468_v7 = vpop.f32.mrb[10].mxu1 }
 0x63d   :  { %v2439_v9 = vadd.f32 %v1397_v3, %v2971_v14  ;;  %v1399_v10 = vpop.f32.mrb[11].mxu0  ;;  %v1470_v20 = vpop.f32.mrb[11].mxu1  ;;  %v2455_v32 = vadd.f32 %v1468_v7, %v2980_v44 }
 0x63e   :  { %v2440_v23 = vadd.f32 %v1399_v10, %v2973_v16  ;;  %v2456_v30 = vadd.f32 %v1470_v20, %v2977_v37 }
 0x63f   :  { %v1900_v26 = vmul.f32 -1.442695, %v2439_v9 }
 0x640   :  { %v1901_v27 = vmul.f32 -1.442695, %v2440_v23  ;;  %v1902_v31 = vmul.f32 -1.442695, %v2456_v30 }
 0x641   :  { %2582 = vpow2.f32 %v1900_v26 }
 0x642   :  { %2584 = vpow2.f32 %v1901_v27 }
 0x643   :  { %2586 = vpow2.f32 %v1902_v31 }
 0x644   :  { %2588 = vtanh.f32 %v2455_v32 }
 0x64b   :  { %v2583_v17 = vpop.eup %2582 }
 0x64c   :  { %v2585_v36 = vpop.eup %2584  ;;  %v1480_v21 = vadd.f32 1.0, %v2583_v17 }
 0x64d   :  { %v1486_v40 = vadd.f32 1.0, %v2585_v36  ;;  %v2587_v41 = vpop.eup %2586 }
 0x64e   :  { %2590 = vrcp.f32 %v1480_v21  ;;  %v2589_v45 = vpop.eup %2588  ;;  %v1493_v53 = vadd.f32 1.0, %v2587_v41 }
 0x64f   :  { %2592 = vrcp.f32 %v1486_v40 }
 0x650   :  { %2594 = vrcp.f32 %v1493_v53 }
 0x658   :  { %v2591_v48 = vpop.eup %2590 }
 0x659   :  { %v2593_v49 = vpop.eup %2592  ;;  %v1497_v51 = vmul.f32 %v2591_v48, %v2589_v45 }
 0x65a   :  { %v1496_v55 = vmul.f32 %v2593_v49, %v3151_v63  ;;  %v2595_v59 = vpop.eup %2594 }
 0x65c   :  { %v3193_v57 = vadd.f32 %v1497_v51, %v1496_v55 }
 0x65e   :  { %2596 = vtanh.f32 %v3193_v57 }
 0x668   :  { %v2597_v62 = vpop.eup %2596 }
 0x669   :  { %v1500_v12 = vmul.f32 %v2597_v62, %v2595_v59 }
 0x66b   :  { %1571 = vmatmul.mubr.f32.vlgmr.msra.gmra.mrb[12].mxu0 %v1500_v12  ;;  %1642 = vmatmul.mubr.f32.vlgmr.msra.gmra.mrb[12].mxu1 %v1500_v12 }
 0x66c   :  { %2368 = vmatpush1.bf16.msra.mxu0 %v2806_v22  ;;  %2400 = vmatpush1.bf16.msra.mxu1 %v2809_v25 }
 0x66d   :  { %2370 = vmatprep.subr.bf16.mxu0 %v2813_v29  ;;  %2402 = vmatprep.subr.bf16.mxu1 %v2817_v34 }
 0x66e   :  { %1745 = vmatprep.mubr.f32.mxu0 %v2731_v0  ;;  %1816 = vmatprep.mubr.f32.mxu1 %v2731_v0 }
 0x670   :  { %2372 = vmatpush1.bf16.msra.mxu0 %v2819_v35  ;;  %2404 = vmatpush1.bf16.msra.mxu1 %v2823_v38 }
 0x671   :  { %2374 = vmatprep.subr.bf16.mxu0 %v2827_v42  ;;  %2406 = vmatprep.subr.bf16.mxu1 %v2831_v47 }
 0x674   :  { %2376 = vmatpush1.bf16.msra.mxu0 %v2835_v50  ;;  %2408 = vmatpush1.bf16.msra.mxu1 %v2839_v54 }
 0x675   :  { %2378 = vmatprep.subr.bf16.mxu0 %v2843_v58  ;;  %2410 = vmatprep.subr.bf16.mxu1 %v2847_v61 }
 0x678   :  { %2380 = vmatpush1.bf16.msra.mxu0 %v2851_v2  ;;  %2412 = vmatpush1.bf16.msra.mxu1 %v2855_v5 }
 0x679   :  { %2382 = vmatprep.subr.bf16.mxu0 %v2859_v8  ;;  %2414 = vmatprep.subr.bf16.mxu1 %v2863_v11 }
 0x67c   :  { %2384 = vmatpush1.bf16.msra.mxu0 %v2867_v15  ;;  %2416 = vmatpush1.bf16.msra.mxu1 %v2871_v19 }
 0x67d   :  { %2386 = vmatprep.subr.bf16.mxu0 %v2875_v24  ;;  %2418 = vmatprep.subr.bf16.mxu1 %v2879_v28 }
 0x680   :  { %2388 = vmatpush1.bf16.msra.mxu0 %v2883_v33  ;;  %2420 = vmatpush1.bf16.msra.mxu1 %v2887_v39 }
 0x681   :  { %2390 = vmatprep.subr.bf16.mxu0 %v2891_v43  ;;  %2422 = vmatprep.subr.bf16.mxu1 %v2895_v46 }
 0x684   :  { %2392 = vmatpush1.bf16.msra.mxu0 %v2899_v52  ;;  %2424 = vmatpush1.bf16.msra.mxu1 %v2903_v56 }
 0x685   :  { %2394 = vmatprep.subr.bf16.mxu0 %v2907_v60  ;;  %2426 = vmatprep.subr.bf16.mxu1 %v2911_v1 }
 0x688   :  { %2396 = vmatpush1.bf16.msra.mxu0 %v2915_v4  ;;  %2428 = vmatpush1.bf16.msra.mxu1 %v2919_v6 }
 0x73e   :  { %v1572_v0 = vpop.f32.mrb[12].mxu0  ;;  %v1643_v22 = vpop.f32.mrb[12].mxu1 }
 0x73f   :  { %v2441_v25 = vadd.f32 %v1572_v0, %v2971_v14  ;;  %v1574_v29 = vpop.f32.mrb[13].mxu0  ;;  %v1645_v34 = vpop.f32.mrb[13].mxu1  ;;  %v2457_v54 = vadd.f32 %v1643_v22, %v2980_v44 }
 0x740   :  { %v2442_v35 = vadd.f32 %v1574_v29, %v2973_v16  ;;  %v2458_v47 = vadd.f32 %v1645_v34, %v2977_v37 }
 0x741   :  { %v1903_v38 = vmul.f32 -1.442695, %v2441_v25 }
 0x742   :  { %v1904_v42 = vmul.f32 -1.442695, %v2442_v35  ;;  %v1905_v50 = vmul.f32 -1.442695, %v2458_v47 }
 0x743   :  { %2598 = vpow2.f32 %v1903_v38 }
 0x744   :  { %2600 = vpow2.f32 %v1904_v42 }
 0x745   :  { %2602 = vpow2.f32 %v1905_v50 }
 0x746   :  { %2604 = vtanh.f32 %v2457_v54 }
 0x74d   :  { %v2599_v58 = vpop.eup %2598 }
 0x74e   :  { %v2601_v61 = vpop.eup %2600  ;;  %v1655_v2 = vadd.f32 1.0, %v2599_v58 }
 0x74f   :  { %v1661_v5 = vadd.f32 1.0, %v2601_v61  ;;  %v2603_v8 = vpop.eup %2602 }
 0x750   :  { %2606 = vrcp.f32 %v1655_v2  ;;  %v2605_v11 = vpop.eup %2604  ;;  %v1668_v28 = vadd.f32 1.0, %v2603_v8 }
 0x751   :  { %2608 = vrcp.f32 %v1661_v5 }
 0x752   :  { %2610 = vrcp.f32 %v1668_v28 }
 0x75a   :  { %v2607_v15 = vpop.eup %2606 }
 0x75b   :  { %v2609_v19 = vpop.eup %2608  ;;  %v1672_v24 = vmul.f32 %v2607_v15, %v2605_v11 }
 0x75c   :  { %v1671_v33 = vmul.f32 %v2609_v19, %v3193_v57  ;;  %v2611_v43 = vpop.eup %2610 }
 0x75e   :  { %v1673_v39 = vadd.f32 %v1672_v24, %v1671_v33 }
 0x760   :  { %2612 = vtanh.f32 %v1673_v39 }
 0x76a   :  { %v2613_v46 = vpop.eup %2612 }
 0x76b   :  { %v1675_v52 = vmul.f32 %v2613_v46, %v2611_v43 }
 0x76d   :  { %1746 = vmatmul.mubr.f32.vlgmr.msra.gmra.mrb[14].mxu0 %v1675_v52  ;;  %1817 = vmatmul.mubr.f32.vlgmr.msra.gmra.mrb[14].mxu1 %v1675_v52 }
 0x840   :  { %v1747_v56 = vpop.f32.mrb[14].mxu0  ;;  %v1818_v60 = vpop.f32.mrb[14].mxu1 }
 0x841   :  { %v2443_v1 = vadd.f32 %v1747_v56, %v2971_v14  ;;  %v1749_v4 = vpop.f32.mrb[15].mxu0  ;;  %v1820_v6 = vpop.f32.mrb[15].mxu1  ;;  %v2459_v9 = vadd.f32 %v1818_v60, %v2980_v44 }
 0x842   :  { %v2444_v63 = vadd.f32 %v1749_v4, %v2973_v16  ;;  %v2460_v3 = vadd.f32 %v1820_v6, %v2977_v37 }
 0x843   :  { %v1906_v13 = vmul.f32 -1.442695, %v2443_v1 }
 0x844   :  { %v1907_v18 = vmul.f32 -1.442695, %v2444_v63  ;;  %v1908_v7 = vmul.f32 -1.442695, %v2460_v3 }
 0x845   :  { %2614 = vpow2.f32 %v1906_v13 }
 0x846   :  { %2616 = vpow2.f32 %v1907_v18 }
 0x847   :  { %2618 = vpow2.f32 %v1908_v7 }
 0x848   :  { %2620 = vtanh.f32 %v2459_v9 }
 0x84f   :  { %v2615_v10 = vpop.eup %2614 }
 0x850   :  { %v2617_v20 = vpop.eup %2616  ;;  %v1830_v23 = vadd.f32 1.0, %v2615_v10 }
 0x851   :  { %v1836_v26 = vadd.f32 1.0, %v2617_v20  ;;  %v2619_v14 = vpop.eup %2618 }
 0x852   :  { %2622 = vrcp.f32 %v1830_v23  ;;  %v2621_v27 = vpop.eup %2620  ;;  %v1843_v32 = vadd.f32 1.0, %v2619_v14 }
 0x853   :  { %2624 = vrcp.f32 %v1836_v26 }
 0x854   :  { %2626 = vrcp.f32 %v1843_v32 }
 0x85c   :  { %v2623_v16 = vpop.eup %2622 }
 0x85d   :  { %v2625_v30 = vpop.eup %2624  ;;  %v1847_v31 = vmul.f32 %v2623_v16, %v2621_v27 }
 0x85e   :  { %v1846_v17 = vmul.f32 %v2625_v30, %v1673_v39  ;;  %v2627_v37 = vpop.eup %2626 }
 0x860   :  { %v1848_v36 = vadd.f32 %v1847_v31, %v1846_v17 }
 0x862   :  { %2628 = vtanh.f32 %v1848_v36 }
 0x86c   :  { %v2629_v44 = vpop.eup %2628 }
 0x86d   :  { %v1850_v21 = vmul.f32 %v2629_v44, %v2627_v37 }
 0x86f   :  { %1851 = vst [vmem:[#allocation10] sm:$0xff] %v1850_v21 }
 0x870   :  { %2707 = shalt.err (!%p2704_p0)
}
 0x871   :  { %s2708_s6 = scalar_lea.hbm %s3253_s4, 128 }
 0x872   :  { %p2709_p1 = scmp.ne.s32.totalorder %s3253_s4, %s2708_s6  ;;  %p2712_p2 = scmp.lt.u32.totalorder %s2708_s6, %s3253_s4 }
 0x874   :  { %p2714_p3 = pnand %p2712_p2, %p2709_p1 }
 0x876   :  { %2717 = shalt.err (!%p2714_p3)
}
 0x877   :  { %1862 = dma.vmem_to_hbm [thread:$0]  %s1860_s26, 128, %s3253_s4, [#allocation6]  }
 0x878   :  { %2722 = dma.done.wait [#allocation6], 128  }
 0x879   :  { %2723 = vsyncadd [#allocation6], 4294967168 }
 0x87a   :  { %1866 = vsyncpa [#allocation5], 1 }
 0x87b   :  { %1867 = vsyncpa [#allocation8], 1 }
 0x87c   :  { %1868 = vsyncpa [#allocation6], 1 }

</bundles_post_ra>
